<compile_context>
chip_gen: v7x
topology: tpu7x:2x2x1
jax: 0.10.0
libtpu: 0.0.40
codegen_flags: <defaults>
</compile_context>

<pallas_src>
import functools

import jax
import jax.numpy as jnp
from jax.experimental import pallas as pl
from jax.experimental.pallas import tpu as pltpu

ENC_STRIDE = 32     # overall stride of efficientnet_b3 last feature map
ENC_FEATURES = 384  # feature_info[-1]['num_chs'] for efficientnet_b3

# Scoped-VMEM limit: <= 48 MiB is safe on v7x (64 MiB physical) and leaves
# large headroom on v5e/v6e (128 MiB physical).
_VMEM_LIMIT = 48 * 1024 * 1024
# Per-grid-step live-set budget used when picking the row tile.
_TILE_BUDGET = 32 * 1024 * 1024


def _round_up(x, m):
    return ((x + m - 1) // m) * m


def _pick_tile(dim, pref, align=8):
    """Largest tile <= pref that divides `dim` and is a multiple of `align`."""
    if dim <= pref:
        return dim
    t = (pref // align) * align
    while t >= align:
        if dim % t == 0:
            return t
        t -= align
    return dim


def _pick_row_tile(M, CK, Kp):
    """Row tile for Kernel A: VMEM-budgeted, >= 2 tiles when M >= 16."""
    resident = 2 * (CK * ENC_FEATURES + ENC_FEATURES * Kp) * 2   # bf16 weights, 2 bufs
    per_row = 2 * (CK + Kp) * 2                                   # bf16 patch row + out row, 2 bufs
    cap = max(8, (_TILE_BUDGET - resident) // per_row)
    cap = max(8, (cap // 8) * 8)
    tm = min(1024, cap)
    if M < 16:
        return min(tm, _round_up(M, 8))
    # At least two row tiles so the "parallel" axis can shard across the two
    # TensorCores of a v7x chip.
    half = _round_up((M + 1) // 2, 8)
    return max(8, min(tm, half))


# ----------------------------------------------------------------------------
# Kernel A: fused encoder (patch-embed matmul + bias + SiLU) + 1x1-conv decoder
#   One grid step = one row tile:
#     patches (tm, CK) @ enc_w (CK, F)  -> f32, + bias, SiLU
#     feat    (tm, F)  @ dec_w (F, Kp)  -> f32, + bias, store bf16 (lane-dense)
#   enc_w / dec_w / biases are fully VMEM-resident (constant index_map).
# ----------------------------------------------------------------------------
def _encoder_decoder_kernel(p_ref, w_ref, b_ref, dw_ref, db_ref, o_ref):
    z = jnp.dot(p_ref[...], w_ref[...],
                preferred_element_type=jnp.float32) + b_ref[...]
    feat = z * jax.nn.sigmoid(z)                                   # SiLU in f32
    logits = jnp.dot(feat.astype(dw_ref.dtype), dw_ref[...],
                     preferred_element_type=jnp.float32) + db_ref[...]
    o_ref[...] = logits.astype(o_ref.dtype)


def encoder_decoder(patches, enc_w, enc_b, dec_w, dec_b, *, tm):
    M, CK = patches.shape
    F = enc_w.shape[1]
    Kp = dec_w.shape[1]
    grid = (M // tm,)
    return pl.pallas_call(
        _encoder_decoder_kernel,
        out_shape=jax.ShapeDtypeStruct((M, Kp), jnp.bfloat16),
        grid_spec=pltpu.PrefetchScalarGridSpec(
            num_scalar_prefetch=0,
            grid=grid,
            in_specs=[
                pl.BlockSpec((tm, CK), lambda i: (i, 0)),
                pl.BlockSpec((CK, F), lambda i: (0, 0)),   # fully VMEM-resident
                pl.BlockSpec((1, F), lambda i: (0, 0)),
                pl.BlockSpec((F, Kp), lambda i: (0, 0)),
                pl.BlockSpec((1, Kp), lambda i: (0, 0)),
            ],
            out_specs=pl.BlockSpec((tm, Kp), lambda i: (i, 0)),
        ),
        compiler_params=pltpu.CompilerParams(
            dimension_semantics=("parallel",),
            vmem_limit_bytes=_VMEM_LIMIT),
    )(patches, enc_w, enc_b, dec_w, dec_b)


# ----------------------------------------------------------------------------
# Kernel B: bilinear upsample, align_corners=False, as two MXU matmuls.
#   l_ref  : (1, h, w)  low-res logits for one (n, class) slice (bf16)
#   mh_ref : (tH, h)    row-interpolation weights for this H tile (bf16)
#   mwt_ref: (w, W)     col-interpolation weights, transposed (bf16)
#   t_ref  : (h, W)     hoisted width-contraction scratch (bf16, per nk slice)
#   o_ref  : (1, tH, W) f32 output tile
# ----------------------------------------------------------------------------
def _bilinear_upsample_kernel(l_ref, mh_ref, mwt_ref, o_ref, t_ref):
    # Width contraction hoisted out of the H-tile loop: compute once per nk.
    @pl.when(pl.program_id(1) == 0)
    def _():
        t_ref[...] = jnp.dot(l_ref[0], mwt_ref[...],
                             preferred_element_type=jnp.float32).astype(t_ref.dtype)

    o_ref[0] = jnp.dot(mh_ref[...], t_ref[...],
                       preferred_element_type=jnp.float32)


def bilinear_upsample(l_nk, mh, mw_t, *, tH):
    NK, h, w = l_nk.shape
    H = mh.shape[0]
    W = mw_t.shape[1]
    grid = (NK, H // tH)
    return pl.pallas_call(
        _bilinear_upsample_kernel,
        out_shape=jax.ShapeDtypeStruct((NK, H, W), jnp.float32),
        grid_spec=pltpu.PrefetchScalarGridSpec(
            num_scalar_prefetch=0,
            grid=grid,
            in_specs=[
                pl.BlockSpec((1, h, w), lambda nk, i: (nk, 0, 0)),
                pl.BlockSpec((tH, h), lambda nk, i: (i, 0)),
                pl.BlockSpec((w, W), lambda nk, i: (0, 0)),
            ],
            out_specs=pl.BlockSpec((1, tH, W), lambda nk, i: (nk, i, 0)),
            scratch_shapes=[pltpu.VMEM((h, W), jnp.bfloat16)],
        ),
        compiler_params=pltpu.CompilerParams(
            # Axis 1 carries the hoisted width-contraction scratch, so it must
            # stay sequential; axis 0 (nk) is megacore-parallel.
            dimension_semantics=("parallel", "arbitrary"),
            vmem_limit_bytes=_VMEM_LIMIT),
    )(l_nk, mh, mw_t)


# ----------------------------------------------------------------------------
# Glue: interpolation matrices (exact PyTorch align_corners=False semantics),
# parameter init, forward.
# ----------------------------------------------------------------------------
def _bilinear_matrix(out_size, in_size):
    """(out_size, in_size) matrix M s.t. y = M @ x equals torch bilinear
    resize (align_corners=False, half-pixel centers) along one axis."""
    scale = in_size / out_size
    dst = jnp.arange(out_size, dtype=jnp.float32)
    src = (dst + 0.5) * scale - 0.5
    src = jnp.maximum(src, 0.0)                       # torch clamps negatives
    i0 = jnp.floor(src).astype(jnp.int32)
    i0 = jnp.clip(i0, 0, in_size - 1)
    i1 = jnp.clip(i0 + 1, 0, in_size - 1)
    w1 = src - i0.astype(jnp.float32)
    w0 = 1.0 - w1
    rows = jnp.arange(out_size)
    m = jnp.zeros((out_size, in_size), jnp.float32)
    m = m.at[rows, i0].add(w0)
    m = m.at[rows, i1].add(w1)
    return m


def init_params(key, in_chans, num_classes):
    k1, k2, k3, k4 = jax.random.split(key, 4)
    ck = ENC_STRIDE * ENC_STRIDE * in_chans
    enc_w = jax.random.normal(k1, (ck, ENC_FEATURES), jnp.float32) * (ck ** -0.5)
    enc_b = jax.random.normal(k2, (1, ENC_FEATURES), jnp.float32) * 0.01
    # torch Conv2d weight is (num_classes, 384, 1, 1); stored transposed as a
    # (384, num_classes) matmul matrix.
    dec_w = jax.random.normal(k3, (ENC_FEATURES, num_classes), jnp.float32) * (ENC_FEATURES ** -0.5)
    dec_b = jax.random.normal(k4, (1, num_classes), jnp.float32) * 0.01
    return dict(enc_w=enc_w, enc_b=enc_b, dec_w=dec_w, dec_b=dec_b)


@functools.partial(jax.jit, static_argnames=("num_classes",))
def efficientnet_b3_segmentation_forward(x_nchw, params, *, num_classes):
    N, C, H, W = x_nchw.shape
    S = ENC_STRIDE
    # TODO(synk): H and W must be multiples of 32; PyTorch's padded convs would
    # handle other sizes, the stand-in encoder does not.
    h, w = H // S, W // S
    K = num_classes
    M = N * h * w
    CK = S * S * C
    Kp = _round_up(max(K, 128), 128)      # lane-dense padded class dim

    # --- stride-32 patch extraction (once, in XLA); bf16 cast fused first so
    # the materialized copy is half the size.
    # TODO(synk): fully fusing this extraction into Kernel A needs a
    # non-rectangular window (C < 128 crosses the (8,128) layout) and is not
    # done here.
    x_nhwc = jnp.transpose(x_nchw.astype(jnp.bfloat16), (0, 2, 3, 1))
    patches = (x_nhwc.reshape(N, h, S, w, S, C)
                     .transpose(0, 1, 3, 2, 4, 5)
                     .reshape(M, CK))

    tm = _pick_row_tile(M, CK, Kp)
    M_pad = _round_up(M, tm)
    if M_pad > M:
        patches = jnp.pad(patches, ((0, M_pad - M), (0, 0)))

    enc_w = params["enc_w"].astype(jnp.bfloat16)
    enc_b = params["enc_b"]                                            # f32
    dec_w = jnp.pad(params["dec_w"], ((0, 0), (0, Kp - K))).astype(jnp.bfloat16)
    dec_b = jnp.pad(params["dec_b"], ((0, 0), (0, Kp - K)))            # f32

    # --- fused encoder + 1x1-conv decoder (single matmul per row tile)
    logits_pad = encoder_decoder(patches, enc_w, enc_b, dec_w, dec_b, tm=tm)  # (M_pad, Kp) bf16

    # --- bilinear upsample to (H, W), align_corners=False, separable matmuls
    mh = _bilinear_matrix(H, h).astype(jnp.bfloat16)        # (H, h)
    mw_t = _bilinear_matrix(W, w).T.astype(jnp.bfloat16)    # (w, W)
    l = (logits_pad[:M, :K]
         .reshape(N, h, w, K)
         .transpose(0, 3, 1, 2)
         .reshape(N * K, h, w))                             # tiny bf16 low-res array

    if H * W * 4 <= 8 * 1024 * 1024:
        tH = H                                              # whole image per step
    else:
        tH = _pick_tile(H, max(8, (4 * 1024 * 1024) // (W * 4)), align=8)
    out = bilinear_upsample(l, mh, mw_t, tH=tH)             # (N*K, H, W) f32
    return out.reshape(N, K, H, W)                          # NCHW


def _reference_forward(x_nchw, params, num_classes, *, match_kernel_bf16):
    """Pure-JAX reference.  With match_kernel_bf16=True it mirrors the
    kernels' bf16-operand / f32-accumulate numerics (including the bf16
    logits handoff and bf16 interpolation weights); otherwise it is the
    all-f32 (PyTorch-faithful) pipeline."""
    N, C, H, W = x_nchw.shape
    S = ENC_STRIDE
    h, w = H // S, W // S
    x_nhwc = jnp.transpose(x_nchw, (0, 2, 3, 1))
    patches = (x_nhwc.reshape(N, h, S, w, S, C)
                     .transpose(0, 1, 3, 2, 4, 5)
                     .reshape(N * h * w, S * S * C))
    enc_w, dec_w = params["enc_w"], params["dec_w"]
    mh = _bilinear_matrix(H, h)
    mw_t = _bilinear_matrix(W, w).T
    if match_kernel_bf16:
        patches = patches.astype(jnp.bfloat16).astype(jnp.float32)
        enc_w = enc_w.astype(jnp.bfloat16).astype(jnp.float32)
        dec_w = dec_w.astype(jnp.bfloat16).astype(jnp.float32)
    z = patches @ enc_w + params["enc_b"]
    feat = jax.nn.silu(z)
    if match_kernel_bf16:
        feat = feat.astype(jnp.bfloat16).astype(jnp.float32)
    logits = feat @ dec_w + params["dec_b"]
    if match_kernel_bf16:
        logits = logits.astype(jnp.bfloat16).astype(jnp.float32)
        mh = mh.astype(jnp.bfloat16).astype(jnp.float32)
        mw_t = mw_t.astype(jnp.bfloat16).astype(jnp.float32)
    l = (logits.reshape(N, h, w, num_classes)
               .transpose(0, 3, 1, 2)
               .reshape(N * num_classes, h, w))
    t = jnp.einsum("nhw,wW->nhW", l, mw_t)
    if match_kernel_bf16:
        t = t.astype(jnp.bfloat16).astype(jnp.float32)
    up = jnp.einsum("Hh,nhW->nHW", mh, t)
    return up.reshape(N, num_classes, H, W)


if __name__ == "__main__":
    # Small shapes consistent with the module: batch=2, 4 input channels,
    # 64x64 spatial (stride-32 encoder -> 2x2 feature map), 2 classes.
    N, C, H, W = 2, 4, 64, 64
    num_classes = 2

    key = jax.random.PRNGKey(0)
    kx, kp = jax.random.split(key)
    x = jax.random.normal(kx, (N, C, H, W), jnp.float32)
    params = init_params(kp, C, num_classes)

    out = efficientnet_b3_segmentation_forward(x, params, num_classes=num_classes)
    out = jax.block_until_ready(out)
    assert out.shape == (N, num_classes, H, W), out.shape

    # Tight check vs a reference matching the kernels' bf16-operand numerics,
    # loose check vs the all-f32 pipeline (budget: bf16 operand rounding over
    # a 4096-long contraction, bf16 logits handoff, bf16 bilinear weights).
    ref_match = _reference_forward(x, params, num_classes, match_kernel_bf16=True)
    ref_f32 = _reference_forward(x, params, num_classes, match_kernel_bf16=False)
    err_match = float(jnp.max(jnp.abs(out - ref_match)))
    err_f32 = float(jnp.max(jnp.abs(out - ref_f32)))
    assert err_match < 2e-2, f"mismatch vs bf16-matched reference: {err_match}"
    assert err_f32 < 8e-2, f"mismatch vs f32 reference: {err_f32}"

    print("KERNEL_OK")
</pallas_src>

<mosaic_0001>
module attributes {stable_mosaic.version = 11 : i64} {
  func.func private @main(%arg0: i32) attributes {dimension_semantics = [#tpu.dimension_semantics<core_parallel>], iteration_bounds = array<i64: 2>, tpu.core_type = #tpu.core_type<sc_scalar_subcore>, window_params = []} {
    return
  }
}

module attributes {stable_mosaic.version = 11 : i64} {
  func.func private @main(%arg0: i32) attributes {dimension_semantics = [#tpu.dimension_semantics<core_parallel>], iteration_bounds = array<i64: 2>, tpu.core_type = #tpu.core_type<sc_scalar_subcore>, window_params = []} {
    return
  }
}

module attributes {stable_mosaic.version = 11 : i64} {
  func.func @_encoder_decoder_kernel(%arg0: i32, %arg1: memref<8x4096xbf16, #tpu.memory_space<vmem>>, %arg2: memref<4096x384xbf16, #tpu.memory_space<vmem>>, %arg3: memref<1x384xf32, #tpu.memory_space<vmem>>, %arg4: memref<384x128xbf16, #tpu.memory_space<vmem>>, %arg5: memref<1x128xf32, #tpu.memory_space<vmem>>, %arg6: memref<8x128xbf16, #tpu.memory_space<vmem>>) attributes {dimension_semantics = [#tpu.dimension_semantics<parallel>], iteration_bounds = array<i64: 1>, scalar_prefetch = 0 : i64, scratch_operands = 0 : i64, tpu.core_type = #tpu.core_type<tc>, window_params = [{transform_indices = @transform_0, window_bounds = array<i64: 8, 4096>}, {pipeline_mode = #tpu.pipeline_mode<synchronous>, transform_indices = @transform_1, window_bounds = array<i64: 4096, 384>}, {pipeline_mode = #tpu.pipeline_mode<synchronous>, transform_indices = @transform_2, window_bounds = array<i64: 1, 384>}, {pipeline_mode = #tpu.pipeline_mode<synchronous>, transform_indices = @transform_3, window_bounds = array<i64: 384, 128>}, {pipeline_mode = #tpu.pipeline_mode<synchronous>, transform_indices = @transform_4, window_bounds = array<i64: 1, 128>}, {transform_indices = @transform_5, window_bounds = array<i64: 8, 128>}]} {
    %c0 = arith.constant 0 : index
    %c0_0 = arith.constant 0 : index
    %0 = vector.load %arg1[%c0, %c0_0] : memref<8x4096xbf16, #tpu.memory_space<vmem>>, vector<8x4096xbf16>
    %c0_1 = arith.constant 0 : index
    %c0_2 = arith.constant 0 : index
    %1 = vector.load %arg2[%c0_1, %c0_2] : memref<4096x384xbf16, #tpu.memory_space<vmem>>, vector<4096x384xbf16>
    %cst = arith.constant dense<0.000000e+00> : vector<8x384xf32>
    %2 = tpu.matmul %0, %1, %cst {dimension_numbers = #tpu.dot_dimension_numbers<[1], [0], [0], [1], [0, 0, 1, 1], [], []>} : vector<8x4096xbf16>, vector<4096x384xbf16>, vector<8x384xf32> -> vector<8x384xf32>
    %c0_3 = arith.constant 0 : index
    %c0_4 = arith.constant 0 : index
    %3 = vector.load %arg3[%c0_3, %c0_4] : memref<1x384xf32, #tpu.memory_space<vmem>>, vector<1x384xf32>
    %4 = vector.broadcast %3 : vector<1x384xf32> to vector<8x384xf32>
    %5 = arith.addf %2, %4 : vector<8x384xf32>
    %6 = arith.negf %5 : vector<8x384xf32>
    %7 = math.exp %6 : vector<8x384xf32>
    %cst_5 = arith.constant 1.000000e+00 : f32
    %8 = vector.broadcast %cst_5 : f32 to vector<8x384xf32>
    %9 = arith.addf %8, %7 : vector<8x384xf32>
    %10 = arith.divf %8, %9 : vector<8x384xf32>
    %11 = arith.mulf %5, %10 : vector<8x384xf32>
    %12 = arith.truncf %11 : vector<8x384xf32> to vector<8x384xbf16>
    %c0_6 = arith.constant 0 : index
    %c0_7 = arith.constant 0 : index
    %13 = vector.load %arg4[%c0_6, %c0_7] : memref<384x128xbf16, #tpu.memory_space<vmem>>, vector<384x128xbf16>
    %cst_8 = arith.constant dense<0.000000e+00> : vector<8x128xf32>
    %14 = tpu.matmul %12, %13, %cst_8 {dimension_numbers = #tpu.dot_dimension_numbers<[1], [0], [0], [1], [0, 0, 1, 1], [], []>} : vector<8x384xbf16>, vector<384x128xbf16>, vector<8x128xf32> -> vector<8x128xf32>
    %c0_9 = arith.constant 0 : index
    %c0_10 = arith.constant 0 : index
    %15 = vector.load %arg5[%c0_9, %c0_10] : memref<1x128xf32, #tpu.memory_space<vmem>>, vector<1x128xf32>
    %16 = vector.broadcast %15 : vector<1x128xf32> to vector<8x128xf32>
    %17 = arith.addf %14, %16 : vector<8x128xf32>
    %18 = arith.truncf %17 : vector<8x128xf32> to vector<8x128xbf16>
    %c0_11 = arith.constant 0 : index
    %c0_12 = arith.constant 0 : index
    %19 = vector.load %arg6[%c0_11, %c0_12] : memref<8x128xbf16, #tpu.memory_space<vmem>>, vector<8x128xbf16>
    tpu.vector_store %arg6[%c0_11, %c0_12], %18 {strides = array<i32>} : memref<8x128xbf16, #tpu.memory_space<vmem>>, vector<8x128xbf16>,
    return
  }
  func.func @transform_0(%arg0: i32) -> (i32, i32) {
    %c0_i32 = arith.constant 0 : i32
    %c0_i32_0 = arith.constant 0 : i32
    return %arg0, %c0_i32 : i32, i32
  }
  func.func @transform_1(%arg0: i32) -> (i32, i32) {
    %c0_i32 = arith.constant 0 : i32
    %c0_i32_0 = arith.constant 0 : i32
    %c0_i32_1 = arith.constant 0 : i32
    return %c0_i32, %c0_i32_0 : i32, i32
  }
  func.func @transform_2(%arg0: i32) -> (i32, i32) {
    %c0_i32 = arith.constant 0 : i32
    %c0_i32_0 = arith.constant 0 : i32
    %c0_i32_1 = arith.constant 0 : i32
    return %c0_i32, %c0_i32_0 : i32, i32
  }
  func.func @transform_3(%arg0: i32) -> (i32, i32) {
    %c0_i32 = arith.constant 0 : i32
    %c0_i32_0 = arith.constant 0 : i32
    %c0_i32_1 = arith.constant 0 : i32
    return %c0_i32, %c0_i32_0 : i32, i32
  }
  func.func @transform_4(%arg0: i32) -> (i32, i32) {
    %c0_i32 = arith.constant 0 : i32
    %c0_i32_0 = arith.constant 0 : i32
    %c0_i32_1 = arith.constant 0 : i32
    return %c0_i32, %c0_i32_0 : i32, i32
  }
  func.func @transform_5(%arg0: i32) -> (i32, i32) {
    %c0_i32 = arith.constant 0 : i32
    %c0_i32_0 = arith.constant 0 : i32
    return %arg0, %c0_i32 : i32, i32
  }
}

module attributes {stable_mosaic.version = 11 : i64} {
  func.func @_bilinear_upsample_kernel(%arg0: i32, %arg1: i32, %arg2: memref<1x2x2xbf16, #tpu.memory_space<vmem>>, %arg3: memref<64x2xbf16, #tpu.memory_space<vmem>>, %arg4: memref<2x64xbf16, #tpu.memory_space<vmem>>, %arg5: memref<1x64x64xf32, #tpu.memory_space<vmem>>, %arg6: memref<2x64xbf16, #tpu.memory_space<vmem>>) attributes {dimension_semantics = [#tpu.dimension_semantics<parallel>, #tpu.dimension_semantics<arbitrary>], iteration_bounds = array<i64: 4, 1>, scalar_prefetch = 0 : i64, scratch_operands = 1 : i64, tpu.core_type = #tpu.core_type<tc>, window_params = [{transform_indices = @transform_0, window_bounds = array<i64: 1, 2, 2>}, {transform_indices = @transform_1, window_bounds = array<i64: 64, 2>}, {pipeline_mode = #tpu.pipeline_mode<synchronous>, transform_indices = @transform_2, window_bounds = array<i64: 2, 64>}, {transform_indices = @transform_3, window_bounds = array<i64: 1, 64, 64>}]} {
    %c0_i32 = arith.constant 0 : i32
    %0 = arith.cmpi eq, %arg1, %c0_i32 : i32
    %1 = arith.extui %0 : i1 to i32
    %c0_i32_0 = arith.constant 0 : i32
    %2 = arith.cmpi ne, %1, %c0_i32_0 : i32
    scf.if %2 {
      %c0_7 = arith.constant 0 : index
      %c0_8 = arith.constant 0 : index
      %c0_9 = arith.constant 0 : index
      %9 = vector.load %arg2[%c0_7, %c0_8, %c0_9] : memref<1x2x2xbf16, #tpu.memory_space<vmem>>, vector<1x2x2xbf16>
      %10 = vector.shape_cast %9 : vector<1x2x2xbf16> to vector<2x2xbf16>
      %c0_10 = arith.constant 0 : index
      %c0_11 = arith.constant 0 : index
      %11 = vector.load %arg4[%c0_10, %c0_11] : memref<2x64xbf16, #tpu.memory_space<vmem>>, vector<2x64xbf16>
      %cst_12 = arith.constant dense<0.000000e+00> : vector<2x64xf32>
      %12 = tpu.matmul %10, %11, %cst_12 {dimension_numbers = #tpu.dot_dimension_numbers<[1], [0], [0], [1], [0, 0, 1, 1], [], []>} : vector<2x2xbf16>, vector<2x64xbf16>, vector<2x64xf32> -> vector<2x64xf32>
      %13 = arith.truncf %12 : vector<2x64xf32> to vector<2x64xbf16>
      %c0_13 = arith.constant 0 : index
      %c0_14 = arith.constant 0 : index
      %14 = vector.load %arg6[%c0_13, %c0_14] : memref<2x64xbf16, #tpu.memory_space<vmem>>, vector<2x64xbf16>
      tpu.vector_store %arg6[%c0_13, %c0_14], %13 {strides = array<i32>} : memref<2x64xbf16, #tpu.memory_space<vmem>>, vector<2x64xbf16>,
    } else {
    }
    %c0 = arith.constant 0 : index
    %c0_1 = arith.constant 0 : index
    %3 = vector.load %arg3[%c0, %c0_1] : memref<64x2xbf16, #tpu.memory_space<vmem>>, vector<64x2xbf16>
    %c0_2 = arith.constant 0 : index
    %c0_3 = arith.constant 0 : index
    %4 = vector.load %arg6[%c0_2, %c0_3] : memref<2x64xbf16, #tpu.memory_space<vmem>>, vector<2x64xbf16>
    %cst = arith.constant dense<0.000000e+00> : vector<64x64xf32>
    %5 = tpu.matmul %3, %4, %cst {dimension_numbers = #tpu.dot_dimension_numbers<[1], [0], [0], [1], [0, 0, 1, 1], [], []>} : vector<64x2xbf16>, vector<2x64xbf16>, vector<64x64xf32> -> vector<64x64xf32>
    %c0_4 = arith.constant 0 : index
    %c0_5 = arith.constant 0 : index
    %c0_6 = arith.constant 0 : index
    %6 = vector.load %arg5[%c0_4, %c0_5, %c0_6] : memref<1x64x64xf32, #tpu.memory_space<vmem>>, vector<1x64x64xf32>
    %7 = vector.shape_cast %6 : vector<1x64x64xf32> to vector<64x64xf32>
    %8 = vector.shape_cast %5 : vector<64x64xf32> to vector<1x64x64xf32>
    tpu.vector_store %arg5[%c0_4, %c0_5, %c0_6], %8 {strides = array<i32>} : memref<1x64x64xf32, #tpu.memory_space<vmem>>, vector<1x64x64xf32>,
    return
  }
  func.func @transform_0(%arg0: i32, %arg1: i32) -> (i32, i32, i32) {
    %c0_i32 = arith.constant 0 : i32
    %c0_i32_0 = arith.constant 0 : i32
    %c0_i32_1 = arith.constant 0 : i32
    return %arg0, %c0_i32, %c0_i32_0 : i32, i32, i32
  }
  func.func @transform_1(%arg0: i32, %arg1: i32) -> (i32, i32) {
    %c0_i32 = arith.constant 0 : i32
    %c0_i32_0 = arith.constant 0 : i32
    return %arg1, %c0_i32 : i32, i32
  }
  func.func @transform_2(%arg0: i32, %arg1: i32) -> (i32, i32) {
    %c0_i32 = arith.constant 0 : i32
    %c0_i32_0 = arith.constant 0 : i32
    %c0_i32_1 = arith.constant 0 : i32
    return %c0_i32, %c0_i32_0 : i32, i32
  }
  func.func @transform_3(%arg0: i32, %arg1: i32) -> (i32, i32, i32) {
    %c0_i32 = arith.constant 0 : i32
    %c0_i32_0 = arith.constant 0 : i32
    return %arg0, %arg1, %c0_i32 : i32, i32, i32
  }
}

</mosaic_0001>

<bundles_post_ra>
// kernel: efficientnet_b3_segmentation_forward.3
= control target key start
LH: loop header
LB: loop body
LE: loop exit
PB: predicated region body
PF: predicated region fallthrough
CT: control target
= control target key end

     0   :  { %8 = vsyncpa [#allocation4], 0  ;;  %s839_s0 = inlined_call_operand.vmem [shape: bf16[4,2,2], index: 0, kind: input, shape index: {}]   ;;  %s840_s1 = inlined_call_operand.vmem [shape: bf16[64,2], index: 1, kind: input, shape index: {}]   ;;  %s841_s2 = inlined_call_operand.vmem [shape: bf16[2,64], index: 2, kind: input, shape index: {}]   ;;  %s842_s3 = inlined_call_operand.hbm [shape: f32[4,64,64], index: 3, kind: output, shape index: {}]  }
   0x1   :  { %10 = vsyncpa [#allocation4 + $0x1], 0  ;;  %s693_s12 = smov 0   ;;  %s695_s13 = smov 0  }
   0x2   :  { %s697_s14 = smov 0   ;;  %s699_s15 = smov 0  }
   0x3   :  { %s701_s16 = smov 0   ;;  %s703_s17 = smov 0  }
   0x4 LB: > { %s479_s18 = sadd.s32 4294967295, %s666_s17   ;;  %s480_s19 = sadd.s32 4294967294, %s666_s17   ;;  %s666_s17 = sphi %s703_s17, %s16_s17   ;;  %s662_s16 = sphi %s701_s16, %s849_s16   ;;  %s658_s15 = sphi %s699_s15, %s848_s15   ;;  %s654_s14 = sphi %s697_s14, %s847_s14   ;;  %s650_s13 = sphi %s695_s13, %s846_s13   ;;  %s646_s12 = sphi %s693_s12, %s845_s12  }
   0x5   : > { %s28_s20 = sadd.s32 1, %s662_s16  ;;  %s110_s21 = sadd.s32 1, %s654_s14 }
   0x6   : > { %p30_p0 = scmp.ge.s32.totalorder %s28_s20, 4  ;;  %p120_p1 = scmp.ne.s32.totalorder %s654_s14, %s650_s13 }
   0x7   : > { %p121_p2 = scmp.eq.s32.totalorder %s479_s18, 3  ;;  %p126_p3 = scmp.ne.s32.totalorder %s650_s13, %s646_s12 }
   0x8   : > { %s851_s20 = smov (%p30_p0, %s28_s20), 0  ;;  %p127_p5 = scmp.eq.s32.totalorder %s480_s19, 3 }
   0x9   : > { %p733_p4 = por %p121_p2, %p120_p1  ;;  %s105_s23 = ssub.s32 %s662_s16, %s851_s20 }
   0xa   : > { %p484_p6 = scmp.ge.s32.totalorder %s666_s17, 1  ;;  %p108_p7 = scmp.eq.s32.totalorder %s105_s23, 0 }
   0xb   : > { %p740_p8 = por %p127_p5, %p126_p3  ;;  %p163_p9 = scmp.lt.s32.totalorder %s666_s17, 5 }
   0xc   : > { %s746_s25 = scalar_select %p108_p7, %s654_s14, %s110_s21  }
   0xd   : > { %p164_p10 = pnand %p484_p6, %p163_p9 }
   0xe   : > { %v206_v0 = vld [vmem:[%s841_s2] sm:$0x1] (!%p164_p10)  ;;  %vm211_vm0 = vcmask (!%p164_p10), 1040384   ;;  %p190_p11 = scmp.lt.s32.totalorder (!%p164_p10), %s658_s15, 3  ;;  %v668_v1 = vmov (!%p164_p10), 0.0   ;;  %vm669_vm1 = vmmov (!%p164_p10), 0  }
   0xf   : > { %167 = sbr.rel (%p164_p10) target bundleno = 490 (0x1ea), region = 32  ;;  %508 = vmatprep.subr.bf16.mxu0 (!%p164_p10), %v668_v1  ;;  %v213_v2 = vsel (!%p164_p10), %vm211_vm0, %v206_v0, 0  ;;  %510 = vmatprep.mubr.msk.bf16.mxu0 (!%p164_p10), %vm669_vm1, %v668_v1  ;;  %vm207_vm2 = vcmask (!%p164_p10), 15360   ;;  %v584_v4 = vld [vmem:[%s840_s1] sm:$0xff] (!%p164_p10)   ;;  %vm256_vm3 = vcmask (!%p164_p10), 516096   ;;  %v585_v12 = vld [vmem:[%s840_s1 + $0x8] sm:$0xff] (!%p164_p10)  }
  0x10   : > { %509 = vmatpush3.bf16.msra.mxu0 (!%p164_p10), %v213_v2  ;;  %516 = vmatprep.mubr.msk.bf16.mxu1 (!%p164_p10), %vm207_vm2, %v584_v4  ;;  %v586_v13 = vld [vmem:[%s840_s1 + $0x10] sm:$0xff] (!%p164_p10)   ;;  %v587_v14 = vld [vmem:[%s840_s1 + $0x18] sm:$0xff] (!%p164_p10)   ;;  %s187_s19 = sand.u32 (!%p164_p10), 1, %s650_s13   ;;  %vm369_vm4 = vcmask (!%p164_p10), 523264   ;;  %s500_s26 = sshll.u32 (!%p164_p10), %s658_s15, 10 }
  0x11   : > { %s485_s21 = sshll.u32 (!%p164_p10), %s187_s19, 6  ;;  %s786_s30 = scalar_lea.hbm (!%p164_p10), %s842_s3, %s500_s26 }
  0x12   : > { %s189_s23 = scalar_lea.vmem (!%p164_p10), [#allocation3], %s485_s21  ;;  %s670_s5 = smov (!%p164_p10), [#allocation3]  }
  0x13   : > { %s394_s27 = sshll.u32 (!%p164_p10), %s189_s23, 4  ;;  %s592_s6 = sshll.u32 (!%p164_p10), %s670_s5, 4  ;;  %s788_s27 = int_to_ptr.vmem [resolvable:$true] %s394_s27  ;;  %s593_s6 = int_to_ptr.vmem [resolvable:$false] %s592_s6 }
  0x14   : > { %s594_s7 = scalar_lea.vmem (!%p164_p10), %s593_s6, 2048  ;;  %p595_p1 = scmp.lt.s32.totalorder (!%p164_p10), %s788_s27, %s593_s6 }
  0x16   : > { %s191_s28 = scalar_select %p190_p11, %s658_s15, 3 }
  0x17   : > { %s793_s15 = scalar_lea.sflag [#allocation4], %s187_s19 }
  0x18   : > { %s192_s4 = scalar_lea.vmem %s839_s0, %s191_s28 }
  0x19   : > { %v205_v3 = vld [vmem:[%s192_s4] sm:$0x1]  ;;  %s588_s4 = scalar_lea.vmem %s788_s27, 1024 }
  0x1a   : > { %511 = vmatmul.mubr.msk.bf16.vlgmr.msra.gmra.mrb[0].mxu0 %vm207_vm2, %v205_v3  ;;  %p589_p12 = scmp.ne.s32.totalorder %s788_s27, %s588_s4  ;;  %p596_p2 = scmp.lt.s32.totalorder %s594_s7, %s588_s4 }
  0x1c   : > { %p590_p13 = pnand %p589_p12, %p733_p4  ;;  %p597_p3 = por %p596_p2, %p595_p1 }
  0x1e   : > { %p591_p0 = pneg %p590_p13 }
  0x20   : > { %p598_p5 = pnand %p597_p3, %p591_p0 }
  0xed   : > { %v249_v5 = vpop.f32.mrb[0].mxu0 }
  0xee   : > { %v255_v6 = vpack.c.bf16 %v249_v5, %v249_v5  ;;  %v512_v7 = vpop.f32.mrb[1].mxu0 }
  0xef   : > { %v252_v8 = vpop.f32.mrb[2].mxu0 }
  0xf0   : > { %257 = vst.msk [vmem:[#allocation2] sm:$0x1] %vm256_vm3, %v255_v6  ;;  %v513_v9 = vpop.f32.mrb[3].mxu0 }
  0xf7   : > { %v266_v10 = vld [vmem:[#allocation2] sm:$0x1] }
  0xf8   : > { %524 = vmatprep.subr.msk.bf16.mxu1 %vm211_vm0, %v266_v10  ;;  %v302_v11 = vsel %vm211_vm0, %v266_v10, 0 }
  0xf9   : > { %515 = vmatpush3.bf16.msra.mxu1 %v302_v11 }
  0xfc   : > { %517 = vmatmul.mubr.msk.bf16.vlgmr.msra.gmra.mrb[0].mxu1 %vm207_vm2, %v585_v12 }
  0xfd   : > { %520 = vmatprep.mubr.msk.bf16.mxu1 %vm207_vm2, %v586_v13 }
 0x104   : > { %521 = vmatmul.mubr.msk.bf16.gmra.mrb[4].mxu1 %vm207_vm2, %v587_v14 }
 0x1cf   : > { %v518_v15 = vpop.f32.mrb[0].mxu1 }
 0x1d0   : > { %372 = vst.msk [vmem:[%s189_s23 + $0x10] sm:$0xff] %vm369_vm4, %v518_v15  ;;  %v338_v16 = vpop.f32.mrb[1].mxu1 }
 0x1d1   : > { %370 = vst.msk [vmem:[%s189_s23] sm:$0xff] %vm369_vm4, %v338_v16  ;;  %v519_v17 = vpop.f32.mrb[2].mxu1 }
 0x1d2   : > { %373 = vst.msk [vmem:[%s189_s23 + $0x18] sm:$0xff] %vm369_vm4, %v519_v17  ;;  %v341_v18 = vpop.f32.mrb[3].mxu1 }
 0x1d3   : > { %371 = vst.msk [vmem:[%s189_s23 + $0x8] sm:$0xff] %vm369_vm4, %v341_v18 }
 0x1d7   : > { %v522_v19 = vpop.f32.mrb[4].mxu1 }
 0x1d8   : > { %376 = vst.msk [vmem:[%s189_s23 + $0x30] sm:$0xff] %vm369_vm4, %v522_v19  ;;  %v354_v20 = vpop.f32.mrb[5].mxu1 }
 0x1d9   : > { %374 = vst.msk [vmem:[%s189_s23 + $0x20] sm:$0xff] %vm369_vm4, %v354_v20  ;;  %v523_v21 = vpop.f32.mrb[6].mxu1 }
 0x1da   : > { %377 = vst.msk [vmem:[%s189_s23 + $0x38] sm:$0xff] %vm369_vm4, %v523_v21  ;;  %v357_v22 = vpop.f32.mrb[7].mxu1 }
 0x1db   : > { %375 = vst.msk [vmem:[%s189_s23 + $0x28] sm:$0xff] %vm369_vm4, %v357_v22 }
 0x1dc   : > { %601 = shalt.err (!%p598_p5)
}
 0x1dd   : > { %s602_s8 = scalar_lea.hbm %s786_s30, 1024  ;;  %s606_s11 = scalar_lea.hbm %s842_s3, 4096 }
 0x1de   : > { %p603_p6 = scmp.ne.s32.totalorder %s786_s30, %s602_s8  ;;  %p607_p10 = scmp.lt.u32.totalorder %s786_s30, %s842_s3 }
 0x1df   : > { %p608_p11 = scmp.lt.u32.totalorder %s606_s11, %s602_s8  ;;  %p610_p13 = scmp.lt.u32.totalorder %s602_s8, %s786_s30 }
 0x1e0   : > { %p604_p7 = pnand %p603_p6, %p733_p4 }
 0x1e1   : > { %p609_p12 = por %p608_p11, %p607_p10 }
 0x1e2   : > { %p605_p9 = pneg %p604_p7 }
 0x1e3   : > { %p611_p0 = por %p610_p13, %p609_p12 }
 0x1e5   : > { %p612_p1 = pnand %p611_p0, %p605_p9 }
 0x1e7   : > { %615 = shalt.err (!%p612_p1)
}
 0x1e8   : > { %s671_s21 = smov 128   ;;  %s672_s23 = smov 8  }
 0x1e9   : > { %525 = dma.vmem_to_hbm [thread:$0]  (%p733_p4), %s788_s27, 1024, %s786_s30, %s793_s15, %s671_s21, %s671_s21, %s672_s23  }
 0x1ea PF: > { %p531_p2 = scmp.ge.s32.totalorder %s666_s17, 2  ;;  %s409_s26 = sand.u32 1, %s646_s12  }
 0x1eb   : > { %s410_s28 = scalar_lea.sflag [#allocation4], %s409_s26 }
 0x1ec   : > { %p528_p3 = pnand %p531_p2, %p740_p8 }
 0x1ee   : > { %641 = dma.done.wait (!%p528_p3), %s410_s28, 1024  }
 0x1ef   : > { %643 = vsyncadd (!%p528_p3), %s410_s28, 4294966272  ;;  %s16_s17 = sadd.s32 1, %s666_s17   ;;  %s845_s12 = smov %s650_s13 }
 0x1f0   : > { %p13_p5 = scmp.ge.s32.totalorder %s16_s17, 6   ;;  %s846_s13 = smov %s654_s14 }
 0x1f1   : > { %s847_s14 = smov %s746_s25  ;;  %s848_s15 = smov %s662_s16 }
 0x1f2   : > { %s849_s16 = smov %s851_s20  ;;  %15 = sbr.rel (!%p13_p5) target bundleno = 4 (0x4), region = 74 }
 0x1f9   :  { %415 = vsyncpa [#allocation4], 1 }
 0x1fa   :  { %417 = vsyncpa [#allocation4 + $0x1], 1 }

// kernel: efficientnet_b3_segmentation_forward.2
= control target key start
LH: loop header
LB: loop body
LE: loop exit
PB: predicated region body
PF: predicated region fallthrough
CT: control target
= control target key end

     0   :  { %vm9278_vm0 = vmmov 0   ;;  %s11994_s1 = inlined_call_operand.vmem [shape: bf16[4096,384], index: 1, kind: input, shape index: {}]   ;;  %s11995_s0 = inlined_call_operand.vmem [shape: bf16[8,4096], index: 0, kind: input, shape index: {}]   ;;  %s11996_s2 = inlined_call_operand.vmem [shape: f32[1,384], index: 2, kind: input, shape index: {}]   ;;  %s11997_s3 = inlined_call_operand.vmem [shape: bf16[384,128], index: 3, kind: input, shape index: {}]   ;;  %s11998_s4 = inlined_call_operand.vmem [shape: f32[1,128], index: 4, kind: input, shape index: {}]   ;;  %s11999_s5 = inlined_call_operand.vmem [shape: bf16[8,128], index: 5, kind: output, shape index: {}]  }
   0x1   :  { %v8184_v0 = vld [vmem:[%s11994_s1 + $0x4] ss:$12 sps:$4 sm:$0xff]   ;;  %v8188_v2 = vld [vmem:[%s11994_s1] ss:$12 sps:$4 sm:$0xff]   ;;  %v8190_v4 = vld [vmem:[%s11994_s1 + $0x1c] ss:$12 sps:$4 sm:$0xff]  }
   0x2   :  { %v8186_v1 = vld [vmem:[%s11994_s1 + $0x484] ss:$12 sps:$4 sm:$0xff]   ;;  %5286 = vmatprep.subr.bf16.mxu1 %v8184_v0  ;;  %v8189_v3 = vld [vmem:[%s11994_s1 + $0x480] ss:$12 sps:$4 sm:$0xff]   ;;  %v8192_v5 = vld [vmem:[%s11994_s1 + $0x49c] ss:$12 sps:$4 sm:$0xff]  }
   0x3   :  { %5409 = vmatprep.subr.bf16.mxu0 %v8186_v1  ;;  %5287 = vmatpush1.bf16.msra.mxu1 %v8188_v2  ;;  %v8194_v6 = vld [vmem:[%s11994_s1 + $0x18] ss:$12 sps:$4 sm:$0xff]   ;;  %v8196_v8 = vld [vmem:[%s11994_s1 + $0x34] ss:$12 sps:$4 sm:$0xff]   ;;  %v8200_v10 = vld [vmem:[%s11994_s1 + $0x30] ss:$12 sps:$4 sm:$0xff]  }
   0x4   :  { %5410 = vmatpush1.bf16.msra.mxu0 %v8189_v3  ;;  %5288 = vmatprep.subr.bf16.mxu1 %v8190_v4  ;;  %v8195_v7 = vld [vmem:[%s11994_s1 + $0x498] ss:$12 sps:$4 sm:$0xff]   ;;  %v8198_v9 = vld [vmem:[%s11994_s1 + $0x4b4] ss:$12 sps:$4 sm:$0xff]   ;;  %v8201_v11 = vld [vmem:[%s11994_s1 + $0x4b0] ss:$12 sps:$4 sm:$0xff]  }
   0x5   :  { %5411 = vmatprep.subr.bf16.mxu0 %v8192_v5  ;;  %v8202_v12 = vld [vmem:[%s11994_s1 + $0x4c] ss:$12 sps:$4 sm:$0xff]   ;;  %v8206_v14 = vld [vmem:[%s11994_s1 + $0x48] ss:$12 sps:$4 sm:$0xff]   ;;  %v8208_v16 = vld [vmem:[%s11994_s1 + $0x64] ss:$12 sps:$4 sm:$0xff]  }
   0x6   :  { %v8204_v13 = vld [vmem:[%s11994_s1 + $0x4cc] ss:$12 sps:$4 sm:$0xff]   ;;  %v8207_v15 = vld [vmem:[%s11994_s1 + $0x4c8] ss:$12 sps:$4 sm:$0xff]   ;;  %v8210_v17 = vld [vmem:[%s11994_s1 + $0x4e4] ss:$12 sps:$4 sm:$0xff]  }
   0x7   :  { %5289 = vmatpush1.bf16.msra.mxu1 %v8194_v6  ;;  %v8212_v18 = vld [vmem:[%s11994_s1 + $0x60] ss:$12 sps:$4 sm:$0xff]   ;;  %v8214_v20 = vld [vmem:[%s11994_s1 + $0x7c] ss:$12 sps:$4 sm:$0xff]   ;;  %v8218_v22 = vld [vmem:[%s11994_s1 + $0x78] ss:$12 sps:$4 sm:$0xff]  }
   0x8   :  { %5412 = vmatpush1.bf16.msra.mxu0 %v8195_v7  ;;  %5290 = vmatprep.subr.bf16.mxu1 %v8196_v8  ;;  %v8213_v19 = vld [vmem:[%s11994_s1 + $0x4e0] ss:$12 sps:$4 sm:$0xff]   ;;  %v8216_v21 = vld [vmem:[%s11994_s1 + $0x4fc] ss:$12 sps:$4 sm:$0xff]   ;;  %v8219_v23 = vld [vmem:[%s11994_s1 + $0x4f8] ss:$12 sps:$4 sm:$0xff]  }
   0x9   :  { %5413 = vmatprep.subr.bf16.mxu0 %v8198_v9  ;;  %v8220_v24 = vld [vmem:[%s11994_s1 + $0x94] ss:$12 sps:$4 sm:$0xff]   ;;  %v8224_v26 = vld [vmem:[%s11994_s1 + $0x90] ss:$12 sps:$4 sm:$0xff]   ;;  %v8226_v28 = vld [vmem:[%s11994_s1 + $0xac] ss:$12 sps:$4 sm:$0xff]  }
   0xa   :  { %v8222_v25 = vld [vmem:[%s11994_s1 + $0x514] ss:$12 sps:$4 sm:$0xff]   ;;  %v8225_v27 = vld [vmem:[%s11994_s1 + $0x510] ss:$12 sps:$4 sm:$0xff]   ;;  %v8228_v29 = vld [vmem:[%s11994_s1 + $0x52c] ss:$12 sps:$4 sm:$0xff]  }
   0xb   :  { %5291 = vmatpush1.bf16.msra.mxu1 %v8200_v10  ;;  %v8230_v30 = vld [vmem:[%s11994_s1 + $0xa8] ss:$12 sps:$4 sm:$0xff]   ;;  %v8232_v32 = vld [vmem:[%s11994_s1 + $0xc4] ss:$12 sps:$4 sm:$0xff]   ;;  %v8236_v34 = vld [vmem:[%s11994_s1 + $0xc0] ss:$12 sps:$4 sm:$0xff]  }
   0xc   :  { %5414 = vmatpush1.bf16.msra.mxu0 %v8201_v11  ;;  %5292 = vmatprep.subr.bf16.mxu1 %v8202_v12  ;;  %v8231_v31 = vld [vmem:[%s11994_s1 + $0x528] ss:$12 sps:$4 sm:$0xff]   ;;  %v8234_v33 = vld [vmem:[%s11994_s1 + $0x544] ss:$12 sps:$4 sm:$0xff]   ;;  %v8237_v35 = vld [vmem:[%s11994_s1 + $0x540] ss:$12 sps:$4 sm:$0xff]  }
   0xd   :  { %5415 = vmatprep.subr.bf16.mxu0 %v8204_v13  ;;  %v8238_v36 = vld [vmem:[%s11994_s1 + $0xdc] ss:$12 sps:$4 sm:$0xff]   ;;  %v8242_v38 = vld [vmem:[%s11994_s1 + $0xd8] ss:$12 sps:$4 sm:$0xff]   ;;  %v8244_v40 = vld [vmem:[%s11994_s1 + $0xf4] ss:$12 sps:$4 sm:$0xff]  }
   0xe   :  { %v8240_v37 = vld [vmem:[%s11994_s1 + $0x55c] ss:$12 sps:$4 sm:$0xff]   ;;  %v8243_v39 = vld [vmem:[%s11994_s1 + $0x558] ss:$12 sps:$4 sm:$0xff]   ;;  %v8246_v41 = vld [vmem:[%s11994_s1 + $0x574] ss:$12 sps:$4 sm:$0xff]  }
   0xf   :  { %5293 = vmatpush1.bf16.msra.mxu1 %v8206_v14  ;;  %v8248_v42 = vld [vmem:[%s11994_s1 + $0xf0] ss:$12 sps:$4 sm:$0xff]   ;;  %v8250_v44 = vld [vmem:[%s11994_s1 + $0x10c] ss:$12 sps:$4 sm:$0xff]   ;;  %v21_v46 = vld [vmem:[%s11995_s0] sm:$0xff] }
  0x10   :  { %5416 = vmatpush1.bf16.msra.mxu0 %v8207_v15  ;;  %5294 = vmatprep.subr.bf16.mxu1 %v8208_v16  ;;  %v8249_v43 = vld [vmem:[%s11994_s1 + $0x570] ss:$12 sps:$4 sm:$0xff]   ;;  %v8252_v45 = vld [vmem:[%s11994_s1 + $0x58c] ss:$12 sps:$4 sm:$0xff]   ;;  %v8254_v47 = vld [vmem:[%s11994_s1 + $0x108] ss:$12 sps:$4 sm:$0xff]   ;;  %v9453_v48 = vcombine.high %v21_v46, %v21_v46  ;;  %v9519_v6 = vcombine.low %v21_v46, %v21_v46 }
  0x11   :  { %5417 = vmatprep.subr.bf16.mxu0 %v8210_v17  ;;  %v8255_v49 = vld [vmem:[%s11994_s1 + $0x588] ss:$12 sps:$4 sm:$0xff]   ;;  %v24_v50 = vld [vmem:[%s11995_s0 + $0x18] sm:$0xff]  ;;  %v8256_v51 = vld [vmem:[%s11994_s1 + $0x124] ss:$12 sps:$4 sm:$0xff]  }
  0x12   :  { %v8258_v52 = vld [vmem:[%s11994_s1 + $0x5a4] ss:$12 sps:$4 sm:$0xff]   ;;  %v9467_v53 = vcombine.high %v24_v50, %v24_v50  ;;  %5318 = vmatprep.mubr.bf16.mxu1 %v9453_v48  ;;  %v8260_v54 = vld [vmem:[%s11994_s1 + $0x120] ss:$12 sps:$4 sm:$0xff]   ;;  %v8262_v56 = vld [vmem:[%s11994_s1 + $0x13c] ss:$12 sps:$4 sm:$0xff]   ;;  %v9521_v7 = vcombine.low %v24_v50, %v24_v50 }
  0x13   :  { %5295 = vmatpush1.bf16.msra.mxu1 %v8212_v18  ;;  %v8261_v55 = vld [vmem:[%s11994_s1 + $0x5a0] ss:$12 sps:$4 sm:$0xff]   ;;  %v8264_v57 = vld [vmem:[%s11994_s1 + $0x5bc] ss:$12 sps:$4 sm:$0xff]   ;;  %v8266_v58 = vld [vmem:[%s11994_s1 + $0x138] ss:$12 sps:$4 sm:$0xff]  }
  0x14   :  { %5418 = vmatpush1.bf16.msra.mxu0 %v8213_v19  ;;  %5296 = vmatprep.subr.bf16.mxu1 %v8214_v20  ;;  %v8267_v59 = vld [vmem:[%s11994_s1 + $0x5b8] ss:$12 sps:$4 sm:$0xff]   ;;  %v8268_v60 = vld [vmem:[%s11994_s1 + $0x154] ss:$12 sps:$4 sm:$0xff]   ;;  %v8272_v62 = vld [vmem:[%s11994_s1 + $0x150] ss:$12 sps:$4 sm:$0xff]  }
  0x15   :  { %5419 = vmatprep.subr.bf16.mxu0 %v8216_v21  ;;  %5441 = vmatprep.mubr.bf16.mxu0 %v9467_v53  ;;  %v8270_v61 = vld [vmem:[%s11994_s1 + $0x5d4] ss:$12 sps:$4 sm:$0xff]   ;;  %v8273_v63 = vld [vmem:[%s11994_s1 + $0x5d0] ss:$12 sps:$4 sm:$0xff]   ;;  %v8274_v0 = vld [vmem:[%s11994_s1 + $0x16c] ss:$12 sps:$4 sm:$0xff]  }
  0x16   :  { %v8276_v1 = vld [vmem:[%s11994_s1 + $0x5ec] ss:$12 sps:$4 sm:$0xff]   ;;  %v8278_v2 = vld [vmem:[%s11994_s1 + $0x168] ss:$12 sps:$4 sm:$0xff]   ;;  %v8284_v4 = vld [vmem:[%s11994_s1 + $0x184] ss:$12 sps:$4 sm:$0xff]  }
  0x17   :  { %5297 = vmatpush1.bf16.msra.mxu1 %v8218_v22  ;;  %v8279_v3 = vld [vmem:[%s11994_s1 + $0x5e8] ss:$12 sps:$4 sm:$0xff]   ;;  %v8289_v5 = vld [vmem:[%s11994_s1 + $0x604] ss:$12 sps:$4 sm:$0xff]   ;;  %v8282_v8 = vld [vmem:[%s11994_s1 + $0x180] ss:$12 sps:$4 sm:$0xff]  }
  0x18   :  { %5420 = vmatpush1.bf16.msra.mxu0 %v8219_v23  ;;  %5298 = vmatprep.subr.bf16.mxu1 %v8220_v24  ;;  %v8287_v9 = vld [vmem:[%s11994_s1 + $0x600] ss:$12 sps:$4 sm:$0xff]   ;;  %v8292_v10 = vld [vmem:[%s11994_s1 + $0x19c] ss:$12 sps:$4 sm:$0xff]   ;;  %v8290_v12 = vld [vmem:[%s11994_s1 + $0x198] ss:$12 sps:$4 sm:$0xff]  }
  0x19   :  { %5421 = vmatprep.subr.bf16.mxu0 %v8222_v25  ;;  %v8295_v11 = vld [vmem:[%s11994_s1 + $0x61c] ss:$12 sps:$4 sm:$0xff]   ;;  %v8293_v13 = vld [vmem:[%s11994_s1 + $0x618] ss:$12 sps:$4 sm:$0xff]   ;;  %v8298_v14 = vld [vmem:[%s11994_s1 + $0x1b4] ss:$12 sps:$4 sm:$0xff]  }
  0x1a   :  { %v8301_v15 = vld [vmem:[%s11994_s1 + $0x634] ss:$12 sps:$4 sm:$0xff]   ;;  %v8296_v16 = vld [vmem:[%s11994_s1 + $0x1b0] ss:$12 sps:$4 sm:$0xff]   ;;  %v8304_v18 = vld [vmem:[%s11994_s1 + $0x1cc] ss:$12 sps:$4 sm:$0xff]  }
  0x1b   :  { %5299 = vmatpush1.bf16.msra.mxu1 %v8224_v26  ;;  %v8299_v17 = vld [vmem:[%s11994_s1 + $0x630] ss:$12 sps:$4 sm:$0xff]   ;;  %v8307_v19 = vld [vmem:[%s11994_s1 + $0x64c] ss:$12 sps:$4 sm:$0xff]   ;;  %v8302_v20 = vld [vmem:[%s11994_s1 + $0x1c8] ss:$12 sps:$4 sm:$0xff]  }
  0x1c   :  { %5422 = vmatpush1.bf16.msra.mxu0 %v8225_v27  ;;  %5300 = vmatprep.subr.bf16.mxu1 %v8226_v28  ;;  %v8305_v21 = vld [vmem:[%s11994_s1 + $0x648] ss:$12 sps:$4 sm:$0xff]   ;;  %v8310_v22 = vld [vmem:[%s11994_s1 + $0x1e4] ss:$12 sps:$4 sm:$0xff]   ;;  %v8308_v24 = vld [vmem:[%s11994_s1 + $0x1e0] ss:$12 sps:$4 sm:$0xff]  }
  0x1d   :  { %5423 = vmatprep.subr.bf16.mxu0 %v8228_v29  ;;  %v8313_v23 = vld [vmem:[%s11994_s1 + $0x664] ss:$12 sps:$4 sm:$0xff]   ;;  %v8311_v25 = vld [vmem:[%s11994_s1 + $0x660] ss:$12 sps:$4 sm:$0xff]   ;;  %v8316_v26 = vld [vmem:[%s11994_s1 + $0x1fc] ss:$12 sps:$4 sm:$0xff]  }
  0x1e   :  { %v8319_v27 = vld [vmem:[%s11994_s1 + $0x67c] ss:$12 sps:$4 sm:$0xff]   ;;  %v8314_v28 = vld [vmem:[%s11994_s1 + $0x1f8] ss:$12 sps:$4 sm:$0xff]  }
  0x1f   :  { %5301 = vmatpush1.bf16.msra.mxu1 %v8230_v30  ;;  %v8317_v29 = vld [vmem:[%s11994_s1 + $0x678] ss:$12 sps:$4 sm:$0xff]   ;;  %v8322_v30 = vld [vmem:[%s11994_s1 + $0x214] ss:$12 sps:$4 sm:$0xff]   ;;  %v8340_v46 = vld [vmem:[%s11994_s1 + $0x25c] ss:$12 sps:$4 sm:$0xff]  }
  0x20   :  { %5424 = vmatpush1.bf16.msra.mxu0 %v8231_v31  ;;  %5302 = vmatprep.subr.bf16.mxu1 %v8232_v32  ;;  %v8325_v31 = vld [vmem:[%s11994_s1 + $0x694] ss:$12 sps:$4 sm:$0xff]   ;;  %v9600_v32 = vld [vmem:[%s11995_s0 + $0x8] sm:$0xff]  ;;  %v8341_v50 = vld [vmem:[%s11994_s1 + $0x6d8] ss:$12 sps:$4 sm:$0xff]  }
  0x21   :  { %5425 = vmatprep.subr.bf16.mxu0 %v8234_v33  ;;  %v8320_v33 = vld [vmem:[%s11994_s1 + $0x210] ss:$12 sps:$4 sm:$0xff]  }
  0x23   :  { %5303 = vmatpush1.bf16.msra.mxu1 %v8236_v34  ;;  %v8323_v34 = vld [vmem:[%s11994_s1 + $0x690] ss:$12 sps:$4 sm:$0xff]  }
  0x24   :  { %5426 = vmatpush1.bf16.msra.mxu0 %v8237_v35  ;;  %5304 = vmatprep.subr.bf16.mxu1 %v8238_v36  ;;  %v9610_v35 = vcombine.high %v9600_v32, %v9600_v32  ;;  %v9615_v36 = vld [vmem:[%s11995_s0 + $0x20] sm:$0xff] }
  0x25   :  { %5427 = vmatprep.subr.bf16.mxu0 %v8240_v37  ;;  %v8328_v37 = vld [vmem:[%s11994_s1 + $0x22c] ss:$12 sps:$4 sm:$0xff]  }
  0x27   :  { %5305 = vmatpush1.bf16.msra.mxu1 %v8242_v38  ;;  %v9622_v38 = vcombine.high %v9615_v36, %v9615_v36 }
  0x28   :  { %5428 = vmatpush1.bf16.msra.mxu0 %v8243_v39  ;;  %5306 = vmatprep.subr.bf16.mxu1 %v8244_v40  ;;  %v8331_v39 = vld [vmem:[%s11994_s1 + $0x6ac] ss:$12 sps:$4 sm:$0xff]   ;;  %v8326_v40 = vld [vmem:[%s11994_s1 + $0x228] ss:$12 sps:$4 sm:$0xff]  }
  0x29   :  { %5429 = vmatprep.subr.bf16.mxu0 %v8246_v41  ;;  %v8329_v41 = vld [vmem:[%s11994_s1 + $0x6a8] ss:$12 sps:$4 sm:$0xff]  }
  0x2b   :  { %5307 = vmatpush1.bf16.msra.mxu1 %v8248_v42  ;;  %v8334_v42 = vld [vmem:[%s11994_s1 + $0x244] ss:$12 sps:$4 sm:$0xff]  }
  0x2c   :  { %5430 = vmatpush1.bf16.msra.mxu0 %v8249_v43  ;;  %5308 = vmatprep.subr.bf16.mxu1 %v8250_v44  ;;  %v8337_v43 = vld [vmem:[%s11994_s1 + $0x6c4] ss:$12 sps:$4 sm:$0xff]   ;;  %v8332_v44 = vld [vmem:[%s11994_s1 + $0x240] ss:$12 sps:$4 sm:$0xff]  }
  0x2d   :  { %5431 = vmatprep.subr.bf16.mxu0 %v8252_v45  ;;  %v8335_v45 = vld [vmem:[%s11994_s1 + $0x6c0] ss:$12 sps:$4 sm:$0xff]  }
  0x2f   :  { %5309 = vmatpush1.bf16.msra.mxu1 %v8254_v47  ;;  %v8343_v47 = vld [vmem:[%s11994_s1 + $0x6dc] ss:$12 sps:$4 sm:$0xff]  }
  0x30   :  { %5432 = vmatpush1.bf16.msra.mxu0 %v8255_v49  ;;  %5310 = vmatprep.subr.bf16.mxu1 %v8256_v51  ;;  %v8338_v49 = vld [vmem:[%s11994_s1 + $0x258] ss:$12 sps:$4 sm:$0xff]   ;;  %v8346_v51 = vld [vmem:[%s11994_s1 + $0x274] ss:$12 sps:$4 sm:$0xff]  }
  0x31   :  { %5433 = vmatprep.subr.bf16.mxu0 %v8258_v52  ;;  %v8349_v52 = vld [vmem:[%s11994_s1 + $0x6f4] ss:$12 sps:$4 sm:$0xff]  }
  0x33   :  { %5311 = vmatpush1.bf16.msra.mxu1 %v8260_v54  ;;  %v8344_v54 = vld [vmem:[%s11994_s1 + $0x270] ss:$12 sps:$4 sm:$0xff]  }
  0x34   :  { %5434 = vmatpush1.bf16.msra.mxu0 %v8261_v55  ;;  %5312 = vmatprep.subr.bf16.mxu1 %v8262_v56  ;;  %v8347_v55 = vld [vmem:[%s11994_s1 + $0x6f0] ss:$12 sps:$4 sm:$0xff]   ;;  %v8352_v56 = vld [vmem:[%s11994_s1 + $0x28c] ss:$12 sps:$4 sm:$0xff]  }
  0x35   :  { %5435 = vmatprep.subr.bf16.mxu0 %v8264_v57  ;;  %v8355_v57 = vld [vmem:[%s11994_s1 + $0x70c] ss:$12 sps:$4 sm:$0xff]  }
  0x37   :  { %5313 = vmatpush1.bf16.msra.mxu1 %v8266_v58  ;;  %v8350_v58 = vld [vmem:[%s11994_s1 + $0x288] ss:$12 sps:$4 sm:$0xff]  }
  0x38   :  { %5436 = vmatpush1.bf16.msra.mxu0 %v8267_v59  ;;  %5314 = vmatprep.subr.bf16.mxu1 %v8268_v60  ;;  %v8353_v59 = vld [vmem:[%s11994_s1 + $0x708] ss:$12 sps:$4 sm:$0xff]   ;;  %v8358_v60 = vld [vmem:[%s11994_s1 + $0x2a4] ss:$12 sps:$4 sm:$0xff]  }
  0x39   :  { %5437 = vmatprep.subr.bf16.mxu0 %v8270_v61  ;;  %v8361_v61 = vld [vmem:[%s11994_s1 + $0x724] ss:$12 sps:$4 sm:$0xff]  }
  0x3b   :  { %5315 = vmatpush1.bf16.msra.mxu1 %v8272_v62  ;;  %v8356_v62 = vld [vmem:[%s11994_s1 + $0x2a0] ss:$12 sps:$4 sm:$0xff]  }
  0x3c   :  { %5438 = vmatpush1.bf16.msra.mxu0 %v8273_v63  ;;  %5316 = vmatprep.subr.bf16.mxu1 %v8274_v0  ;;  %v8359_v63 = vld [vmem:[%s11994_s1 + $0x720] ss:$12 sps:$4 sm:$0xff]   ;;  %v8364_v0 = vld [vmem:[%s11994_s1 + $0x2bc] ss:$12 sps:$4 sm:$0xff]  }
  0x3d   :  { %5439 = vmatprep.subr.bf16.mxu0 %v8276_v1  ;;  %v8367_v1 = vld [vmem:[%s11994_s1 + $0x73c] ss:$12 sps:$4 sm:$0xff]  }
  0x3f   :  { %5317 = vmatpush1.bf16.msra.mxu1 %v8278_v2  ;;  %v8362_v2 = vld [vmem:[%s11994_s1 + $0x2b8] ss:$12 sps:$4 sm:$0xff]  }
  0x40   :  { %5440 = vmatpush1.bf16.msra.mxu0 %v8279_v3  ;;  %5327 = vmatprep.subr.bf16.mxu1 %v8284_v4  ;;  %v8365_v3 = vld [vmem:[%s11994_s1 + $0x738] ss:$12 sps:$4 sm:$0xff]   ;;  %v8370_v4 = vld [vmem:[%s11994_s1 + $0x2d4] ss:$12 sps:$4 sm:$0xff]  }
  0x41   :  { %5450 = vmatprep.subr.bf16.mxu0 %v8289_v5  ;;  %v8373_v5 = vld [vmem:[%s11994_s1 + $0x754] ss:$12 sps:$4 sm:$0xff]  }
  0x42   :  { %5319 = vmatmul.mubr.bf16.vlgmr.msra.gmra.mrb[0].mxu1 %v9519_v6 }
  0x43   :  { %5442 = vmatmul.mubr.bf16.vlgmr.msra.gmra.mrb[0].mxu0 %v9521_v7  ;;  %5328 = vmatpush1.bf16.msra.mxu1 %v8282_v8  ;;  %v8368_v8 = vld [vmem:[%s11994_s1 + $0x2d0] ss:$12 sps:$4 sm:$0xff]  }
  0x44   :  { %5451 = vmatpush1.bf16.msra.mxu0 %v8287_v9  ;;  %5329 = vmatprep.subr.bf16.mxu1 %v8292_v10  ;;  %v8371_v9 = vld [vmem:[%s11994_s1 + $0x750] ss:$12 sps:$4 sm:$0xff]   ;;  %v8376_v10 = vld [vmem:[%s11994_s1 + $0x2ec] ss:$12 sps:$4 sm:$0xff]  }
  0x45   :  { %5452 = vmatprep.subr.bf16.mxu0 %v8295_v11  ;;  %5359 = vmatprep.mubr.bf16.mxu1 %v9610_v35  ;;  %v8379_v11 = vld [vmem:[%s11994_s1 + $0x76c] ss:$12 sps:$4 sm:$0xff]  }
  0x46   :  { %5482 = vmatprep.mubr.bf16.mxu0 %v9622_v38 }
  0x47   :  { %5330 = vmatpush1.bf16.msra.mxu1 %v8290_v12  ;;  %v8374_v12 = vld [vmem:[%s11994_s1 + $0x2e8] ss:$12 sps:$4 sm:$0xff]  }
  0x48   :  { %5453 = vmatpush1.bf16.msra.mxu0 %v8293_v13  ;;  %5331 = vmatprep.subr.bf16.mxu1 %v8298_v14  ;;  %v8377_v13 = vld [vmem:[%s11994_s1 + $0x768] ss:$12 sps:$4 sm:$0xff]   ;;  %v8384_v14 = vld [vmem:[%s11994_s1 + $0x304] ss:$12 sps:$4 sm:$0xff]  }
  0x49   :  { %5454 = vmatprep.subr.bf16.mxu0 %v8301_v15  ;;  %v8389_v15 = vld [vmem:[%s11994_s1 + $0x784] ss:$12 sps:$4 sm:$0xff]  }
  0x4b   :  { %5332 = vmatpush1.bf16.msra.mxu1 %v8296_v16  ;;  %v9739_v16 = vcombine.low %v9600_v32, %v9600_v32  ;;  %v8404_v32 = vld [vmem:[%s11994_s1 + $0x34c] ss:$12 sps:$4 sm:$0xff]  }
  0x4c   :  { %5455 = vmatpush1.bf16.msra.mxu0 %v8299_v17  ;;  %5333 = vmatprep.subr.bf16.mxu1 %v8304_v18  ;;  %v8382_v17 = vld [vmem:[%s11994_s1 + $0x300] ss:$12 sps:$4 sm:$0xff]   ;;  %v9746_v18 = vcombine.low %v9615_v36, %v9615_v36  ;;  %v8405_v36 = vld [vmem:[%s11994_s1 + $0x7c8] ss:$12 sps:$4 sm:$0xff]  }
  0x4d   :  { %5456 = vmatprep.subr.bf16.mxu0 %v8307_v19  ;;  %v8387_v19 = vld [vmem:[%s11994_s1 + $0x780] ss:$12 sps:$4 sm:$0xff]  }
  0x4f   :  { %5334 = vmatpush1.bf16.msra.mxu1 %v8302_v20  ;;  %v8392_v20 = vld [vmem:[%s11994_s1 + $0x31c] ss:$12 sps:$4 sm:$0xff]  }
  0x50   :  { %5457 = vmatpush1.bf16.msra.mxu0 %v8305_v21  ;;  %5335 = vmatprep.subr.bf16.mxu1 %v8310_v22  ;;  %v8395_v21 = vld [vmem:[%s11994_s1 + $0x79c] ss:$12 sps:$4 sm:$0xff]   ;;  %v9760_v22 = vld [vmem:[%s11995_s0 + $0x10] sm:$0xff] }
  0x51   :  { %5458 = vmatprep.subr.bf16.mxu0 %v8313_v23  ;;  %v9765_v23 = vld [vmem:[%s11995_s0 + $0x28] sm:$0xff] }
  0x53   :  { %5336 = vmatpush1.bf16.msra.mxu1 %v8308_v24  ;;  %v8390_v24 = vld [vmem:[%s11994_s1 + $0x318] ss:$12 sps:$4 sm:$0xff]  }
  0x54   :  { %5459 = vmatpush1.bf16.msra.mxu0 %v8311_v25  ;;  %5337 = vmatprep.subr.bf16.mxu1 %v8316_v26  ;;  %v9772_v25 = vcombine.high %v9760_v22, %v9760_v22  ;;  %v9776_v26 = vcombine.high %v9765_v23, %v9765_v23 }
  0x55   :  { %5460 = vmatprep.subr.bf16.mxu0 %v8319_v27  ;;  %v8393_v27 = vld [vmem:[%s11994_s1 + $0x798] ss:$12 sps:$4 sm:$0xff]  }
  0x57   :  { %5338 = vmatpush1.bf16.msra.mxu1 %v8314_v28  ;;  %v8398_v28 = vld [vmem:[%s11994_s1 + $0x334] ss:$12 sps:$4 sm:$0xff]  }
  0x58   :  { %5461 = vmatpush1.bf16.msra.mxu0 %v8317_v29  ;;  %5339 = vmatprep.subr.bf16.mxu1 %v8322_v30  ;;  %v8401_v29 = vld [vmem:[%s11994_s1 + $0x7b4] ss:$12 sps:$4 sm:$0xff]   ;;  %v8396_v30 = vld [vmem:[%s11994_s1 + $0x330] ss:$12 sps:$4 sm:$0xff]  }
  0x59   :  { %5462 = vmatprep.subr.bf16.mxu0 %v8325_v31  ;;  %v8399_v31 = vld [vmem:[%s11994_s1 + $0x7b0] ss:$12 sps:$4 sm:$0xff]  }
  0x5b   :  { %5340 = vmatpush1.bf16.msra.mxu1 %v8320_v33  ;;  %v8407_v33 = vld [vmem:[%s11994_s1 + $0x7cc] ss:$12 sps:$4 sm:$0xff]  }
  0x5c   :  { %5463 = vmatpush1.bf16.msra.mxu0 %v8323_v34  ;;  %5341 = vmatprep.subr.bf16.mxu1 %v8328_v37  ;;  %v8402_v34 = vld [vmem:[%s11994_s1 + $0x348] ss:$12 sps:$4 sm:$0xff]   ;;  %v8410_v37 = vld [vmem:[%s11994_s1 + $0x364] ss:$12 sps:$4 sm:$0xff]  }
  0x5d   :  { %5464 = vmatprep.subr.bf16.mxu0 %v8331_v39  ;;  %v8413_v39 = vld [vmem:[%s11994_s1 + $0x7e4] ss:$12 sps:$4 sm:$0xff]  }
  0x5f   :  { %5342 = vmatpush1.bf16.msra.mxu1 %v8326_v40  ;;  %v8408_v40 = vld [vmem:[%s11994_s1 + $0x360] ss:$12 sps:$4 sm:$0xff]  }
  0x60   :  { %5465 = vmatpush1.bf16.msra.mxu0 %v8329_v41  ;;  %5343 = vmatprep.subr.bf16.mxu1 %v8334_v42  ;;  %v8411_v41 = vld [vmem:[%s11994_s1 + $0x7e0] ss:$12 sps:$4 sm:$0xff]   ;;  %v8416_v42 = vld [vmem:[%s11994_s1 + $0x37c] ss:$12 sps:$4 sm:$0xff]  }
  0x61   :  { %5466 = vmatprep.subr.bf16.mxu0 %v8337_v43  ;;  %v8419_v43 = vld [vmem:[%s11994_s1 + $0x7fc] ss:$12 sps:$4 sm:$0xff]  }
  0x63   :  { %5344 = vmatpush1.bf16.msra.mxu1 %v8332_v44  ;;  %v8414_v44 = vld [vmem:[%s11994_s1 + $0x378] ss:$12 sps:$4 sm:$0xff]  }
  0x64   :  { %5467 = vmatpush1.bf16.msra.mxu0 %v8335_v45  ;;  %5345 = vmatprep.subr.bf16.mxu1 %v8340_v46  ;;  %v8417_v45 = vld [vmem:[%s11994_s1 + $0x7f8] ss:$12 sps:$4 sm:$0xff]   ;;  %v8422_v46 = vld [vmem:[%s11994_s1 + $0x394] ss:$12 sps:$4 sm:$0xff]  }
  0x65   :  { %5468 = vmatprep.subr.bf16.mxu0 %v8343_v47  ;;  %v8425_v47 = vld [vmem:[%s11994_s1 + $0x814] ss:$12 sps:$4 sm:$0xff]  }
  0x67   :  { %5346 = vmatpush1.bf16.msra.mxu1 %v8338_v49  ;;  %v8420_v49 = vld [vmem:[%s11994_s1 + $0x390] ss:$12 sps:$4 sm:$0xff]  }
  0x68   :  { %5469 = vmatpush1.bf16.msra.mxu0 %v8341_v50  ;;  %5347 = vmatprep.subr.bf16.mxu1 %v8346_v51  ;;  %v8423_v50 = vld [vmem:[%s11994_s1 + $0x810] ss:$12 sps:$4 sm:$0xff]   ;;  %v8428_v51 = vld [vmem:[%s11994_s1 + $0x3ac] ss:$12 sps:$4 sm:$0xff]  }
  0x69   :  { %5470 = vmatprep.subr.bf16.mxu0 %v8349_v52  ;;  %v8431_v52 = vld [vmem:[%s11994_s1 + $0x82c] ss:$12 sps:$4 sm:$0xff]  }
  0x6b   :  { %5348 = vmatpush1.bf16.msra.mxu1 %v8344_v54  ;;  %v8426_v54 = vld [vmem:[%s11994_s1 + $0x3a8] ss:$12 sps:$4 sm:$0xff]  }
  0x6c   :  { %5471 = vmatpush1.bf16.msra.mxu0 %v8347_v55  ;;  %5349 = vmatprep.subr.bf16.mxu1 %v8352_v56  ;;  %v8429_v55 = vld [vmem:[%s11994_s1 + $0x828] ss:$12 sps:$4 sm:$0xff]   ;;  %v8434_v56 = vld [vmem:[%s11994_s1 + $0x3c4] ss:$12 sps:$4 sm:$0xff]  }
  0x6d   :  { %5472 = vmatprep.subr.bf16.mxu0 %v8355_v57  ;;  %v8437_v57 = vld [vmem:[%s11994_s1 + $0x844] ss:$12 sps:$4 sm:$0xff]  }
  0x6f   :  { %5350 = vmatpush1.bf16.msra.mxu1 %v8350_v58  ;;  %v8432_v58 = vld [vmem:[%s11994_s1 + $0x3c0] ss:$12 sps:$4 sm:$0xff]  }
  0x70   :  { %5473 = vmatpush1.bf16.msra.mxu0 %v8353_v59  ;;  %5351 = vmatprep.subr.bf16.mxu1 %v8358_v60  ;;  %v8435_v59 = vld [vmem:[%s11994_s1 + $0x840] ss:$12 sps:$4 sm:$0xff]   ;;  %v8440_v60 = vld [vmem:[%s11994_s1 + $0x3dc] ss:$12 sps:$4 sm:$0xff]  }
  0x71   :  { %5474 = vmatprep.subr.bf16.mxu0 %v8361_v61  ;;  %v8443_v61 = vld [vmem:[%s11994_s1 + $0x85c] ss:$12 sps:$4 sm:$0xff]  }
  0x73   :  { %5352 = vmatpush1.bf16.msra.mxu1 %v8356_v62  ;;  %v8438_v62 = vld [vmem:[%s11994_s1 + $0x3d8] ss:$12 sps:$4 sm:$0xff]  }
  0x74   :  { %5475 = vmatpush1.bf16.msra.mxu0 %v8359_v63  ;;  %5353 = vmatprep.subr.bf16.mxu1 %v8364_v0  ;;  %v8441_v63 = vld [vmem:[%s11994_s1 + $0x858] ss:$12 sps:$4 sm:$0xff]   ;;  %v8446_v0 = vld [vmem:[%s11994_s1 + $0x3f4] ss:$12 sps:$4 sm:$0xff]  }
  0x75   :  { %5476 = vmatprep.subr.bf16.mxu0 %v8367_v1  ;;  %v8449_v1 = vld [vmem:[%s11994_s1 + $0x874] ss:$12 sps:$4 sm:$0xff]  }
  0x77   :  { %5354 = vmatpush1.bf16.msra.mxu1 %v8362_v2  ;;  %v8444_v2 = vld [vmem:[%s11994_s1 + $0x3f0] ss:$12 sps:$4 sm:$0xff]  }
  0x78   :  { %5477 = vmatpush1.bf16.msra.mxu0 %v8365_v3  ;;  %5355 = vmatprep.subr.bf16.mxu1 %v8370_v4  ;;  %v8447_v3 = vld [vmem:[%s11994_s1 + $0x870] ss:$12 sps:$4 sm:$0xff]   ;;  %v8452_v4 = vld [vmem:[%s11994_s1 + $0x40c] ss:$12 sps:$4 sm:$0xff]  }
  0x79   :  { %5478 = vmatprep.subr.bf16.mxu0 %v8373_v5  ;;  %v8455_v5 = vld [vmem:[%s11994_s1 + $0x88c] ss:$12 sps:$4 sm:$0xff]  }
  0x7b   :  { %5356 = vmatpush1.bf16.msra.mxu1 %v8368_v8  ;;  %v8450_v8 = vld [vmem:[%s11994_s1 + $0x408] ss:$12 sps:$4 sm:$0xff]  }
  0x7c   :  { %5479 = vmatpush1.bf16.msra.mxu0 %v8371_v9  ;;  %5357 = vmatprep.subr.bf16.mxu1 %v8376_v10  ;;  %v8453_v9 = vld [vmem:[%s11994_s1 + $0x888] ss:$12 sps:$4 sm:$0xff]   ;;  %v8458_v10 = vld [vmem:[%s11994_s1 + $0x424] ss:$12 sps:$4 sm:$0xff]  }
  0x7d   :  { %5480 = vmatprep.subr.bf16.mxu0 %v8379_v11  ;;  %v8461_v11 = vld [vmem:[%s11994_s1 + $0x8a4] ss:$12 sps:$4 sm:$0xff]  }
  0x7f   :  { %5358 = vmatpush1.bf16.msra.mxu1 %v8374_v12  ;;  %v8456_v12 = vld [vmem:[%s11994_s1 + $0x420] ss:$12 sps:$4 sm:$0xff]  }
  0x80   :  { %5481 = vmatpush1.bf16.msra.mxu0 %v8377_v13  ;;  %5368 = vmatprep.subr.bf16.mxu1 %v8384_v14  ;;  %v8459_v13 = vld [vmem:[%s11994_s1 + $0x8a0] ss:$12 sps:$4 sm:$0xff]   ;;  %v8464_v14 = vld [vmem:[%s11994_s1 + $0x43c] ss:$12 sps:$4 sm:$0xff]  }
  0x81   :  { %5491 = vmatprep.subr.bf16.mxu0 %v8389_v15  ;;  %v8467_v15 = vld [vmem:[%s11994_s1 + $0x8bc] ss:$12 sps:$4 sm:$0xff]  }
  0x82   :  { %5360 = vmatmul.mubr.bf16.vlgmr.msra.gmra.mrb[0].mxu1 %v9739_v16 }
  0x83   :  { %5483 = vmatmul.mubr.bf16.vlgmr.msra.gmra.mrb[0].mxu0 %v9746_v18  ;;  %5369 = vmatpush1.bf16.msra.mxu1 %v8382_v17  ;;  %v8462_v17 = vld [vmem:[%s11994_s1 + $0x438] ss:$12 sps:$4 sm:$0xff]  }
  0x84   :  { %5492 = vmatpush1.bf16.msra.mxu0 %v8387_v19  ;;  %5370 = vmatprep.subr.bf16.mxu1 %v8392_v20  ;;  %v8465_v19 = vld [vmem:[%s11994_s1 + $0x8b8] ss:$12 sps:$4 sm:$0xff]   ;;  %v8470_v20 = vld [vmem:[%s11994_s1 + $0x454] ss:$12 sps:$4 sm:$0xff]  }
  0x85   :  { %5493 = vmatprep.subr.bf16.mxu0 %v8395_v21  ;;  %5400 = vmatprep.mubr.bf16.mxu1 %v9772_v25  ;;  %v8473_v21 = vld [vmem:[%s11994_s1 + $0x8d4] ss:$12 sps:$4 sm:$0xff]  }
  0x86   :  { %5523 = vmatprep.mubr.bf16.mxu0 %v9776_v26 }
  0x87   :  { %5371 = vmatpush1.bf16.msra.mxu1 %v8390_v24  ;;  %v8468_v24 = vld [vmem:[%s11994_s1 + $0x450] ss:$12 sps:$4 sm:$0xff]  }
  0x88   :  { %5494 = vmatpush1.bf16.msra.mxu0 %v8393_v27  ;;  %5372 = vmatprep.subr.bf16.mxu1 %v8398_v28  ;;  %v8471_v27 = vld [vmem:[%s11994_s1 + $0x8d0] ss:$12 sps:$4 sm:$0xff]   ;;  %v8476_v28 = vld [vmem:[%s11994_s1 + $0x46c] ss:$12 sps:$4 sm:$0xff]  }
  0x89   :  { %5495 = vmatprep.subr.bf16.mxu0 %v8401_v29  ;;  %v8479_v29 = vld [vmem:[%s11994_s1 + $0x8ec] ss:$12 sps:$4 sm:$0xff]  }
  0x8b   :  { %5373 = vmatpush1.bf16.msra.mxu1 %v8396_v30  ;;  %v8474_v30 = vld [vmem:[%s11994_s1 + $0x468] ss:$12 sps:$4 sm:$0xff]  }
  0x8c   :  { %5496 = vmatpush1.bf16.msra.mxu0 %v8399_v31  ;;  %5374 = vmatprep.subr.bf16.mxu1 %v8404_v32  ;;  %v8477_v31 = vld [vmem:[%s11994_s1 + $0x8e8] ss:$12 sps:$4 sm:$0xff]   ;;  %v8486_v32 = vld [vmem:[%s11994_s1 + $0x904] ss:$12 sps:$4 sm:$0xff]  }
  0x8d   :  { %5497 = vmatprep.subr.bf16.mxu0 %v8407_v33  ;;  %v8487_v33 = vld [vmem:[%s11994_s1 + $0xc8] ss:$12 sps:$4 sm:$0xff]  }
  0x8f   :  { %5375 = vmatpush1.bf16.msra.mxu1 %v8402_v34  ;;  %v8484_v34 = vld [vmem:[%s11994_s1 + $0x900] ss:$12 sps:$4 sm:$0xff]  }
  0x90   :  { %5498 = vmatpush1.bf16.msra.mxu0 %v8405_v36  ;;  %5376 = vmatprep.subr.bf16.mxu1 %v8410_v37  ;;  %v9964_v36 = vcombine.low %v9760_v22, %v9760_v22  ;;  %v9968_v37 = vcombine.low %v9765_v23, %v9765_v23  ;;  %v8491_v22 = vld [vmem:[%s11994_s1 + $0x91c] ss:$12 sps:$4 sm:$0xff]   ;;  %v8492_v23 = vld [vmem:[%s11994_s1 + $0xe0] ss:$12 sps:$4 sm:$0xff]  }
  0x91   :  { %5499 = vmatprep.subr.bf16.mxu0 %v8413_v39  ;;  %v8488_v39 = vld [vmem:[%s11994_s1 + $0x8] ss:$12 sps:$4 sm:$0xff]  }
  0x93   :  { %5377 = vmatpush1.bf16.msra.mxu1 %v8408_v40  ;;  %v9976_v40 = vld [vmem:[%s11995_s0 + $0x30] sm:$0xff] }
  0x94   :  { %5500 = vmatpush1.bf16.msra.mxu0 %v8411_v41  ;;  %5378 = vmatprep.subr.bf16.mxu1 %v8416_v42  ;;  %v8489_v41 = vld [vmem:[%s11994_s1 + $0x918] ss:$12 sps:$4 sm:$0xff]   ;;  %v9989_v42 = vcombine.high %v9976_v40, %v9976_v40 }
  0x95   :  { %5501 = vmatprep.subr.bf16.mxu0 %v8419_v43  ;;  %v8493_v43 = vld [vmem:[%s11994_s1 + $0x20] ss:$12 sps:$4 sm:$0xff]  }
  0x97   :  { %5379 = vmatpush1.bf16.msra.mxu1 %v8414_v44  ;;  %v8496_v44 = vld [vmem:[%s11994_s1 + $0x934] ss:$12 sps:$4 sm:$0xff]  }
  0x98   :  { %5502 = vmatpush1.bf16.msra.mxu0 %v8417_v45  ;;  %5380 = vmatprep.subr.bf16.mxu1 %v8422_v46  ;;  %v8497_v45 = vld [vmem:[%s11994_s1 + $0xf8] ss:$12 sps:$4 sm:$0xff]   ;;  %v8494_v46 = vld [vmem:[%s11994_s1 + $0x930] ss:$12 sps:$4 sm:$0xff]  }
  0x99   :  { %5503 = vmatprep.subr.bf16.mxu0 %v8425_v47  ;;  %v8498_v47 = vld [vmem:[%s11994_s1 + $0x38] ss:$12 sps:$4 sm:$0xff]  }
  0x9b   :  { %5381 = vmatpush1.bf16.msra.mxu1 %v8420_v49  ;;  %v8501_v49 = vld [vmem:[%s11994_s1 + $0x94c] ss:$12 sps:$4 sm:$0xff]  }
  0x9c   :  { %5504 = vmatpush1.bf16.msra.mxu0 %v8423_v50  ;;  %5382 = vmatprep.subr.bf16.mxu1 %v8428_v51  ;;  %v8499_v50 = vld [vmem:[%s11994_s1 + $0x948] ss:$12 sps:$4 sm:$0xff]   ;;  %v8503_v51 = vld [vmem:[%s11994_s1 + $0x50] ss:$12 sps:$4 sm:$0xff]  }
  0x9d   :  { %5505 = vmatprep.subr.bf16.mxu0 %v8431_v52  ;;  %v8506_v52 = vld [vmem:[%s11994_s1 + $0x964] ss:$12 sps:$4 sm:$0xff]  }
  0x9f   :  { %5383 = vmatpush1.bf16.msra.mxu1 %v8426_v54  ;;  %v8507_v54 = vld [vmem:[%s11994_s1 + $0x128] ss:$12 sps:$4 sm:$0xff]  }
  0xa0   :  { %5506 = vmatpush1.bf16.msra.mxu0 %v8429_v55  ;;  %5384 = vmatprep.subr.bf16.mxu1 %v8434_v56  ;;  %v8504_v55 = vld [vmem:[%s11994_s1 + $0x960] ss:$12 sps:$4 sm:$0xff]   ;;  %v8508_v56 = vld [vmem:[%s11994_s1 + $0x68] ss:$12 sps:$4 sm:$0xff]  }
  0xa1   :  { %5507 = vmatprep.subr.bf16.mxu0 %v8437_v57  ;;  %v8511_v57 = vld [vmem:[%s11994_s1 + $0x97c] ss:$12 sps:$4 sm:$0xff]  }
  0xa3   :  { %5385 = vmatpush1.bf16.msra.mxu1 %v8432_v58  ;;  %v8512_v58 = vld [vmem:[%s11994_s1 + $0x140] ss:$12 sps:$4 sm:$0xff]  }
  0xa4   :  { %5508 = vmatpush1.bf16.msra.mxu0 %v8435_v59  ;;  %5386 = vmatprep.subr.bf16.mxu1 %v8440_v60  ;;  %v8509_v59 = vld [vmem:[%s11994_s1 + $0x978] ss:$12 sps:$4 sm:$0xff]   ;;  %v8513_v60 = vld [vmem:[%s11994_s1 + $0x80] ss:$12 sps:$4 sm:$0xff]  }
  0xa5   :  { %5509 = vmatprep.subr.bf16.mxu0 %v8443_v61  ;;  %v8516_v61 = vld [vmem:[%s11994_s1 + $0x994] ss:$12 sps:$4 sm:$0xff]  }
  0xa7   :  { %5387 = vmatpush1.bf16.msra.mxu1 %v8438_v62  ;;  %v8517_v62 = vld [vmem:[%s11994_s1 + $0x158] ss:$12 sps:$4 sm:$0xff]  }
  0xa8   :  { %5510 = vmatpush1.bf16.msra.mxu0 %v8441_v63  ;;  %5388 = vmatprep.subr.bf16.mxu1 %v8446_v0  ;;  %v8514_v63 = vld [vmem:[%s11994_s1 + $0x990] ss:$12 sps:$4 sm:$0xff]   ;;  %v8518_v0 = vld [vmem:[%s11994_s1 + $0x98] ss:$12 sps:$4 sm:$0xff]  }
  0xa9   :  { %5511 = vmatprep.subr.bf16.mxu0 %v8449_v1  ;;  %v8521_v1 = vld [vmem:[%s11994_s1 + $0x9ac] ss:$12 sps:$4 sm:$0xff]  }
  0xab   :  { %5389 = vmatpush1.bf16.msra.mxu1 %v8444_v2  ;;  %v8522_v2 = vld [vmem:[%s11994_s1 + $0x170] ss:$12 sps:$4 sm:$0xff]  }
  0xac   :  { %5512 = vmatpush1.bf16.msra.mxu0 %v8447_v3  ;;  %5390 = vmatprep.subr.bf16.mxu1 %v8452_v4  ;;  %v8519_v3 = vld [vmem:[%s11994_s1 + $0x9a8] ss:$12 sps:$4 sm:$0xff]   ;;  %v8523_v4 = vld [vmem:[%s11994_s1 + $0xb0] ss:$12 sps:$4 sm:$0xff]  }
  0xad   :  { %5513 = vmatprep.subr.bf16.mxu0 %v8455_v5  ;;  %v8526_v5 = vld [vmem:[%s11994_s1 + $0x9c4] ss:$12 sps:$4 sm:$0xff]  }
  0xaf   :  { %5391 = vmatpush1.bf16.msra.mxu1 %v8450_v8  ;;  %v8527_v8 = vld [vmem:[%s11994_s1 + $0x248] ss:$12 sps:$4 sm:$0xff]  }
  0xb0   :  { %5514 = vmatpush1.bf16.msra.mxu0 %v8453_v9  ;;  %5392 = vmatprep.subr.bf16.mxu1 %v8458_v10  ;;  %v8524_v9 = vld [vmem:[%s11994_s1 + $0x9c0] ss:$12 sps:$4 sm:$0xff]   ;;  %v8528_v10 = vld [vmem:[%s11994_s1 + $0x188] ss:$12 sps:$4 sm:$0xff]  }
  0xb1   :  { %5515 = vmatprep.subr.bf16.mxu0 %v8461_v11  ;;  %v8531_v11 = vld [vmem:[%s11994_s1 + $0x9dc] ss:$12 sps:$4 sm:$0xff]  }
  0xb3   :  { %5393 = vmatpush1.bf16.msra.mxu1 %v8456_v12  ;;  %v8532_v12 = vld [vmem:[%s11994_s1 + $0x260] ss:$12 sps:$4 sm:$0xff]  }
  0xb4   :  { %5516 = vmatpush1.bf16.msra.mxu0 %v8459_v13  ;;  %5394 = vmatprep.subr.bf16.mxu1 %v8464_v14  ;;  %v8529_v13 = vld [vmem:[%s11994_s1 + $0x9d8] ss:$12 sps:$4 sm:$0xff]   ;;  %v8533_v14 = vld [vmem:[%s11994_s1 + $0x1a0] ss:$12 sps:$4 sm:$0xff]  }
  0xb5   :  { %5517 = vmatprep.subr.bf16.mxu0 %v8467_v15  ;;  %v8536_v15 = vld [vmem:[%s11994_s1 + $0x9f4] ss:$12 sps:$4 sm:$0xff]  }
  0xb7   :  { %5395 = vmatpush1.bf16.msra.mxu1 %v8462_v17  ;;  %v8537_v17 = vld [vmem:[%s11994_s1 + $0x278] ss:$12 sps:$4 sm:$0xff]  }
  0xb8   :  { %5518 = vmatpush1.bf16.msra.mxu0 %v8465_v19  ;;  %5396 = vmatprep.subr.bf16.mxu1 %v8470_v20  ;;  %v8538_v19 = vld [vmem:[%s11994_s1 + $0x1b8] ss:$12 sps:$4 sm:$0xff]  }
  0xb9   :  { %5519 = vmatprep.subr.bf16.mxu0 %v8473_v21  ;;  %v8541_v20 = vld [vmem:[%s11994_s1 + $0xa0c] ss:$12 sps:$4 sm:$0xff]   ;;  %v8539_v21 = vld [vmem:[%s11994_s1 + $0xa08] ss:$12 sps:$4 sm:$0xff]  }
  0xbb   :  { %5397 = vmatpush1.bf16.msra.mxu1 %v8468_v24  ;;  %v8543_v24 = vld [vmem:[%s11994_s1 + $0x1d0] ss:$12 sps:$4 sm:$0xff]  }
  0xbc   :  { %5520 = vmatpush1.bf16.msra.mxu0 %v8471_v27  ;;  %5398 = vmatprep.subr.bf16.mxu1 %v8476_v28  ;;  %v8546_v27 = vld [vmem:[%s11994_s1 + $0xa24] ss:$12 sps:$4 sm:$0xff]   ;;  %v8547_v28 = vld [vmem:[%s11994_s1 + $0x2a8] ss:$12 sps:$4 sm:$0xff]  }
  0xbd   :  { %5521 = vmatprep.subr.bf16.mxu0 %v8479_v29  ;;  %v8544_v29 = vld [vmem:[%s11994_s1 + $0xa20] ss:$12 sps:$4 sm:$0xff]  }
  0xbf   :  { %5399 = vmatpush1.bf16.msra.mxu1 %v8474_v30  ;;  %v8548_v30 = vld [vmem:[%s11994_s1 + $0x1e8] ss:$12 sps:$4 sm:$0xff]  }
  0xc0   :  { %5522 = vmatpush1.bf16.msra.mxu0 %v8477_v31  ;;  %7719 = vmatprep.subr.bf16.mxu1 %v8487_v33  ;;  %v8551_v31 = vld [vmem:[%s11994_s1 + $0xa3c] ss:$12 sps:$4 sm:$0xff]   ;;  %v8549_v33 = vld [vmem:[%s11994_s1 + $0xa38] ss:$12 sps:$4 sm:$0xff]  }
  0xc1   :  { %5532 = vmatprep.subr.bf16.mxu0 %v8486_v32  ;;  %v8552_v32 = vld [vmem:[%s11994_s1 + $0x2c0] ss:$12 sps:$4 sm:$0xff]  }
  0xc2   :  { %5401 = vmatmul.mubr.bf16.vlgmr.msra.gmra.mrb[0].mxu1 %v9964_v36 }
  0xc3   :  { %5524 = vmatmul.mubr.bf16.vlgmr.msra.gmra.mrb[0].mxu0 %v9968_v37  ;;  %7720 = vmatpush3.bf16.msra.mxu1 %v8488_v39  ;;  %v8556_v39 = vld [vmem:[%s11994_s1 + $0xa54] ss:$12 sps:$4 sm:$0xff]  }
  0xc4   :  { %5533 = vmatpush1.bf16.msra.mxu0 %v8484_v34  ;;  %7721 = vmatprep.subr.bf16.mxu1 %v8492_v23  ;;  %v8553_v34 = vld [vmem:[%s11994_s1 + $0x200] ss:$12 sps:$4 sm:$0xff]   ;;  %v8554_v23 = vld [vmem:[%s11994_s1 + $0xa50] ss:$12 sps:$4 sm:$0xff]  }
  0xc5   :  { %5534 = vmatprep.subr.bf16.mxu0 %v8491_v22  ;;  %5974 = vmatprep.mubr.bf16.mxu1 %v9453_v48  ;;  %v8502_v48 = vld [vmem:[%s11994_s1 + $0x110] ss:$12 sps:$4 sm:$0xff]   ;;  %v8557_v22 = vld [vmem:[%s11994_s1 + $0x2d8] ss:$12 sps:$4 sm:$0xff]  }
  0xc6   :  { %5564 = vmatprep.mubr.bf16.mxu0 %v9989_v42 }
  0xc7   :  { %7722 = vmatpush3.bf16.msra.mxu1 %v8493_v43  ;;  %v8561_v43 = vld [vmem:[%s11994_s1 + $0xa6c] ss:$12 sps:$4 sm:$0xff]  }
  0xc8   :  { %5535 = vmatpush1.bf16.msra.mxu0 %v8489_v41  ;;  %7723 = vmatprep.subr.bf16.mxu1 %v8497_v45  ;;  %v8558_v41 = vld [vmem:[%s11994_s1 + $0x218] ss:$12 sps:$4 sm:$0xff]   ;;  %v8559_v45 = vld [vmem:[%s11994_s1 + $0xa68] ss:$12 sps:$4 sm:$0xff]  }
  0xc9   :  { %5536 = vmatprep.subr.bf16.mxu0 %v8496_v44  ;;  %v8562_v44 = vld [vmem:[%s11994_s1 + $0x2f0] ss:$12 sps:$4 sm:$0xff]  }
  0xcb   :  { %7724 = vmatpush3.bf16.msra.mxu1 %v8498_v47  ;;  %v8568_v47 = vld [vmem:[%s11994_s1 + $0xa84] ss:$12 sps:$4 sm:$0xff]  }
  0xcc   :  { %5537 = vmatpush1.bf16.msra.mxu0 %v8494_v46  ;;  %7725 = vmatprep.subr.bf16.mxu1 %v8502_v48  ;;  %v8563_v46 = vld [vmem:[%s11994_s1 + $0x230] ss:$12 sps:$4 sm:$0xff]   ;;  %v8566_v48 = vld [vmem:[%s11994_s1 + $0xa80] ss:$12 sps:$4 sm:$0xff]  }
  0xcd   :  { %5538 = vmatprep.subr.bf16.mxu0 %v8501_v49  ;;  %v8569_v49 = vld [vmem:[%s11994_s1 + $0x3c8] ss:$12 sps:$4 sm:$0xff]  }
  0xcf   :  { %7726 = vmatpush3.bf16.msra.mxu1 %v8503_v51  ;;  %v10182_v51 = vcombine.low %v9976_v40, %v9976_v40 }
  0xd0   :  { %5539 = vmatpush1.bf16.msra.mxu0 %v8499_v50  ;;  %7727 = vmatprep.subr.bf16.mxu1 %v8507_v54  ;;  %v8570_v50 = vld [vmem:[%s11994_s1 + $0x308] ss:$12 sps:$4 sm:$0xff]  }
  0xd1   :  { %5540 = vmatprep.subr.bf16.mxu0 %v8506_v52  ;;  %v10187_v52 = vld [vmem:[%s11995_s0 + $0x38] sm:$0xff] }
  0xd2   :  { %v8573_v54 = vld [vmem:[%s11994_s1 + $0xa9c] ss:$12 sps:$4 sm:$0xff]   ;;  %v10197_v40 = vcombine.high %v10187_v52, %v10187_v52 }
  0xd3   :  { %7728 = vmatpush3.bf16.msra.mxu1 %v8508_v56  ;;  %v8571_v56 = vld [vmem:[%s11994_s1 + $0xa98] ss:$12 sps:$4 sm:$0xff]  }
  0xd4   :  { %5541 = vmatpush1.bf16.msra.mxu0 %v8504_v55  ;;  %7729 = vmatprep.subr.bf16.mxu1 %v8512_v58  ;;  %v8574_v55 = vld [vmem:[%s11994_s1 + $0x3e0] ss:$12 sps:$4 sm:$0xff]  }
  0xd5   :  { %5542 = vmatprep.subr.bf16.mxu0 %v8511_v57  ;;  %v8575_v57 = vld [vmem:[%s11994_s1 + $0x320] ss:$12 sps:$4 sm:$0xff]  }
  0xd6   :  { %v8578_v58 = vld [vmem:[%s11994_s1 + $0xab4] ss:$12 sps:$4 sm:$0xff]  }
  0xd7   :  { %7730 = vmatpush3.bf16.msra.mxu1 %v8513_v60  ;;  %v8580_v60 = vld [vmem:[%s11994_s1 + $0x338] ss:$12 sps:$4 sm:$0xff]  }
  0xd8   :  { %5543 = vmatpush1.bf16.msra.mxu0 %v8509_v59  ;;  %7731 = vmatprep.subr.bf16.mxu1 %v8517_v62  ;;  %v8576_v59 = vld [vmem:[%s11994_s1 + $0xab0] ss:$12 sps:$4 sm:$0xff]  }
  0xd9   :  { %5544 = vmatprep.subr.bf16.mxu0 %v8516_v61  ;;  %v8583_v61 = vld [vmem:[%s11994_s1 + $0xacc] ss:$12 sps:$4 sm:$0xff]   ;;  %v8584_v62 = vld [vmem:[%s11994_s1 + $0x410] ss:$12 sps:$4 sm:$0xff]  }
  0xdb   :  { %7732 = vmatpush3.bf16.msra.mxu1 %v8518_v0  ;;  %v8588_v0 = vld [vmem:[%s11994_s1 + $0xae4] ss:$12 sps:$4 sm:$0xff]  }
  0xdc   :  { %5545 = vmatpush1.bf16.msra.mxu0 %v8514_v63  ;;  %7733 = vmatprep.subr.bf16.mxu1 %v8522_v2  ;;  %v8585_v63 = vld [vmem:[%s11994_s1 + $0x350] ss:$12 sps:$4 sm:$0xff]   ;;  %v8586_v2 = vld [vmem:[%s11994_s1 + $0xae0] ss:$12 sps:$4 sm:$0xff]  }
  0xdd   :  { %5546 = vmatprep.subr.bf16.mxu0 %v8521_v1  ;;  %v8589_v1 = vld [vmem:[%s11994_s1 + $0x428] ss:$12 sps:$4 sm:$0xff]  }
  0xdf   :  { %7734 = vmatpush3.bf16.msra.mxu1 %v8523_v4  ;;  %v8593_v4 = vld [vmem:[%s11994_s1 + $0xafc] ss:$12 sps:$4 sm:$0xff]  }
  0xe0   :  { %5547 = vmatpush1.bf16.msra.mxu0 %v8519_v3  ;;  %7741 = vmatprep.subr.bf16.mxu1 %v8527_v8  ;;  %v8590_v3 = vld [vmem:[%s11994_s1 + $0x368] ss:$12 sps:$4 sm:$0xff]   ;;  %v8591_v8 = vld [vmem:[%s11994_s1 + $0xaf8] ss:$12 sps:$4 sm:$0xff]  }
  0xe1   :  { %5548 = vmatprep.subr.bf16.mxu0 %v8526_v5  ;;  %v8594_v5 = vld [vmem:[%s11994_s1 + $0x440] ss:$12 sps:$4 sm:$0xff]  }
  0xe2   :  { %5975 = vmatmul.mubr.bf16.vlgmr.msra.gmra.mrb[4].mxu1 %v9519_v6  ;;  %v8534_v6 = vld [vmem:[%s11994_s1 + $0x9f0] ss:$12 sps:$4 sm:$0xff]  }
  0xe3   :  { %7742 = vmatpush3.bf16.msra.mxu1 %v8528_v10  ;;  %6014 = vmatprep.mubr.bf16.mxu1 %v9610_v35  ;;  %v8542_v35 = vld [vmem:[%s11994_s1 + $0x290] ss:$12 sps:$4 sm:$0xff]   ;;  %v8598_v10 = vld [vmem:[%s11994_s1 + $0xb14] ss:$12 sps:$4 sm:$0xff]  }
  0xe4   :  { %5549 = vmatpush1.bf16.msra.mxu0 %v8524_v9  ;;  %7743 = vmatprep.subr.bf16.mxu1 %v8532_v12  ;;  %v8595_v9 = vld [vmem:[%s11994_s1 + $0x380] ss:$12 sps:$4 sm:$0xff]   ;;  %v8596_v12 = vld [vmem:[%s11994_s1 + $0xb10] ss:$12 sps:$4 sm:$0xff]  }
  0xe5   :  { %5550 = vmatprep.subr.bf16.mxu0 %v8531_v11  ;;  %v8599_v11 = vld [vmem:[%s11994_s1 + $0x458] ss:$12 sps:$4 sm:$0xff]  }
  0xe7   :  { %7744 = vmatpush3.bf16.msra.mxu1 %v8533_v14  ;;  %v8603_v14 = vld [vmem:[%s11994_s1 + $0xb2c] ss:$12 sps:$4 sm:$0xff]  }
  0xe8   :  { %5551 = vmatpush1.bf16.msra.mxu0 %v8529_v13  ;;  %7745 = vmatprep.subr.bf16.mxu1 %v8537_v17  ;;  %v8600_v13 = vld [vmem:[%s11994_s1 + $0x398] ss:$12 sps:$4 sm:$0xff]   ;;  %v8601_v17 = vld [vmem:[%s11994_s1 + $0xb28] ss:$12 sps:$4 sm:$0xff]  }
  0xe9   :  { %5552 = vmatprep.subr.bf16.mxu0 %v8536_v15  ;;  %v8604_v15 = vld [vmem:[%s11994_s1 + $0x470] ss:$12 sps:$4 sm:$0xff]  }
  0xeb   :  { %7746 = vmatpush3.bf16.msra.mxu1 %v8538_v19  ;;  %v8608_v19 = vld [vmem:[%s11994_s1 + $0xb44] ss:$12 sps:$4 sm:$0xff]  }
  0xec   :  { %5553 = vmatpush1.bf16.msra.mxu0 %v8534_v6  ;;  %7747 = vmatprep.subr.bf16.mxu1 %v8542_v35  ;;  %v8605_v6 = vld [vmem:[%s11994_s1 + $0x3b0] ss:$12 sps:$4 sm:$0xff]   ;;  %v8606_v35 = vld [vmem:[%s11994_s1 + $0xb40] ss:$12 sps:$4 sm:$0xff]  }
  0xed   :  { %5554 = vmatprep.subr.bf16.mxu0 %v8541_v20  ;;  %v8609_v20 = vld [vmem:[%s11994_s1 + $0x548] ss:$12 sps:$4 sm:$0xff]  }
  0xef   :  { %7748 = vmatpush3.bf16.msra.mxu1 %v8543_v24  ;;  %v8613_v24 = vld [vmem:[%s11994_s1 + $0xb5c] ss:$12 sps:$4 sm:$0xff]  }
  0xf0   :  { %5555 = vmatpush1.bf16.msra.mxu0 %v8539_v21  ;;  %7749 = vmatprep.subr.bf16.mxu1 %v8547_v28  ;;  %v8610_v21 = vld [vmem:[%s11994_s1 + $0x488] ss:$12 sps:$4 sm:$0xff]   ;;  %v8611_v28 = vld [vmem:[%s11994_s1 + $0xb58] ss:$12 sps:$4 sm:$0xff]  }
  0xf1   :  { %5556 = vmatprep.subr.bf16.mxu0 %v8546_v27  ;;  %v8614_v27 = vld [vmem:[%s11994_s1 + $0x560] ss:$12 sps:$4 sm:$0xff]  }
  0xf3   :  { %7750 = vmatpush3.bf16.msra.mxu1 %v8548_v30  ;;  %v8618_v30 = vld [vmem:[%s11994_s1 + $0xb74] ss:$12 sps:$4 sm:$0xff]  }
  0xf4   :  { %5557 = vmatpush1.bf16.msra.mxu0 %v8544_v29  ;;  %7751 = vmatprep.subr.bf16.mxu1 %v8552_v32  ;;  %v8615_v29 = vld [vmem:[%s11994_s1 + $0x4a0] ss:$12 sps:$4 sm:$0xff]   ;;  %v8620_v32 = vld [vmem:[%s11994_s1 + $0x4b8] ss:$12 sps:$4 sm:$0xff]  }
  0xf5   :  { %5558 = vmatprep.subr.bf16.mxu0 %v8551_v31  ;;  %v8619_v31 = vld [vmem:[%s11994_s1 + $0x578] ss:$12 sps:$4 sm:$0xff]  }
  0xf7   :  { %7752 = vmatpush3.bf16.msra.mxu1 %v8553_v34  ;;  %v8621_v34 = vld [vmem:[%s11994_s1 + $0xb88] ss:$12 sps:$4 sm:$0xff]  }
  0xf8   :  { %5559 = vmatpush1.bf16.msra.mxu0 %v8549_v33  ;;  %7753 = vmatprep.subr.bf16.mxu1 %v8557_v22  ;;  %v8623_v33 = vld [vmem:[%s11994_s1 + $0xb8c] ss:$12 sps:$4 sm:$0xff]   ;;  %v8628_v22 = vld [vmem:[%s11994_s1 + $0xba4] ss:$12 sps:$4 sm:$0xff]  }
  0xf9   :  { %5560 = vmatprep.subr.bf16.mxu0 %v8556_v39  ;;  %v8625_v39 = vld [vmem:[%s11994_s1 + $0x4d0] ss:$12 sps:$4 sm:$0xff]  }
  0xfb   :  { %7754 = vmatpush3.bf16.msra.mxu1 %v8558_v41  ;;  %v8626_v41 = vld [vmem:[%s11994_s1 + $0xba0] ss:$12 sps:$4 sm:$0xff]  }
  0xfc   :  { %5561 = vmatpush1.bf16.msra.mxu0 %v8554_v23  ;;  %7755 = vmatprep.subr.bf16.mxu1 %v8562_v44  ;;  %v8629_v23 = vld [vmem:[%s11994_s1 + $0x5a8] ss:$12 sps:$4 sm:$0xff]  }
  0xfd   :  { %5562 = vmatprep.subr.bf16.mxu0 %v8561_v43  ;;  %v8630_v43 = vld [vmem:[%s11994_s1 + $0x4e8] ss:$12 sps:$4 sm:$0xff]  }
  0xfe   :  { %v8633_v44 = vld [vmem:[%s11994_s1 + $0xbbc] ss:$12 sps:$4 sm:$0xff]  }
  0xff   :  { %7756 = vmatpush3.bf16.msra.mxu1 %v8563_v46  ;;  %v8631_v46 = vld [vmem:[%s11994_s1 + $0xbb8] ss:$12 sps:$4 sm:$0xff]  }
 0x100   :  { %5563 = vmatpush1.bf16.msra.mxu0 %v8559_v45  ;;  %7763 = vmatprep.subr.bf16.mxu1 %v8569_v49  ;;  %v8634_v45 = vld [vmem:[%s11994_s1 + $0x5c0] ss:$12 sps:$4 sm:$0xff]  }
 0x101   :  { %5573 = vmatprep.subr.bf16.mxu0 %v8568_v47  ;;  %v8635_v47 = vld [vmem:[%s11994_s1 + $0x500] ss:$12 sps:$4 sm:$0xff]  }
 0x102   :  { %6015 = vmatmul.mubr.bf16.vlgmr.msra.gmra.mrb[8].mxu1 %v9739_v16  ;;  %v8579_v16 = vld [vmem:[%s11994_s1 + $0x3f8] ss:$12 sps:$4 sm:$0xff]   ;;  %v8638_v49 = vld [vmem:[%s11994_s1 + $0xbd4] ss:$12 sps:$4 sm:$0xff]  }
 0x103   :  { %5565 = vmatmul.mubr.bf16.vlgmr.msra.gmra.mrb[0].mxu0 %v10182_v51  ;;  %7764 = vmatpush3.bf16.msra.mxu1 %v8570_v50  ;;  %v8636_v50 = vld [vmem:[%s11994_s1 + $0xbd0] ss:$12 sps:$4 sm:$0xff]  }
 0x104   :  { %5574 = vmatpush1.bf16.msra.mxu0 %v8566_v48  ;;  %7765 = vmatprep.subr.bf16.mxu1 %v8574_v55  ;;  %v8639_v48 = vld [vmem:[%s11994_s1 + $0x5d8] ss:$12 sps:$4 sm:$0xff]  }
 0x105   :  { %5575 = vmatprep.subr.bf16.mxu0 %v8573_v54  ;;  %6054 = vmatprep.mubr.bf16.mxu1 %v9772_v25  ;;  %v8581_v25 = vld [vmem:[%s11994_s1 + $0xac8] ss:$12 sps:$4 sm:$0xff]   ;;  %v8640_v54 = vld [vmem:[%s11994_s1 + $0x518] ss:$12 sps:$4 sm:$0xff]  }
 0x106   :  { %5605 = vmatprep.mubr.bf16.mxu0 %v10197_v40  ;;  %v8643_v55 = vld [vmem:[%s11994_s1 + $0xbec] ss:$12 sps:$4 sm:$0xff]  }
 0x107   :  { %7766 = vmatpush3.bf16.msra.mxu1 %v8575_v57  ;;  %v8641_v57 = vld [vmem:[%s11994_s1 + $0xbe8] ss:$12 sps:$4 sm:$0xff]  }
 0x108   :  { %5576 = vmatpush1.bf16.msra.mxu0 %v8571_v56  ;;  %7767 = vmatprep.subr.bf16.mxu1 %v8579_v16  ;;  %v8644_v56 = vld [vmem:[%s11994_s1 + $0x5f0] ss:$12 sps:$4 sm:$0xff]  }
 0x109   :  { %5577 = vmatprep.subr.bf16.mxu0 %v8578_v58  ;;  %v8645_v58 = vld [vmem:[%s11994_s1 + $0x530] ss:$12 sps:$4 sm:$0xff]  }
 0x10a   :  { %v8650_v16 = vld [vmem:[%s11994_s1 + $0xc04] ss:$12 sps:$4 sm:$0xff]  }
 0x10b   :  { %7768 = vmatpush3.bf16.msra.mxu1 %v8580_v60  ;;  %v8648_v60 = vld [vmem:[%s11994_s1 + $0xc00] ss:$12 sps:$4 sm:$0xff]  }
 0x10c   :  { %5578 = vmatpush1.bf16.msra.mxu0 %v8576_v59  ;;  %7769 = vmatprep.subr.bf16.mxu1 %v8584_v62  ;;  %v8651_v59 = vld [vmem:[%s11994_s1 + $0x6c8] ss:$12 sps:$4 sm:$0xff]   ;;  %v10393_v62 = vcombine.low %v10187_v52, %v10187_v52 }
 0x10d   :  { %5579 = vmatprep.subr.bf16.mxu0 %v8583_v61  ;;  %v8652_v61 = vld [vmem:[%s11994_s1 + $0x608] ss:$12 sps:$4 sm:$0xff]  }
 0x10f   :  { %7770 = vmatpush3.bf16.msra.mxu1 %v8585_v63  ;;  %v8655_v63 = vld [vmem:[%s11994_s1 + $0xc1c] ss:$12 sps:$4 sm:$0xff]  }
 0x110   :  { %5580 = vmatpush1.bf16.msra.mxu0 %v8581_v25  ;;  %7771 = vmatprep.subr.bf16.mxu1 %v8589_v1  ;;  %v10398_v25 = vld [vmem:[%s11995_s0 + $0x40] sm:$0xff] }
 0x111   :  { %5581 = vmatprep.subr.bf16.mxu0 %v8588_v0  ;;  %v8656_v0 = vld [vmem:[%s11994_s1 + $0x6e0] ss:$12 sps:$4 sm:$0xff]   ;;  %v10408_v52 = vcombine.high %v10398_v25, %v10398_v25  ;;  %v8653_v1 = vld [vmem:[%s11994_s1 + $0xc18] ss:$12 sps:$4 sm:$0xff]  }
 0x113   :  { %7772 = vmatpush3.bf16.msra.mxu1 %v8590_v3  ;;  %v8660_v3 = vld [vmem:[%s11994_s1 + $0xc34] ss:$12 sps:$4 sm:$0xff]  }
 0x114   :  { %5582 = vmatpush1.bf16.msra.mxu0 %v8586_v2  ;;  %7773 = vmatprep.subr.bf16.mxu1 %v8594_v5  ;;  %v8657_v2 = vld [vmem:[%s11994_s1 + $0x620] ss:$12 sps:$4 sm:$0xff]   ;;  %v8662_v5 = vld [vmem:[%s11994_s1 + $0x638] ss:$12 sps:$4 sm:$0xff]  }
 0x115   :  { %5583 = vmatprep.subr.bf16.mxu0 %v8593_v4  ;;  %v8658_v4 = vld [vmem:[%s11994_s1 + $0xc30] ss:$12 sps:$4 sm:$0xff]  }
 0x117   :  { %7774 = vmatpush3.bf16.msra.mxu1 %v8595_v9  ;;  %v8663_v9 = vld [vmem:[%s11994_s1 + $0xc48] ss:$12 sps:$4 sm:$0xff]  }
 0x118   :  { %5584 = vmatpush1.bf16.msra.mxu0 %v8591_v8  ;;  %7775 = vmatprep.subr.bf16.mxu1 %v8599_v11  ;;  %v8665_v8 = vld [vmem:[%s11994_s1 + $0xc4c] ss:$12 sps:$4 sm:$0xff]   ;;  %v8670_v11 = vld [vmem:[%s11994_s1 + $0xc64] ss:$12 sps:$4 sm:$0xff]  }
 0x119   :  { %5585 = vmatprep.subr.bf16.mxu0 %v8598_v10  ;;  %v8667_v10 = vld [vmem:[%s11994_s1 + $0x650] ss:$12 sps:$4 sm:$0xff]  }
 0x11b   :  { %7776 = vmatpush3.bf16.msra.mxu1 %v8600_v13  ;;  %v8668_v13 = vld [vmem:[%s11994_s1 + $0xc60] ss:$12 sps:$4 sm:$0xff]  }
 0x11c   :  { %5586 = vmatpush1.bf16.msra.mxu0 %v8596_v12  ;;  %7777 = vmatprep.subr.bf16.mxu1 %v8604_v15  ;;  %v8671_v12 = vld [vmem:[%s11994_s1 + $0x728] ss:$12 sps:$4 sm:$0xff]  }
 0x11d   :  { %5587 = vmatprep.subr.bf16.mxu0 %v8603_v14  ;;  %v8672_v14 = vld [vmem:[%s11994_s1 + $0x668] ss:$12 sps:$4 sm:$0xff]  }
 0x11e   :  { %v8675_v15 = vld [vmem:[%s11994_s1 + $0xc7c] ss:$12 sps:$4 sm:$0xff]  }
 0x11f   :  { %7778 = vmatpush3.bf16.msra.mxu1 %v8605_v6  ;;  %v8673_v6 = vld [vmem:[%s11994_s1 + $0xc78] ss:$12 sps:$4 sm:$0xff]  }
 0x120   :  { %5588 = vmatpush1.bf16.msra.mxu0 %v8601_v17  ;;  %7785 = vmatprep.subr.bf16.mxu1 %v8609_v20  ;;  %v8676_v17 = vld [vmem:[%s11994_s1 + $0x740] ss:$12 sps:$4 sm:$0xff]  }
 0x121   :  { %5589 = vmatprep.subr.bf16.mxu0 %v8608_v19  ;;  %v8677_v19 = vld [vmem:[%s11994_s1 + $0x680] ss:$12 sps:$4 sm:$0xff]  }
 0x122   :  { %6055 = vmatmul.mubr.bf16.vlgmr.msra.gmra.mrb[12].mxu1 %v9964_v36  ;;  %v8616_v36 = vld [vmem:[%s11994_s1 + $0xb70] ss:$12 sps:$4 sm:$0xff]   ;;  %v8680_v20 = vld [vmem:[%s11994_s1 + $0xc94] ss:$12 sps:$4 sm:$0xff]  }
 0x123   :  { %7786 = vmatpush3.bf16.msra.mxu1 %v8610_v21  ;;  %6094 = vmatprep.mubr.bf16.mxu1 %v9467_v53  ;;  %v8624_v53 = vld [vmem:[%s11994_s1 + $0x590] ss:$12 sps:$4 sm:$0xff]  }
 0x124   :  { %5590 = vmatpush1.bf16.msra.mxu0 %v8606_v35  ;;  %7787 = vmatprep.subr.bf16.mxu1 %v8614_v27  ;;  %v8681_v35 = vld [vmem:[%s11994_s1 + $0x758] ss:$12 sps:$4 sm:$0xff]   ;;  %v8678_v21 = vld [vmem:[%s11994_s1 + $0xc90] ss:$12 sps:$4 sm:$0xff]  }
 0x125   :  { %5591 = vmatprep.subr.bf16.mxu0 %v8613_v24  ;;  %v8682_v24 = vld [vmem:[%s11994_s1 + $0x698] ss:$12 sps:$4 sm:$0xff]  }
 0x126   :  { %v8685_v27 = vld [vmem:[%s11994_s1 + $0xcac] ss:$12 sps:$4 sm:$0xff]  }
 0x127   :  { %7788 = vmatpush3.bf16.msra.mxu1 %v8615_v29  ;;  %v8683_v29 = vld [vmem:[%s11994_s1 + $0xca8] ss:$12 sps:$4 sm:$0xff]  }
 0x128   :  { %5592 = vmatpush1.bf16.msra.mxu0 %v8611_v28  ;;  %7789 = vmatprep.subr.bf16.mxu1 %v8619_v31  ;;  %v8686_v28 = vld [vmem:[%s11994_s1 + $0x770] ss:$12 sps:$4 sm:$0xff]  }
 0x129   :  { %5593 = vmatprep.subr.bf16.mxu0 %v8618_v30  ;;  %v8687_v30 = vld [vmem:[%s11994_s1 + $0x6b0] ss:$12 sps:$4 sm:$0xff]  }
 0x12a   :  { %v8690_v31 = vld [vmem:[%s11994_s1 + $0xcc4] ss:$12 sps:$4 sm:$0xff]  }
 0x12b   :  { %7790 = vmatpush3.bf16.msra.mxu1 %v8620_v32  ;;  %v8688_v32 = vld [vmem:[%s11994_s1 + $0xcc0] ss:$12 sps:$4 sm:$0xff]  }
 0x12c   :  { %5594 = vmatpush1.bf16.msra.mxu0 %v8616_v36  ;;  %7791 = vmatprep.subr.bf16.mxu1 %v8624_v53  ;;  %v8691_v36 = vld [vmem:[%s11994_s1 + $0x848] ss:$12 sps:$4 sm:$0xff]  }
 0x12d   :  { %5595 = vmatprep.subr.bf16.mxu0 %v8623_v33  ;;  %v8692_v33 = vld [vmem:[%s11994_s1 + $0x788] ss:$12 sps:$4 sm:$0xff]  }
 0x12e   :  { %v8695_v53 = vld [vmem:[%s11994_s1 + $0xcdc] ss:$12 sps:$4 sm:$0xff]  }
 0x12f   :  { %7792 = vmatpush3.bf16.msra.mxu1 %v8625_v39  ;;  %v8693_v39 = vld [vmem:[%s11994_s1 + $0xcd8] ss:$12 sps:$4 sm:$0xff]  }
 0x130   :  { %5596 = vmatpush1.bf16.msra.mxu0 %v8621_v34  ;;  %7793 = vmatprep.subr.bf16.mxu1 %v8629_v23  ;;  %v8696_v34 = vld [vmem:[%s11994_s1 + $0x860] ss:$12 sps:$4 sm:$0xff]  }
 0x131   :  { %5597 = vmatprep.subr.bf16.mxu0 %v8628_v22  ;;  %v8697_v22 = vld [vmem:[%s11994_s1 + $0x7a0] ss:$12 sps:$4 sm:$0xff]  }
 0x132   :  { %v8700_v23 = vld [vmem:[%s11994_s1 + $0xcf4] ss:$12 sps:$4 sm:$0xff]  }
 0x133   :  { %7794 = vmatpush3.bf16.msra.mxu1 %v8630_v43  ;;  %v8702_v43 = vld [vmem:[%s11994_s1 + $0x7b8] ss:$12 sps:$4 sm:$0xff]  }
 0x134   :  { %5598 = vmatpush1.bf16.msra.mxu0 %v8626_v41  ;;  %7795 = vmatprep.subr.bf16.mxu1 %v8634_v45  ;;  %v8701_v41 = vld [vmem:[%s11994_s1 + $0x878] ss:$12 sps:$4 sm:$0xff]   ;;  %v8703_v45 = vld [vmem:[%s11994_s1 + $0xd08] ss:$12 sps:$4 sm:$0xff]  }
 0x135   :  { %5599 = vmatprep.subr.bf16.mxu0 %v8633_v44  ;;  %v8705_v44 = vld [vmem:[%s11994_s1 + $0xd0c] ss:$12 sps:$4 sm:$0xff]  }
 0x137   :  { %7796 = vmatpush3.bf16.msra.mxu1 %v8635_v47  ;;  %v8710_v47 = vld [vmem:[%s11994_s1 + $0xd24] ss:$12 sps:$4 sm:$0xff]  }
 0x138   :  { %5600 = vmatpush1.bf16.msra.mxu0 %v8631_v46  ;;  %7797 = vmatprep.subr.bf16.mxu1 %v8639_v48  ;;  %v8707_v46 = vld [vmem:[%s11994_s1 + $0x7d0] ss:$12 sps:$4 sm:$0xff]   ;;  %v8708_v48 = vld [vmem:[%s11994_s1 + $0xd20] ss:$12 sps:$4 sm:$0xff]  }
 0x139   :  { %5601 = vmatprep.subr.bf16.mxu0 %v8638_v49  ;;  %v8711_v49 = vld [vmem:[%s11994_s1 + $0x8a8] ss:$12 sps:$4 sm:$0xff]  }
 0x13b   :  { %7798 = vmatpush3.bf16.msra.mxu1 %v8640_v54  ;;  %v8715_v54 = vld [vmem:[%s11994_s1 + $0xd3c] ss:$12 sps:$4 sm:$0xff]  }
 0x13c   :  { %5602 = vmatpush1.bf16.msra.mxu0 %v8636_v50  ;;  %7799 = vmatprep.subr.bf16.mxu1 %v8644_v56  ;;  %v8712_v50 = vld [vmem:[%s11994_s1 + $0x7e8] ss:$12 sps:$4 sm:$0xff]   ;;  %v8713_v56 = vld [vmem:[%s11994_s1 + $0xd38] ss:$12 sps:$4 sm:$0xff]  }
 0x13d   :  { %5603 = vmatprep.subr.bf16.mxu0 %v8643_v55  ;;  %v8716_v55 = vld [vmem:[%s11994_s1 + $0x8c0] ss:$12 sps:$4 sm:$0xff]  }
 0x13f   :  { %7800 = vmatpush3.bf16.msra.mxu1 %v8645_v58  ;;  %v8720_v58 = vld [vmem:[%s11994_s1 + $0xd54] ss:$12 sps:$4 sm:$0xff]  }
 0x140   :  { %5604 = vmatpush1.bf16.msra.mxu0 %v8641_v57  ;;  %7807 = vmatprep.subr.bf16.mxu1 %v8651_v59  ;;  %v8717_v57 = vld [vmem:[%s11994_s1 + $0x800] ss:$12 sps:$4 sm:$0xff]   ;;  %v8718_v59 = vld [vmem:[%s11994_s1 + $0xd50] ss:$12 sps:$4 sm:$0xff]  }
 0x141   :  { %5614 = vmatprep.subr.bf16.mxu0 %v8650_v16  ;;  %v8721_v16 = vld [vmem:[%s11994_s1 + $0x8d8] ss:$12 sps:$4 sm:$0xff]  }
 0x142   :  { %6095 = vmatmul.mubr.bf16.vlgmr.msra.gmra.mrb[16].mxu1 %v9521_v7  ;;  %v8661_v7 = vld [vmem:[%s11994_s1 + $0x6f8] ss:$12 sps:$4 sm:$0xff]  }
 0x143   :  { %5606 = vmatmul.mubr.bf16.vlgmr.msra.gmra.mrb[0].mxu0 %v10393_v62  ;;  %7808 = vmatpush3.bf16.msra.mxu1 %v8652_v61  ;;  %v8725_v61 = vld [vmem:[%s11994_s1 + $0xd6c] ss:$12 sps:$4 sm:$0xff]  }
 0x144   :  { %5615 = vmatpush1.bf16.msra.mxu0 %v8648_v60  ;;  %7809 = vmatprep.subr.bf16.mxu1 %v8656_v0  ;;  %v8722_v60 = vld [vmem:[%s11994_s1 + $0x818] ss:$12 sps:$4 sm:$0xff]   ;;  %v8723_v0 = vld [vmem:[%s11994_s1 + $0xd68] ss:$12 sps:$4 sm:$0xff]  }
 0x145   :  { %5616 = vmatprep.subr.bf16.mxu0 %v8655_v63  ;;  %6134 = vmatprep.mubr.bf16.mxu1 %v9622_v38  ;;  %v8666_v38 = vld [vmem:[%s11994_s1 + $0x710] ss:$12 sps:$4 sm:$0xff]  }
 0x146   :  { %5646 = vmatprep.mubr.bf16.mxu0 %v10408_v52  ;;  %v8726_v63 = vld [vmem:[%s11994_s1 + $0x8f0] ss:$12 sps:$4 sm:$0xff]  }
 0x147   :  { %7810 = vmatpush3.bf16.msra.mxu1 %v8657_v2  ;;  %v8732_v2 = vld [vmem:[%s11994_s1 + $0xd84] ss:$12 sps:$4 sm:$0xff]  }
 0x148   :  { %5617 = vmatpush1.bf16.msra.mxu0 %v8653_v1  ;;  %7811 = vmatprep.subr.bf16.mxu1 %v8661_v7  ;;  %v8727_v1 = vld [vmem:[%s11994_s1 + $0x830] ss:$12 sps:$4 sm:$0xff]   ;;  %v8730_v7 = vld [vmem:[%s11994_s1 + $0xd80] ss:$12 sps:$4 sm:$0xff]  }
 0x149   :  { %5618 = vmatprep.subr.bf16.mxu0 %v8660_v3  ;;  %v8733_v3 = vld [vmem:[%s11994_s1 + $0x9c8] ss:$12 sps:$4 sm:$0xff]  }
 0x14b   :  { %7812 = vmatpush3.bf16.msra.mxu1 %v8662_v5  ;;  %v10604_v5 = vcombine.low %v10398_v25, %v10398_v25 }
 0x14c   :  { %5619 = vmatpush1.bf16.msra.mxu0 %v8658_v4  ;;  %7813 = vmatprep.subr.bf16.mxu1 %v8666_v38  ;;  %v8734_v4 = vld [vmem:[%s11994_s1 + $0x908] ss:$12 sps:$4 sm:$0xff]  }
 0x14d   :  { %5620 = vmatprep.subr.bf16.mxu0 %v8665_v8  ;;  %v10609_v8 = vld [vmem:[%s11995_s0 + $0x48] sm:$0xff] }
 0x14e   :  { %v8737_v38 = vld [vmem:[%s11994_s1 + $0xd9c] ss:$12 sps:$4 sm:$0xff]   ;;  %v10619_v25 = vcombine.high %v10609_v8, %v10609_v8 }
 0x14f   :  { %7814 = vmatpush3.bf16.msra.mxu1 %v8667_v10  ;;  %v8735_v10 = vld [vmem:[%s11994_s1 + $0xd98] ss:$12 sps:$4 sm:$0xff]  }
 0x150   :  { %5621 = vmatpush1.bf16.msra.mxu0 %v8663_v9  ;;  %7815 = vmatprep.subr.bf16.mxu1 %v8671_v12  ;;  %v8738_v9 = vld [vmem:[%s11994_s1 + $0x9e0] ss:$12 sps:$4 sm:$0xff]  }
 0x151   :  { %5622 = vmatprep.subr.bf16.mxu0 %v8670_v11  ;;  %v8739_v11 = vld [vmem:[%s11994_s1 + $0x920] ss:$12 sps:$4 sm:$0xff]  }
 0x152   :  { %v8742_v12 = vld [vmem:[%s11994_s1 + $0xdb4] ss:$12 sps:$4 sm:$0xff]  }
 0x153   :  { %7816 = vmatpush3.bf16.msra.mxu1 %v8672_v14  ;;  %v8744_v14 = vld [vmem:[%s11994_s1 + $0x938] ss:$12 sps:$4 sm:$0xff]  }
 0x154   :  { %5623 = vmatpush1.bf16.msra.mxu0 %v8668_v13  ;;  %7817 = vmatprep.subr.bf16.mxu1 %v8676_v17  ;;  %v8740_v13 = vld [vmem:[%s11994_s1 + $0xdb0] ss:$12 sps:$4 sm:$0xff]   ;;  %v8745_v17 = vld [vmem:[%s11994_s1 + $0xdc8] ss:$12 sps:$4 sm:$0xff]  }
 0x155   :  { %5624 = vmatprep.subr.bf16.mxu0 %v8675_v15  ;;  %v8747_v15 = vld [vmem:[%s11994_s1 + $0xdcc] ss:$12 sps:$4 sm:$0xff]  }
 0x157   :  { %7818 = vmatpush3.bf16.msra.mxu1 %v8677_v19  ;;  %v8752_v19 = vld [vmem:[%s11994_s1 + $0xde4] ss:$12 sps:$4 sm:$0xff]  }
 0x158   :  { %5625 = vmatpush1.bf16.msra.mxu0 %v8673_v6  ;;  %7819 = vmatprep.subr.bf16.mxu1 %v8681_v35  ;;  %v8749_v6 = vld [vmem:[%s11994_s1 + $0x950] ss:$12 sps:$4 sm:$0xff]   ;;  %v8750_v35 = vld [vmem:[%s11994_s1 + $0xde0] ss:$12 sps:$4 sm:$0xff]  }
 0x159   :  { %5626 = vmatprep.subr.bf16.mxu0 %v8680_v20  ;;  %v8753_v20 = vld [vmem:[%s11994_s1 + $0xa28] ss:$12 sps:$4 sm:$0xff]  }
 0x15b   :  { %7820 = vmatpush3.bf16.msra.mxu1 %v8682_v24  ;;  %v8757_v24 = vld [vmem:[%s11994_s1 + $0xdfc] ss:$12 sps:$4 sm:$0xff]  }
 0x15c   :  { %5627 = vmatpush1.bf16.msra.mxu0 %v8678_v21  ;;  %7821 = vmatprep.subr.bf16.mxu1 %v8686_v28  ;;  %v8754_v21 = vld [vmem:[%s11994_s1 + $0x968] ss:$12 sps:$4 sm:$0xff]   ;;  %v8755_v28 = vld [vmem:[%s11994_s1 + $0xdf8] ss:$12 sps:$4 sm:$0xff]  }
 0x15d   :  { %5628 = vmatprep.subr.bf16.mxu0 %v8685_v27  ;;  %v8758_v27 = vld [vmem:[%s11994_s1 + $0xa40] ss:$12 sps:$4 sm:$0xff]  }
 0x15f   :  { %7822 = vmatpush3.bf16.msra.mxu1 %v8687_v30  ;;  %v8762_v30 = vld [vmem:[%s11994_s1 + $0xe14] ss:$12 sps:$4 sm:$0xff]  }
 0x160   :  { %5629 = vmatpush1.bf16.msra.mxu0 %v8683_v29  ;;  %7829 = vmatprep.subr.bf16.mxu1 %v8691_v36  ;;  %v8759_v29 = vld [vmem:[%s11994_s1 + $0x980] ss:$12 sps:$4 sm:$0xff]   ;;  %v8760_v36 = vld [vmem:[%s11994_s1 + $0xe10] ss:$12 sps:$4 sm:$0xff]  }
 0x161   :  { %5630 = vmatprep.subr.bf16.mxu0 %v8690_v31  ;;  %v8763_v31 = vld [vmem:[%s11994_s1 + $0xa58] ss:$12 sps:$4 sm:$0xff]  }
 0x162   :  { %6135 = vmatmul.mubr.bf16.vlgmr.msra.gmra.mrb[20].mxu1 %v9746_v18  ;;  %v8698_v18 = vld [vmem:[%s11994_s1 + $0xcf0] ss:$12 sps:$4 sm:$0xff]  }
 0x163   :  { %7830 = vmatpush3.bf16.msra.mxu1 %v8692_v33  ;;  %6174 = vmatprep.mubr.bf16.mxu1 %v9776_v26  ;;  %v8706_v26 = vld [vmem:[%s11994_s1 + $0x890] ss:$12 sps:$4 sm:$0xff]  }
 0x164   :  { %5631 = vmatpush1.bf16.msra.mxu0 %v8688_v32  ;;  %7831 = vmatprep.subr.bf16.mxu1 %v8696_v34  ;;  %v8764_v32 = vld [vmem:[%s11994_s1 + $0x998] ss:$12 sps:$4 sm:$0xff]  }
 0x165   :  { %5632 = vmatprep.subr.bf16.mxu0 %v8695_v53  ;;  %v8767_v34 = vld [vmem:[%s11994_s1 + $0xe2c] ss:$12 sps:$4 sm:$0xff]  }
 0x167   :  { %7832 = vmatpush3.bf16.msra.mxu1 %v8697_v22  ;;  %v8768_v22 = vld [vmem:[%s11994_s1 + $0xa70] ss:$12 sps:$4 sm:$0xff]  }
 0x168   :  { %5633 = vmatpush1.bf16.msra.mxu0 %v8693_v39  ;;  %7833 = vmatprep.subr.bf16.mxu1 %v8701_v41  ;;  %v8765_v41 = vld [vmem:[%s11994_s1 + $0xe28] ss:$12 sps:$4 sm:$0xff]  }
 0x169   :  { %5634 = vmatprep.subr.bf16.mxu0 %v8700_v23 }
 0x16b   :  { %7834 = vmatpush3.bf16.msra.mxu1 %v8702_v43  ;;  %v8772_v43 = vld [vmem:[%s11994_s1 + $0xe44] ss:$12 sps:$4 sm:$0xff]  }
 0x16c   :  { %5635 = vmatpush1.bf16.msra.mxu0 %v8698_v18  ;;  %7835 = vmatprep.subr.bf16.mxu1 %v8706_v26  ;;  %v8769_v18 = vld [vmem:[%s11994_s1 + $0x9b0] ss:$12 sps:$4 sm:$0xff]   ;;  %v8770_v26 = vld [vmem:[%s11994_s1 + $0xe40] ss:$12 sps:$4 sm:$0xff]  }
 0x16d   :  { %5636 = vmatprep.subr.bf16.mxu0 %v8705_v44  ;;  %v8773_v44 = vld [vmem:[%s11994_s1 + $0xb48] ss:$12 sps:$4 sm:$0xff]  }
 0x16f   :  { %7836 = vmatpush3.bf16.msra.mxu1 %v8707_v46  ;;  %v8777_v46 = vld [vmem:[%s11994_s1 + $0xe5c] ss:$12 sps:$4 sm:$0xff]  }
 0x170   :  { %5637 = vmatpush1.bf16.msra.mxu0 %v8703_v45  ;;  %7837 = vmatprep.subr.bf16.mxu1 %v8711_v49  ;;  %v8774_v45 = vld [vmem:[%s11994_s1 + $0xa88] ss:$12 sps:$4 sm:$0xff]   ;;  %v8775_v49 = vld [vmem:[%s11994_s1 + $0xe58] ss:$12 sps:$4 sm:$0xff]  }
 0x171   :  { %5638 = vmatprep.subr.bf16.mxu0 %v8710_v47  ;;  %v8778_v47 = vld [vmem:[%s11994_s1 + $0xb60] ss:$12 sps:$4 sm:$0xff]  }
 0x173   :  { %7838 = vmatpush3.bf16.msra.mxu1 %v8712_v50  ;;  %v8782_v50 = vld [vmem:[%s11994_s1 + $0xe74] ss:$12 sps:$4 sm:$0xff]  }
 0x174   :  { %5639 = vmatpush1.bf16.msra.mxu0 %v8708_v48  ;;  %7839 = vmatprep.subr.bf16.mxu1 %v8716_v55  ;;  %v8779_v48 = vld [vmem:[%s11994_s1 + $0xaa0] ss:$12 sps:$4 sm:$0xff]   ;;  %v8784_v55 = vld [vmem:[%s11994_s1 + $0xab8] ss:$12 sps:$4 sm:$0xff]  }
 0x175   :  { %5640 = vmatprep.subr.bf16.mxu0 %v8715_v54  ;;  %v8780_v54 = vld [vmem:[%s11994_s1 + $0xe70] ss:$12 sps:$4 sm:$0xff]  }
 0x177   :  { %7840 = vmatpush3.bf16.msra.mxu1 %v8717_v57  ;;  %v8788_v57 = vld [vmem:[%s11994_s1 + $0xb90] ss:$12 sps:$4 sm:$0xff]  }
 0x178   :  { %5641 = vmatpush1.bf16.msra.mxu0 %v8713_v56  ;;  %7841 = vmatprep.subr.bf16.mxu1 %v8721_v16  ;;  %v8787_v56 = vld [vmem:[%s11994_s1 + $0xe8c] ss:$12 sps:$4 sm:$0xff]   ;;  %v8792_v16 = vld [vmem:[%s11994_s1 + $0xea4] ss:$12 sps:$4 sm:$0xff]  }
 0x179   :  { %5642 = vmatprep.subr.bf16.mxu0 %v8720_v58  ;;  %v8789_v58 = vld [vmem:[%s11994_s1 + $0xad0] ss:$12 sps:$4 sm:$0xff]  }
 0x17b   :  { %7842 = vmatpush3.bf16.msra.mxu1 %v8722_v60  ;;  %v8790_v60 = vld [vmem:[%s11994_s1 + $0xea0] ss:$12 sps:$4 sm:$0xff]  }
 0x17c   :  { %5643 = vmatpush1.bf16.msra.mxu0 %v8718_v59  ;;  %7843 = vmatprep.subr.bf16.mxu1 %v8726_v63  ;;  %v8793_v59 = vld [vmem:[%s11994_s1 + $0xba8] ss:$12 sps:$4 sm:$0xff]  }
 0x17d   :  { %5644 = vmatprep.subr.bf16.mxu0 %v8725_v61  ;;  %v8794_v61 = vld [vmem:[%s11994_s1 + $0xae8] ss:$12 sps:$4 sm:$0xff]  }
 0x17e   :  { %v8797_v63 = vld [vmem:[%s11994_s1 + $0xebc] ss:$12 sps:$4 sm:$0xff]  }
 0x17f   :  { %7844 = vmatpush3.bf16.msra.mxu1 %v8727_v1  ;;  %v8795_v1 = vld [vmem:[%s11994_s1 + $0xeb8] ss:$12 sps:$4 sm:$0xff]  }
 0x180   :  { %5645 = vmatpush1.bf16.msra.mxu0 %v8723_v0  ;;  %7851 = vmatprep.subr.bf16.mxu1 %v8733_v3  ;;  %v8798_v0 = vld [vmem:[%s11994_s1 + $0xbc0] ss:$12 sps:$4 sm:$0xff]  }
 0x181   :  { %5655 = vmatprep.subr.bf16.mxu0 %v8732_v2  ;;  %v8799_v2 = vld [vmem:[%s11994_s1 + $0xb00] ss:$12 sps:$4 sm:$0xff]  }
 0x182   :  { %6175 = vmatmul.mubr.bf16.vlgmr.msra.gmra.mrb[24].mxu1 %v9968_v37  ;;  %v8743_v37 = vld [vmem:[%s11994_s1 + $0x9f8] ss:$12 sps:$4 sm:$0xff]   ;;  %v8802_v3 = vld [vmem:[%s11994_s1 + $0xed4] ss:$12 sps:$4 sm:$0xff]  }
 0x183   :  { %5647 = vmatmul.mubr.bf16.vlgmr.msra.gmra.mrb[0].mxu0 %v10604_v5  ;;  %7852 = vmatpush3.bf16.msra.mxu1 %v8734_v4  ;;  %v8800_v4 = vld [vmem:[%s11994_s1 + $0xed0] ss:$12 sps:$4 sm:$0xff]  }
 0x184   :  { %5656 = vmatpush1.bf16.msra.mxu0 %v8730_v7  ;;  %7853 = vmatprep.subr.bf16.mxu1 %v8738_v9  ;;  %v8803_v7 = vld [vmem:[%s11994_s1 + $0xbd8] ss:$12 sps:$4 sm:$0xff]  }
 0x185   :  { %5657 = vmatprep.subr.bf16.mxu0 %v8737_v38  ;;  %6214 = vmatprep.mubr.bf16.mxu1 %v9989_v42  ;;  %v8748_v42 = vld [vmem:[%s11994_s1 + $0xa10] ss:$12 sps:$4 sm:$0xff]   ;;  %v8804_v38 = vld [vmem:[%s11994_s1 + $0xb18] ss:$12 sps:$4 sm:$0xff]  }
 0x186   :  { %5687 = vmatprep.mubr.bf16.mxu0 %v10619_v25  ;;  %v8807_v9 = vld [vmem:[%s11994_s1 + $0xeec] ss:$12 sps:$4 sm:$0xff]  }
 0x187   :  { %7854 = vmatpush3.bf16.msra.mxu1 %v8739_v11  ;;  %v8805_v11 = vld [vmem:[%s11994_s1 + $0xee8] ss:$12 sps:$4 sm:$0xff]  }
 0x188   :  { %5658 = vmatpush1.bf16.msra.mxu0 %v8735_v10  ;;  %7855 = vmatprep.subr.bf16.mxu1 %v8743_v37  ;;  %v8808_v10 = vld [vmem:[%s11994_s1 + $0xbf0] ss:$12 sps:$4 sm:$0xff]  }
 0x189   :  { %5659 = vmatprep.subr.bf16.mxu0 %v8742_v12  ;;  %v8809_v12 = vld [vmem:[%s11994_s1 + $0xb30] ss:$12 sps:$4 sm:$0xff]  }
 0x18a   :  { %v8814_v37 = vld [vmem:[%s11994_s1 + $0xf04] ss:$12 sps:$4 sm:$0xff]  }
 0x18b   :  { %7856 = vmatpush3.bf16.msra.mxu1 %v8744_v14  ;;  %v8812_v14 = vld [vmem:[%s11994_s1 + $0xf00] ss:$12 sps:$4 sm:$0xff]  }
 0x18c   :  { %5660 = vmatpush1.bf16.msra.mxu0 %v8740_v13  ;;  %7857 = vmatprep.subr.bf16.mxu1 %v8748_v42  ;;  %v8815_v13 = vld [vmem:[%s11994_s1 + $0xcc8] ss:$12 sps:$4 sm:$0xff]  }
 0x18d   :  { %5661 = vmatprep.subr.bf16.mxu0 %v8747_v15  ;;  %v10816_v15 = vcombine.low %v10609_v8, %v10609_v8  ;;  %v10821_v42 = vld [vmem:[%s11995_s0 + $0x50] sm:$0xff]  ;;  %v8820_v8 = vld [vmem:[%s11994_s1 + $0xce0] ss:$12 sps:$4 sm:$0xff]  }
 0x18f   :  { %7858 = vmatpush3.bf16.msra.mxu1 %v8749_v6  ;;  %v8819_v6 = vld [vmem:[%s11994_s1 + $0xf1c] ss:$12 sps:$4 sm:$0xff]  }
 0x190   :  { %5662 = vmatpush1.bf16.msra.mxu0 %v8745_v17  ;;  %7859 = vmatprep.subr.bf16.mxu1 %v8753_v20  ;;  %v8816_v17 = vld [vmem:[%s11994_s1 + $0xc08] ss:$12 sps:$4 sm:$0xff]   ;;  %v8817_v20 = vld [vmem:[%s11994_s1 + $0xf18] ss:$12 sps:$4 sm:$0xff]  }
 0x191   :  { %5663 = vmatprep.subr.bf16.mxu0 %v8752_v19  ;;  %v10834_v19 = vcombine.high %v10821_v42, %v10821_v42 }
 0x193   :  { %7860 = vmatpush3.bf16.msra.mxu1 %v8754_v21  ;;  %v8824_v21 = vld [vmem:[%s11994_s1 + $0xf34] ss:$12 sps:$4 sm:$0xff]  }
 0x194   :  { %5664 = vmatpush1.bf16.msra.mxu0 %v8750_v35  ;;  %7861 = vmatprep.subr.bf16.mxu1 %v8758_v27  ;;  %v8821_v35 = vld [vmem:[%s11994_s1 + $0xc20] ss:$12 sps:$4 sm:$0xff]   ;;  %v8822_v27 = vld [vmem:[%s11994_s1 + $0xf30] ss:$12 sps:$4 sm:$0xff]  }
 0x195   :  { %5665 = vmatprep.subr.bf16.mxu0 %v8757_v24  ;;  %v10691_v33 = vpop.f32.mrb[0].mxu1  ;;  %v1063_v24 = vlaneseq }
 0x196   :  { %v10693_v53 = vpop.f32.mrb[1].mxu1 }
 0x197   :  { %7862 = vmatpush3.bf16.msra.mxu1 %v8759_v29  ;;  %v5406_v39 = vpop.f32.mrb[2].mxu1  ;;  %v8829_v29 = vld [vmem:[%s11994_s1 + $0xf4c] ss:$12 sps:$4 sm:$0xff]  }
 0x198   :  { %5666 = vmatpush1.bf16.msra.mxu0 %v8755_v28  ;;  %7863 = vmatprep.subr.bf16.mxu1 %v8763_v31  ;;  %v5407_v23 = vpop.f32.mrb[3].mxu1  ;;  %v8826_v28 = vld [vmem:[%s11994_s1 + $0xc38] ss:$12 sps:$4 sm:$0xff]   ;;  %v8827_v31 = vld [vmem:[%s11994_s1 + $0xf48] ss:$12 sps:$4 sm:$0xff]  }
 0x199   :  { %5667 = vmatprep.subr.bf16.mxu0 %v8762_v30  ;;  %v8834_v39 = vld [vmem:[%s11994_s1 + $0xf64] ss:$12 sps:$4 sm:$0xff]   ;;  %v8835_v23 = vld [vmem:[%s11994_s1 + $0xd28] ss:$12 sps:$4 sm:$0xff]  }
 0x19b   :  { %7864 = vmatpush3.bf16.msra.mxu1 %v8764_v32  ;;  %v8831_v32 = vld [vmem:[%s11994_s1 + $0xc50] ss:$12 sps:$4 sm:$0xff]  }
 0x19c   :  { %5668 = vmatpush1.bf16.msra.mxu0 %v8760_v36  ;;  %7865 = vmatprep.subr.bf16.mxu1 %v8768_v22  ;;  %v10867_v36 = vshrl.u32 %v1063_v24, 7  ;;  %v8879_v24 = vld [vmem:[%s11994_s1 + $0x103c] ss:$12 sps:$4 sm:$0xff]  }
 0x19d   :  { %5669 = vmatprep.subr.bf16.mxu0 %v8767_v34 }
 0x19f   :  { %7866 = vmatpush3.bf16.msra.mxu1 %v8769_v18  ;;  %v1073_v18 = vsub.s32 2, %v10867_v36 }
 0x1a0   :  { %5670 = vmatpush1.bf16.msra.mxu0 %v8765_v41  ;;  %7873 = vmatprep.subr.bf16.mxu1 %v8773_v44  ;;  %v1061_v44 = vld [vmem:[%s11996_s2] sm:$0x7] }
 0x1a1   :  { %5671 = vmatprep.subr.bf16.mxu0 %v8772_v43 }
 0x1a2   :  { %6215 = vmatmul.mubr.bf16.vlgmr.msra.gmra.mrb[28].mxu1 %v10182_v51  ;;  %v8783_v51 = vld [vmem:[%s11994_s1 + $0xb78] ss:$12 sps:$4 sm:$0xff]  }
 0x1a3   :  { %7874 = vmatpush3.bf16.msra.mxu1 %v8774_v45  ;;  %6254 = vmatprep.mubr.bf16.mxu1 %v10197_v40  ;;  %v8785_v40 = vld [vmem:[%s11994_s1 + $0xe88] ss:$12 sps:$4 sm:$0xff]  }
 0x1a4   :  { %5672 = vmatpush1.bf16.msra.mxu0 %v8770_v26  ;;  %7875 = vmatprep.subr.bf16.mxu1 %v8778_v47  ;;  %v8832_v26 = vld [vmem:[%s11994_s1 + $0xf60] ss:$12 sps:$4 sm:$0xff]   ;;  %v8836_v45 = vld [vmem:[%s11994_s1 + $0xc68] ss:$12 sps:$4 sm:$0xff]  }
 0x1a5   :  { %5673 = vmatprep.subr.bf16.mxu0 %v8777_v46  ;;  %v8839_v46 = vld [vmem:[%s11994_s1 + $0xf7c] ss:$12 sps:$4 sm:$0xff]   ;;  %v8840_v47 = vld [vmem:[%s11994_s1 + $0xd40] ss:$12 sps:$4 sm:$0xff]  }
 0x1a7   :  { %7876 = vmatpush3.bf16.msra.mxu1 %v8779_v48  ;;  %v1074_v48 = vrot.slane %v1061_v44, %v1073_v18  ;;  %v8890_v18 = vld [vmem:[%s11994_s1 + $0xef0] ss:$12 sps:$4 sm:$0xff]   ;;  %v8887_v44 = vld [vmem:[%s11994_s1 + $0x1068] ss:$12 sps:$4 sm:$0xff]  }
 0x1a8   :  { %5674 = vmatpush1.bf16.msra.mxu0 %v8775_v49  ;;  %7877 = vmatprep.subr.bf16.mxu1 %v8783_v51  ;;  %v8837_v49 = vld [vmem:[%s11994_s1 + $0xf78] ss:$12 sps:$4 sm:$0xff]   ;;  %v8844_v51 = vld [vmem:[%s11994_s1 + $0xf94] ss:$12 sps:$4 sm:$0xff]  }
 0x1a9   :  { %5675 = vmatprep.subr.bf16.mxu0 %v8782_v50  ;;  %v8841_v50 = vld [vmem:[%s11994_s1 + $0xc80] ss:$12 sps:$4 sm:$0xff]  }
 0x1ab   :  { %7878 = vmatpush3.bf16.msra.mxu1 %v8784_v55  ;;  %v8842_v55 = vld [vmem:[%s11994_s1 + $0xf90] ss:$12 sps:$4 sm:$0xff]  }
 0x1ac   :  { %5676 = vmatpush1.bf16.msra.mxu0 %v8780_v54  ;;  %7879 = vmatprep.subr.bf16.mxu1 %v8788_v57  ;;  %v8845_v54 = vld [vmem:[%s11994_s1 + $0xd58] ss:$12 sps:$4 sm:$0xff]  }
 0x1ad   :  { %5677 = vmatprep.subr.bf16.mxu0 %v8787_v56 }
 0x1af   :  { %7880 = vmatpush3.bf16.msra.mxu1 %v8789_v58 }
 0x1b0   :  { %5678 = vmatpush1.bf16.msra.mxu0 %v8785_v40  ;;  %7881 = vmatprep.subr.bf16.mxu1 %v8793_v59  ;;  %v8846_v40 = vld [vmem:[%s11994_s1 + $0xc98] ss:$12 sps:$4 sm:$0xff]  }
 0x1b1   :  { %5679 = vmatprep.subr.bf16.mxu0 %v8792_v16 }
 0x1b3   :  { %7882 = vmatpush3.bf16.msra.mxu1 %v8794_v61  ;;  %v8850_v61 = vld [vmem:[%s11994_s1 + $0xd70] ss:$12 sps:$4 sm:$0xff]  }
 0x1b4   :  { %5680 = vmatpush1.bf16.msra.mxu0 %v8790_v60  ;;  %7883 = vmatprep.subr.bf16.mxu1 %v8798_v0  ;;  %v8849_v60 = vld [vmem:[%s11994_s1 + $0xfac] ss:$12 sps:$4 sm:$0xff]  }
 0x1b5   :  { %5681 = vmatprep.subr.bf16.mxu0 %v8797_v63  ;;  %v7735_v30 = vpop.f32.mrb[4].mxu1 }
 0x1b6   :  { %v7736_v34 = vpop.f32.mrb[5].mxu1 }
 0x1b7   :  { %7884 = vmatpush3.bf16.msra.mxu1 %v8799_v2  ;;  %v7737_v22 = vadd.f32 %v7736_v34, %v7735_v30  ;;  %v7738_v41 = vpop.f32.mrb[6].mxu1  ;;  %v8851_v2 = vld [vmem:[%s11994_s1 + $0xcb0] ss:$12 sps:$4 sm:$0xff]   ;;  %v8884_v30 = vld [vmem:[%s11994_s1 + $0x1054] ss:$12 sps:$4 sm:$0xff]  }
 0x1b8   :  { %5682 = vmatpush1.bf16.msra.mxu0 %v8795_v1  ;;  %7885 = vmatprep.subr.bf16.mxu1 %v8803_v7  ;;  %v7739_v43 = vpop.f32.mrb[7].mxu1  ;;  %v8847_v1 = vld [vmem:[%s11994_s1 + $0xfa8] ss:$12 sps:$4 sm:$0xff]   ;;  %v8889_v41 = vld [vmem:[%s11994_s1 + $0x106c] ss:$12 sps:$4 sm:$0xff]  }
 0x1b9   :  { %5683 = vmatprep.subr.bf16.mxu0 %v8802_v3  ;;  %v5977_v56 = vadd.f32 %v7737_v22, %v1074_v48  ;;  %v8854_v3 = vld [vmem:[%s11994_s1 + $0xfc4] ss:$12 sps:$4 sm:$0xff]   ;;  %v8855_v7 = vld [vmem:[%s11994_s1 + $0xe48] ss:$12 sps:$4 sm:$0xff]   ;;  %v11038_v48 = vcombine.low %v10821_v42, %v10821_v42  ;;  %v8902_v42 = vld [vmem:[%s11994_s1 + $0xfe0] ss:$12 sps:$4 sm:$0xff]  }
 0x1bb   :  { %7886 = vmatpush3.bf16.msra.mxu1 %v8804_v38  ;;  %v8856_v38 = vld [vmem:[%s11994_s1 + $0xd88] ss:$12 sps:$4 sm:$0xff]  }
 0x1bc   :  { %5684 = vmatpush1.bf16.msra.mxu0 %v8800_v4  ;;  %7887 = vmatprep.subr.bf16.mxu1 %v8808_v10  ;;  %v8852_v4 = vld [vmem:[%s11994_s1 + $0xfc0] ss:$12 sps:$4 sm:$0xff]  }
 0x1bd   :  { %5685 = vmatprep.subr.bf16.mxu0 %v8807_v9  ;;  %v8859_v9 = vld [vmem:[%s11994_s1 + $0xfdc] ss:$12 sps:$4 sm:$0xff]   ;;  %v8860_v10 = vld [vmem:[%s11994_s1 + $0xe60] ss:$12 sps:$4 sm:$0xff]  }
 0x1bf   :  { %7888 = vmatpush3.bf16.msra.mxu1 %v8809_v12  ;;  %v8861_v12 = vld [vmem:[%s11994_s1 + $0xda0] ss:$12 sps:$4 sm:$0xff]  }
 0x1c0   :  { %5686 = vmatpush1.bf16.msra.mxu0 %v8805_v11  ;;  %7895 = vmatprep.subr.bf16.mxu1 %v8815_v13  ;;  %v8857_v11 = vld [vmem:[%s11994_s1 + $0xfd8] ss:$12 sps:$4 sm:$0xff]  }
 0x1c1   :  { %5696 = vmatprep.subr.bf16.mxu0 %v8814_v37  ;;  %v8864_v37 = vld [vmem:[%s11994_s1 + $0xff4] ss:$12 sps:$4 sm:$0xff]   ;;  %v8865_v13 = vld [vmem:[%s11994_s1 + $0xe78] ss:$12 sps:$4 sm:$0xff]  }
 0x1c2   :  { %6255 = vmatmul.mubr.bf16.vlgmr.msra.gmra.mrb[32].mxu1 %v10393_v62  ;;  %v8825_v62 = vld [vmem:[%s11994_s1 + $0xcf8] ss:$12 sps:$4 sm:$0xff]  }
 0x1c3   :  { %5688 = vmatmul.mubr.bf16.vlgmr.msra.gmra.mrb[0].mxu0 %v10816_v15  ;;  %7896 = vmatpush3.bf16.msra.mxu1 %v8816_v17  ;;  %v8869_v17 = vld [vmem:[%s11994_s1 + $0x100c] ss:$12 sps:$4 sm:$0xff]  }
 0x1c4   :  { %5697 = vmatpush1.bf16.msra.mxu0 %v8812_v14  ;;  %7897 = vmatprep.subr.bf16.mxu1 %v8820_v8  ;;  %v8866_v14 = vld [vmem:[%s11994_s1 + $0xdb8] ss:$12 sps:$4 sm:$0xff]   ;;  %v8871_v8 = vld [vmem:[%s11994_s1 + $0xdd0] ss:$12 sps:$4 sm:$0xff]  }
 0x1c5   :  { %5698 = vmatprep.subr.bf16.mxu0 %v8819_v6  ;;  %6294 = vmatprep.mubr.bf16.mxu1 %v10408_v52  ;;  %v8830_v52 = vld [vmem:[%s11994_s1 + $0xd10] ss:$12 sps:$4 sm:$0xff]  }
 0x1c6   :  { %5728 = vmatprep.mubr.bf16.mxu0 %v10834_v19  ;;  %v8870_v6 = vld [vmem:[%s11994_s1 + $0xe90] ss:$12 sps:$4 sm:$0xff]  }
 0x1c7   :  { %7898 = vmatpush3.bf16.msra.mxu1 %v8821_v35  ;;  %v8875_v35 = vld [vmem:[%s11994_s1 + $0xea8] ss:$12 sps:$4 sm:$0xff]  }
 0x1c8   :  { %5699 = vmatpush1.bf16.msra.mxu0 %v8817_v20  ;;  %7899 = vmatprep.subr.bf16.mxu1 %v8825_v62  ;;  %v8874_v20 = vld [vmem:[%s11994_s1 + $0x1024] ss:$12 sps:$4 sm:$0xff]   ;;  %v8876_v62 = vld [vmem:[%s11994_s1 + $0xde8] ss:$12 sps:$4 sm:$0xff]  }
 0x1c9   :  { %5700 = vmatprep.subr.bf16.mxu0 %v8824_v21  ;;  %v8872_v21 = vld [vmem:[%s11994_s1 + $0x1020] ss:$12 sps:$4 sm:$0xff]  }
 0x1cb   :  { %7900 = vmatpush3.bf16.msra.mxu1 %v8826_v28  ;;  %v8877_v28 = vld [vmem:[%s11994_s1 + $0x1038] ss:$12 sps:$4 sm:$0xff]  }
 0x1cc   :  { %5701 = vmatpush1.bf16.msra.mxu0 %v8822_v27  ;;  %7901 = vmatprep.subr.bf16.mxu1 %v8830_v52  ;;  %v8880_v27 = vld [vmem:[%s11994_s1 + $0xec0] ss:$12 sps:$4 sm:$0xff]   ;;  %v8885_v52 = vld [vmem:[%s11994_s1 + $0xed8] ss:$12 sps:$4 sm:$0xff]  }
 0x1cd   :  { %5702 = vmatprep.subr.bf16.mxu0 %v8829_v29  ;;  %v8881_v29 = vld [vmem:[%s11994_s1 + $0xe00] ss:$12 sps:$4 sm:$0xff]  }
 0x1cf   :  { %7902 = vmatpush3.bf16.msra.mxu1 %v8831_v32  ;;  %v8886_v32 = vld [vmem:[%s11994_s1 + $0xe18] ss:$12 sps:$4 sm:$0xff]  }
 0x1d0   :  { %5703 = vmatpush1.bf16.msra.mxu0 %v8827_v31  ;;  %7903 = vmatprep.subr.bf16.mxu1 %v8835_v23  ;;  %v8882_v31 = vld [vmem:[%s11994_s1 + $0x1050] ss:$12 sps:$4 sm:$0xff]  }
 0x1d1   :  { %5704 = vmatprep.subr.bf16.mxu0 %v8834_v39 }
 0x1d3   :  { %7904 = vmatpush3.bf16.msra.mxu1 %v8836_v45  ;;  %v8891_v45 = vld [vmem:[%s11994_s1 + $0xe30] ss:$12 sps:$4 sm:$0xff]  }
 0x1d4   :  { %5705 = vmatpush1.bf16.msra.mxu0 %v8832_v26  ;;  %7905 = vmatprep.subr.bf16.mxu1 %v8840_v47  ;;  %v8897_v47 = vld [vmem:[%s11994_s1 + $0xfc8] ss:$12 sps:$4 sm:$0xff]  }
 0x1d5   :  { %5706 = vmatprep.subr.bf16.mxu0 %v8839_v46  ;;  %v7757_v57 = vpop.f32.mrb[8].mxu1  ;;  %v8896_v46 = vld [vmem:[%s11994_s1 + $0x1084] ss:$12 sps:$4 sm:$0xff]  }
 0x1d6   :  { %v7758_v58 = vpop.f32.mrb[9].mxu1 }
 0x1d7   :  { %7906 = vmatpush3.bf16.msra.mxu1 %v8841_v50  ;;  %v7759_v16 = vadd.f32 %v7758_v58, %v7757_v57  ;;  %v7760_v59 = vpop.f32.mrb[10].mxu1  ;;  %v11043_v50 = vld [vmem:[%s11995_s0 + $0x58] sm:$0xff]  ;;  %v8903_v57 = vld [vmem:[%s11994_s1 + $0xf20] ss:$12 sps:$4 sm:$0xff]  }
 0x1d8   :  { %5707 = vmatpush1.bf16.msra.mxu0 %v8837_v49  ;;  %7907 = vmatprep.subr.bf16.mxu1 %v8845_v54  ;;  %v7761_v63 = vpop.f32.mrb[11].mxu1  ;;  %v8894_v49 = vld [vmem:[%s11994_s1 + $0x1080] ss:$12 sps:$4 sm:$0xff]   ;;  %v8901_v54 = vld [vmem:[%s11994_s1 + $0x109c] ss:$12 sps:$4 sm:$0xff]  }
 0x1d9   :  { %5708 = vmatprep.subr.bf16.mxu0 %v8844_v51  ;;  %v10918_v0 = vadd.f32 %v7759_v16, %v5977_v56  ;;  %v8898_v51 = vld [vmem:[%s11994_s1 + $0xf08] ss:$12 sps:$4 sm:$0xff]   ;;  %v11059_v56 = vcombine.high %v11043_v50, %v11043_v50  ;;  %v8907_v58 = vld [vmem:[%s11994_s1 + $0xff8] ss:$12 sps:$4 sm:$0xff]  }
 0x1da   :  { %v8908_v16 = vld [vmem:[%s11994_s1 + $0xf38] ss:$12 sps:$4 sm:$0xff]  }
 0x1db   :  { %7908 = vmatpush3.bf16.msra.mxu1 %v8846_v40  ;;  %v8906_v40 = vld [vmem:[%s11994_s1 + $0x10b4] ss:$12 sps:$4 sm:$0xff]   ;;  %v8911_v59 = vld [vmem:[%s11994_s1 + $0x10cc] ss:$12 sps:$4 sm:$0xff]   ;;  %v8916_v63 = vld [vmem:[%s11994_s1 + $0x10e4] ss:$12 sps:$4 sm:$0xff]  }
 0x1dc   :  { %5709 = vmatpush1.bf16.msra.mxu0 %v8842_v55  ;;  %7909 = vmatprep.subr.bf16.mxu1 %v8850_v61  ;;  %v8899_v55 = vld [vmem:[%s11994_s1 + $0x1098] ss:$12 sps:$4 sm:$0xff]   ;;  %v8913_v61 = vld [vmem:[%s11994_s1 + $0xf50] ss:$12 sps:$4 sm:$0xff]  }
 0x1dd   :  { %5710 = vmatprep.subr.bf16.mxu0 %v8849_v60  ;;  %v8912_v60 = vld [vmem:[%s11994_s1 + $0x1010] ss:$12 sps:$4 sm:$0xff]  }
 0x1df   :  { %7910 = vmatpush3.bf16.msra.mxu1 %v8851_v2  ;;  %v8918_v2 = vld [vmem:[%s11994_s1 + $0xf68] ss:$12 sps:$4 sm:$0xff]  }
 0x1e0   :  { %5711 = vmatpush1.bf16.msra.mxu0 %v8847_v1  ;;  %7917 = vmatprep.subr.bf16.mxu1 %v8855_v7  ;;  %v8914_v1 = vld [vmem:[%s11994_s1 + $0x10e0] ss:$12 sps:$4 sm:$0xff]  }
 0x1e1   :  { %5712 = vmatprep.subr.bf16.mxu0 %v8854_v3  ;;  %v8921_v3 = vld [vmem:[%s11994_s1 + $0x10fc] ss:$12 sps:$4 sm:$0xff]   ;;  %v8922_v7 = vld [vmem:[%s11994_s1 + $0x1040] ss:$12 sps:$4 sm:$0xff]  }
 0x1e2   :  { %6295 = vmatmul.mubr.bf16.vlgmr.msra.gmra.mrb[36].mxu1 %v10604_v5  ;;  %v8862_v5 = vld [vmem:[%s11994_s1 + $0xff0] ss:$12 sps:$4 sm:$0xff]  }
 0x1e3   :  { %7918 = vmatpush3.bf16.msra.mxu1 %v8856_v38  ;;  %6334 = vmatprep.mubr.bf16.mxu1 %v10619_v25  ;;  %v8867_v25 = vld [vmem:[%s11994_s1 + $0x1008] ss:$12 sps:$4 sm:$0xff]   ;;  %v8923_v38 = vld [vmem:[%s11994_s1 + $0xf80] ss:$12 sps:$4 sm:$0xff]  }
 0x1e4   :  { %5713 = vmatpush1.bf16.msra.mxu0 %v8852_v4  ;;  %7919 = vmatprep.subr.bf16.mxu1 %v8860_v10  ;;  %v8919_v4 = vld [vmem:[%s11994_s1 + $0x10f8] ss:$12 sps:$4 sm:$0xff]  }
 0x1e5   :  { %5714 = vmatprep.subr.bf16.mxu0 %v8859_v9  ;;  %v8926_v9 = vld [vmem:[%s11994_s1 + $0x1114] ss:$12 sps:$4 sm:$0xff]   ;;  %v8927_v10 = vld [vmem:[%s11994_s1 + $0x1058] ss:$12 sps:$4 sm:$0xff]  }
 0x1e7   :  { %7920 = vmatpush3.bf16.msra.mxu1 %v8861_v12  ;;  %v8928_v12 = vld [vmem:[%s11994_s1 + $0xf98] ss:$12 sps:$4 sm:$0xff]  }
 0x1e8   :  { %5715 = vmatpush1.bf16.msra.mxu0 %v8857_v11  ;;  %7921 = vmatprep.subr.bf16.mxu1 %v8865_v13  ;;  %v8924_v11 = vld [vmem:[%s11994_s1 + $0x1110] ss:$12 sps:$4 sm:$0xff]  }
 0x1e9   :  { %5716 = vmatprep.subr.bf16.mxu0 %v8864_v37 }
 0x1eb   :  { %7922 = vmatpush3.bf16.msra.mxu1 %v8866_v14 }
 0x1ec   :  { %5717 = vmatpush1.bf16.msra.mxu0 %v8862_v5  ;;  %7923 = vmatprep.subr.bf16.mxu1 %v8870_v6  ;;  %v8932_v6 = vld [vmem:[%s11994_s1 + $0x1070] ss:$12 sps:$4 sm:$0xff]  }
 0x1ed   :  { %5718 = vmatprep.subr.bf16.mxu0 %v8869_v17  ;;  %v8931_v17 = vld [vmem:[%s11994_s1 + $0x112c] ss:$12 sps:$4 sm:$0xff]  }
 0x1ef   :  { %7924 = vmatpush3.bf16.msra.mxu1 %v8871_v8  ;;  %v8929_v8 = vld [vmem:[%s11994_s1 + $0x1128] ss:$12 sps:$4 sm:$0xff]  }
 0x1f0   :  { %5719 = vmatpush1.bf16.msra.mxu0 %v8867_v25  ;;  %7925 = vmatprep.subr.bf16.mxu1 %v8875_v35  ;;  %v8933_v35 = vld [vmem:[%s11994_s1 + $0xfb0] ss:$12 sps:$4 sm:$0xff]  }
 0x1f1   :  { %5720 = vmatprep.subr.bf16.mxu0 %v8874_v20 }
 0x1f3   :  { %7926 = vmatpush3.bf16.msra.mxu1 %v8876_v62  ;;  %v8937_v62 = vld [vmem:[%s11994_s1 + $0x1148] ss:$12 sps:$4 sm:$0xff]  }
 0x1f4   :  { %5721 = vmatpush1.bf16.msra.mxu0 %v8872_v21  ;;  %7927 = vmatprep.subr.bf16.mxu1 %v8880_v27  ;;  %v8936_v21 = vld [vmem:[%s11994_s1 + $0x1144] ss:$12 sps:$4 sm:$0xff]   ;;  %v8938_v27 = vld [vmem:[%s11994_s1 + $0x1088] ss:$12 sps:$4 sm:$0xff]  }
 0x1f5   :  { %5722 = vmatprep.subr.bf16.mxu0 %v8879_v24  ;;  %v7779_v34 = vpop.f32.mrb[12].mxu1  ;;  %v8934_v24 = vld [vmem:[%s11994_s1 + $0x1140] ss:$12 sps:$4 sm:$0xff]  }
 0x1f6   :  { %v7780_v39 = vpop.f32.mrb[13].mxu1 }
 0x1f7   :  { %7928 = vmatpush3.bf16.msra.mxu1 %v8881_v29  ;;  %v7781_v22 = vadd.f32 %v7780_v39, %v7779_v34  ;;  %v7782_v23 = vpop.f32.mrb[14].mxu1  ;;  %v8942_v29 = vld [vmem:[%s11994_s1 + $0x1160] ss:$12 sps:$4 sm:$0xff]   ;;  %v8944_v34 = vld [vmem:[%s11994_s1 + $0x1170] ss:$12 sps:$4 sm:$0xff]  }
 0x1f8   :  { %5723 = vmatpush1.bf16.msra.mxu0 %v8877_v28  ;;  %7929 = vmatprep.subr.bf16.mxu1 %v8885_v52  ;;  %v7783_v43 = vpop.f32.mrb[15].mxu1  ;;  %v8941_v28 = vld [vmem:[%s11994_s1 + $0x115c] ss:$12 sps:$4 sm:$0xff]   ;;  %v8943_v52 = vld [vmem:[%s11994_s1 + $0x10a0] ss:$12 sps:$4 sm:$0xff]  }
 0x1f9   :  { %5724 = vmatprep.subr.bf16.mxu0 %v8884_v30  ;;  %v11022_v26 = vadd.f32 %v7781_v22, %v10918_v0  ;;  %v8917_v0 = vld [vmem:[%s11994_s1 + $0x1028] ss:$12 sps:$4 sm:$0xff]   ;;  %v8939_v30 = vld [vmem:[%s11994_s1 + $0x1158] ss:$12 sps:$4 sm:$0xff]   ;;  %v8952_v23 = vld [vmem:[%s11994_s1 + $0x1190] ss:$12 sps:$4 sm:$0xff]  }
 0x1fa   :  { %v8948_v39 = vld [vmem:[%s11994_s1 + $0x10b8] ss:$12 sps:$4 sm:$0xff]  }
 0x1fb   :  { %7930 = vmatpush3.bf16.msra.mxu1 %v8886_v32  ;;  %v8947_v32 = vld [vmem:[%s11994_s1 + $0x1178] ss:$12 sps:$4 sm:$0xff]  }
 0x1fc   :  { %5725 = vmatpush1.bf16.msra.mxu0 %v8882_v31  ;;  %7931 = vmatprep.subr.bf16.mxu1 %v8890_v18  ;;  %v8946_v31 = vld [vmem:[%s11994_s1 + $0x1174] ss:$12 sps:$4 sm:$0xff]   ;;  %v8951_v22 = vld [vmem:[%s11994_s1 + $0x118c] ss:$12 sps:$4 sm:$0xff]   ;;  %v8953_v18 = vld [vmem:[%s11994_s1 + $0x10d0] ss:$12 sps:$4 sm:$0xff]  }
 0x1fd   :  { %5726 = vmatprep.subr.bf16.mxu0 %v8889_v41  ;;  %v8949_v41 = vld [vmem:[%s11994_s1 + $0x1188] ss:$12 sps:$4 sm:$0xff]   ;;  %v8956_v43 = vld [vmem:[%s11994_s1 + $0x11a4] ss:$12 sps:$4 sm:$0xff]  }
 0x1ff   :  { %7932 = vmatpush3.bf16.msra.mxu1 %v8891_v45  ;;  %v8958_v45 = vld [vmem:[%s11994_s1 + $0x10e8] ss:$12 sps:$4 sm:$0xff]  }
 0x200   :  { %5727 = vmatpush1.bf16.msra.mxu0 %v8887_v44  ;;  %7939 = vmatprep.subr.bf16.mxu1 %v8897_v47  ;;  %v8957_v44 = vld [vmem:[%s11994_s1 + $0x11a8] ss:$12 sps:$4 sm:$0xff]   ;;  %v8962_v47 = vld [vmem:[%s11994_s1 + $0x11c0] ss:$12 sps:$4 sm:$0xff]  }
 0x201   :  { %5737 = vmatprep.subr.bf16.mxu0 %v8896_v46  ;;  %v8961_v46 = vld [vmem:[%s11994_s1 + $0x11bc] ss:$12 sps:$4 sm:$0xff]  }
 0x202   :  { %6335 = vmatmul.mubr.bf16.vlgmr.msra.gmra.mrb[40].mxu1 %v10816_v15  ;;  %v8904_v15 = vld [vmem:[%s11994_s1 + $0x10b0] ss:$12 sps:$4 sm:$0xff]  }
 0x203   :  { %5729 = vmatmul.mubr.bf16.vlgmr.msra.gmra.mrb[0].mxu0 %v11038_v48  ;;  %7940 = vmatpush3.bf16.msra.mxu1 %v8898_v51  ;;  %v8966_v51 = vld [vmem:[%s11994_s1 + $0x11d4] ss:$12 sps:$4 sm:$0xff]  }
 0x204   :  { %5738 = vmatpush1.bf16.msra.mxu0 %v8894_v49  ;;  %7941 = vmatprep.subr.bf16.mxu1 %v8902_v42  ;;  %v8959_v49 = vld [vmem:[%s11994_s1 + $0x11b8] ss:$12 sps:$4 sm:$0xff]   ;;  %v8964_v42 = vld [vmem:[%s11994_s1 + $0x11d0] ss:$12 sps:$4 sm:$0xff]  }
 0x205   :  { %5739 = vmatprep.subr.bf16.mxu0 %v8901_v54  ;;  %6374 = vmatprep.mubr.bf16.mxu1 %v10834_v19  ;;  %v8909_v19 = vld [vmem:[%s11994_s1 + $0x10c8] ss:$12 sps:$4 sm:$0xff]   ;;  %v8967_v54 = vld [vmem:[%s11994_s1 + $0x11d8] ss:$12 sps:$4 sm:$0xff]  }
 0x206   :  { %5769 = vmatprep.mubr.bf16.mxu0 %v11059_v56 }
 0x207   :  { %7942 = vmatpush3.bf16.msra.mxu1 %v8903_v57 }
 0x208   :  { %5740 = vmatpush1.bf16.msra.mxu0 %v8899_v55  ;;  %7943 = vmatprep.subr.bf16.mxu1 %v8907_v58  ;;  %v8968_v55 = vld [vmem:[%s11994_s1 + $0x1118] ss:$12 sps:$4 sm:$0xff]  }
 0x209   :  { %5741 = vmatprep.subr.bf16.mxu0 %v8906_v40 }
 0x20b   :  { %7944 = vmatpush3.bf16.msra.mxu1 %v8908_v16  ;;  %v8972_v16 = vld [vmem:[%s11994_s1 + $0x11f0] ss:$12 sps:$4 sm:$0xff]  }
 0x20c   :  { %5742 = vmatpush1.bf16.msra.mxu0 %v8904_v15  ;;  %7945 = vmatprep.subr.bf16.mxu1 %v8912_v60  ;;  %v8971_v15 = vld [vmem:[%s11994_s1 + $0x11ec] ss:$12 sps:$4 sm:$0xff]   ;;  %v8969_v60 = vld [vmem:[%s11994_s1 + $0x11e8] ss:$12 sps:$4 sm:$0xff]  }
 0x20d   :  { %5743 = vmatprep.subr.bf16.mxu0 %v8911_v59 }
 0x20f   :  { %7946 = vmatpush3.bf16.msra.mxu1 %v8913_v61  ;;  %v8973_v61 = vld [vmem:[%s11994_s1 + $0x1130] ss:$12 sps:$4 sm:$0xff]  }
 0x210   :  { %5744 = vmatpush1.bf16.msra.mxu0 %v8909_v19  ;;  %7947 = vmatprep.subr.bf16.mxu1 %v8917_v0  ;;  %v8979_v0 = vld [vmem:[%s11994_s1 + $0x12c8] ss:$12 sps:$4 sm:$0xff]  }
 0x211   :  { %5745 = vmatprep.subr.bf16.mxu0 %v8916_v63  ;;  %v8978_v63 = vld [vmem:[%s11994_s1 + $0x1204] ss:$12 sps:$4 sm:$0xff]  }
 0x213   :  { %7948 = vmatpush3.bf16.msra.mxu1 %v8918_v2  ;;  %v8980_v2 = vld [vmem:[%s11994_s1 + $0x1208] ss:$12 sps:$4 sm:$0xff]  }
 0x214   :  { %5746 = vmatpush1.bf16.msra.mxu0 %v8914_v1  ;;  %7949 = vmatprep.subr.bf16.mxu1 %v8922_v7  ;;  %v8976_v1 = vld [vmem:[%s11994_s1 + $0x1200] ss:$12 sps:$4 sm:$0xff]  }
 0x215   :  { %5747 = vmatprep.subr.bf16.mxu0 %v8921_v3  ;;  %v7801_v37 = vpop.f32.mrb[16].mxu1  ;;  %v6913_v3 = vcombine.low %v11043_v50, %v11043_v50  ;;  %v11261_v7 = vld [vmem:[%s11995_s0 + $0x60] sm:$0xff] }
 0x216   :  { %v7802_v13 = vpop.f32.mrb[17].mxu1  ;;  %v8981_v50 = vld [vmem:[%s11994_s1 + $0x1218] ss:$12 sps:$4 sm:$0xff]  }
 0x217   :  { %7950 = vmatpush3.bf16.msra.mxu1 %v8923_v38  ;;  %v7803_v5 = vadd.f32 %v7802_v13, %v7801_v37  ;;  %v7804_v14 = vpop.f32.mrb[18].mxu1  ;;  %v8984_v38 = vld [vmem:[%s11994_s1 + $0x12e0] ss:$12 sps:$4 sm:$0xff]   ;;  %v8986_v37 = vld [vmem:[%s11994_s1 + $0x1230] ss:$12 sps:$4 sm:$0xff]  }
 0x218   :  { %5748 = vmatpush1.bf16.msra.mxu0 %v8919_v4  ;;  %7951 = vmatprep.subr.bf16.mxu1 %v8927_v10  ;;  %v7805_v25 = vpop.f32.mrb[19].mxu1  ;;  %v8983_v4 = vld [vmem:[%s11994_s1 + $0x121c] ss:$12 sps:$4 sm:$0xff]   ;;  %v6916_v10 = vcombine.high %v11261_v7, %v11261_v7  ;;  %v8990_v13 = vld [vmem:[%s11994_s1 + $0x1238] ss:$12 sps:$4 sm:$0xff]  }
 0x219   :  { %5749 = vmatprep.subr.bf16.mxu0 %v8926_v9  ;;  %v11138_v20 = vadd.f32 %v7803_v5, %v11022_v26  ;;  %v8954_v26 = vld [vmem:[%s11994_s1 + $0x11a0] ss:$12 sps:$4 sm:$0xff]   ;;  %v8994_v14 = vld [vmem:[%s11994_s1 + $0x1310] ss:$12 sps:$4 sm:$0xff]  }
 0x21a   :  { %v8985_v9 = vld [vmem:[%s11994_s1 + $0x1220] ss:$12 sps:$4 sm:$0xff]   ;;  %v8998_v25 = vld [vmem:[%s11994_s1 + $0x1264] ss:$12 sps:$4 sm:$0xff]  }
 0x21b   :  { %7952 = vmatpush3.bf16.msra.mxu1 %v8928_v12  ;;  %v8989_v12 = vld [vmem:[%s11994_s1 + $0x12f8] ss:$12 sps:$4 sm:$0xff]  }
 0x21c   :  { %5750 = vmatpush1.bf16.msra.mxu0 %v8924_v11  ;;  %7953 = vmatprep.subr.bf16.mxu1 %v8932_v6  ;;  %v8988_v11 = vld [vmem:[%s11994_s1 + $0x1234] ss:$12 sps:$4 sm:$0xff]   ;;  %v8993_v5 = vld [vmem:[%s11994_s1 + $0x124c] ss:$12 sps:$4 sm:$0xff]   ;;  %v8995_v6 = vld [vmem:[%s11994_s1 + $0x1250] ss:$12 sps:$4 sm:$0xff]  }
 0x21d   :  { %5751 = vmatprep.subr.bf16.mxu0 %v8931_v17  ;;  %v8991_v17 = vld [vmem:[%s11994_s1 + $0x1248] ss:$12 sps:$4 sm:$0xff]  }
 0x21f   :  { %7954 = vmatpush3.bf16.msra.mxu1 %v8933_v35  ;;  %v9000_v35 = vld [vmem:[%s11994_s1 + $0x1268] ss:$12 sps:$4 sm:$0xff]  }
 0x220   :  { %5752 = vmatpush1.bf16.msra.mxu0 %v8929_v8  ;;  %7961 = vmatprep.subr.bf16.mxu1 %v8937_v62  ;;  %v8999_v8 = vld [vmem:[%s11994_s1 + $0x1328] ss:$12 sps:$4 sm:$0xff]   ;;  %v9004_v62 = vld [vmem:[%s11994_s1 + $0x1340] ss:$12 sps:$4 sm:$0xff]  }
 0x221   :  { %5753 = vmatprep.subr.bf16.mxu0 %v8936_v21  ;;  %v9003_v21 = vld [vmem:[%s11994_s1 + $0x127c] ss:$12 sps:$4 sm:$0xff]  }
 0x222   :  { %6375 = vmatmul.mubr.bf16.vlgmr.msra.gmra.mrb[44].mxu1 %v11038_v48  ;;  %v8963_v48 = vld [vmem:[%s11994_s1 + $0x1100] ss:$12 sps:$4 sm:$0xff]  }
 0x223   :  { %7962 = vmatpush3.bf16.msra.mxu1 %v8938_v27  ;;  %6414 = vmatprep.mubr.bf16.mxu1 %v11059_v56  ;;  %v9005_v27 = vld [vmem:[%s11994_s1 + $0x1280] ss:$12 sps:$4 sm:$0xff]  }
 0x224   :  { %5754 = vmatpush1.bf16.msra.mxu0 %v8934_v24  ;;  %7963 = vmatprep.subr.bf16.mxu1 %v8942_v29  ;;  %v9001_v24 = vld [vmem:[%s11994_s1 + $0x1278] ss:$12 sps:$4 sm:$0xff]  }
 0x225   :  { %5755 = vmatprep.subr.bf16.mxu0 %v8941_v28  ;;  %v9008_v28 = vld [vmem:[%s11994_s1 + $0x1294] ss:$12 sps:$4 sm:$0xff]   ;;  %v9009_v29 = vld [vmem:[%s11994_s1 + $0x1358] ss:$12 sps:$4 sm:$0xff]  }
 0x227   :  { %7964 = vmatpush3.bf16.msra.mxu1 %v8943_v52 }
 0x228   :  { %5756 = vmatpush1.bf16.msra.mxu0 %v8939_v30  ;;  %7965 = vmatprep.subr.bf16.mxu1 %v8947_v32  ;;  %v9010_v32 = vld [vmem:[%s11994_s1 + $0x1298] ss:$12 sps:$4 sm:$0xff]  }
 0x229   :  { %5757 = vmatprep.subr.bf16.mxu0 %v8946_v31  ;;  %v9006_v31 = vld [vmem:[%s11994_s1 + $0x1290] ss:$12 sps:$4 sm:$0xff]  }
 0x22b   :  { %7966 = vmatpush3.bf16.msra.mxu1 %v8948_v39 }
 0x22c   :  { %5758 = vmatpush1.bf16.msra.mxu0 %v8944_v34  ;;  %7967 = vmatprep.subr.bf16.mxu1 %v8952_v23  ;;  %v9014_v23 = vld [vmem:[%s11994_s1 + $0x1370] ss:$12 sps:$4 sm:$0xff]  }
 0x22d   :  { %5759 = vmatprep.subr.bf16.mxu0 %v8951_v22  ;;  %v9013_v22 = vld [vmem:[%s11994_s1 + $0x12ac] ss:$12 sps:$4 sm:$0xff]  }
 0x22f   :  { %7968 = vmatpush3.bf16.msra.mxu1 %v8953_v18 }
 0x230   :  { %5760 = vmatpush1.bf16.msra.mxu0 %v8949_v41  ;;  %7969 = vmatprep.subr.bf16.mxu1 %v8957_v44  ;;  %v9015_v44 = vld [vmem:[%s11994_s1 + $0x12b0] ss:$12 sps:$4 sm:$0xff]  }
 0x231   :  { %5761 = vmatprep.subr.bf16.mxu0 %v8956_v43  ;;  %v9011_v43 = vld [vmem:[%s11994_s1 + $0x12a8] ss:$12 sps:$4 sm:$0xff]  }
 0x233   :  { %7970 = vmatpush3.bf16.msra.mxu1 %v8958_v45  ;;  %v9021_v45 = vld [vmem:[%s11994_s1 + $0x1448] ss:$12 sps:$4 sm:$0xff]  }
 0x234   :  { %5762 = vmatpush1.bf16.msra.mxu0 %v8954_v26  ;;  %7971 = vmatprep.subr.bf16.mxu1 %v8962_v47  ;;  %v9020_v26 = vld [vmem:[%s11994_s1 + $0x12c4] ss:$12 sps:$4 sm:$0xff]   ;;  %v11365_v47 = vld [vmem:[%s11995_s0 + $0x68] sm:$0xff] }
 0x235   :  { %5763 = vmatprep.subr.bf16.mxu0 %v8961_v46  ;;  %v7823_v56 = vpop.f32.mrb[20].mxu1  ;;  %v11360_v46 = vcombine.low %v11261_v7, %v11261_v7  ;;  %v9043_v7 = vld [vmem:[%s11994_s1 + $0x1338] ss:$12 sps:$4 sm:$0xff]  }
 0x236   :  { %v7824_v57 = vpop.f32.mrb[21].mxu1 }
 0x237   :  { %7972 = vmatpush3.bf16.msra.mxu1 %v8963_v48  ;;  %v7825_v40 = vadd.f32 %v7824_v57, %v7823_v56  ;;  %v7826_v58 = vpop.f32.mrb[22].mxu1  ;;  %v9022_v48 = vld [vmem:[%s11994_s1 + $0x1388] ss:$12 sps:$4 sm:$0xff]   ;;  %v9027_v56 = vld [vmem:[%s11994_s1 + $0x13a0] ss:$12 sps:$4 sm:$0xff]  }
 0x238   :  { %5764 = vmatpush1.bf16.msra.mxu0 %v8959_v49  ;;  %7973 = vmatprep.subr.bf16.mxu1 %v8967_v54  ;;  %v7827_v59 = vpop.f32.mrb[23].mxu1  ;;  %v9018_v49 = vld [vmem:[%s11994_s1 + $0x12c0] ss:$12 sps:$4 sm:$0xff]   ;;  %v9028_v58 = vld [vmem:[%s11994_s1 + $0x12f0] ss:$12 sps:$4 sm:$0xff]  }
 0x239   :  { %5765 = vmatprep.subr.bf16.mxu0 %v8966_v51  ;;  %v11239_v19 = vadd.f32 %v7825_v40, %v11138_v20  ;;  %v8996_v20 = vld [vmem:[%s11994_s1 + $0x1260] ss:$12 sps:$4 sm:$0xff]   ;;  %v9025_v51 = vld [vmem:[%s11994_s1 + $0x12dc] ss:$12 sps:$4 sm:$0xff]   ;;  %v9031_v40 = vld [vmem:[%s11994_s1 + $0x1478] ss:$12 sps:$4 sm:$0xff]  }
 0x23a   :  { %v9026_v54 = vld [vmem:[%s11994_s1 + $0x1460] ss:$12 sps:$4 sm:$0xff]   ;;  %v9036_v59 = vld [vmem:[%s11994_s1 + $0x1490] ss:$12 sps:$4 sm:$0xff]  }
 0x23b   :  { %7974 = vmatpush3.bf16.msra.mxu1 %v8968_v55  ;;  %v9023_v55 = vld [vmem:[%s11994_s1 + $0x12d8] ss:$12 sps:$4 sm:$0xff]   ;;  %v9030_v57 = vld [vmem:[%s11994_s1 + $0x12f4] ss:$12 sps:$4 sm:$0xff]  }
 0x23c   :  { %5766 = vmatpush1.bf16.msra.mxu0 %v8964_v42  ;;  %7975 = vmatprep.subr.bf16.mxu1 %v8972_v16  ;;  %v11381_v42 = vcombine.high %v11365_v47, %v11365_v47  ;;  %v9035_v16 = vld [vmem:[%s11994_s1 + $0x130c] ss:$12 sps:$4 sm:$0xff]  }
 0x23d   :  { %5767 = vmatprep.subr.bf16.mxu0 %v8971_v15  ;;  %v9032_v15 = vld [vmem:[%s11994_s1 + $0x13b8] ss:$12 sps:$4 sm:$0xff]  }
 0x23f   :  { %7976 = vmatpush3.bf16.msra.mxu1 %v8973_v61  ;;  %v9040_v61 = vld [vmem:[%s11994_s1 + $0x1324] ss:$12 sps:$4 sm:$0xff]  }
 0x240   :  { %5768 = vmatpush1.bf16.msra.mxu0 %v8969_v60  ;;  %7983 = vmatprep.subr.bf16.mxu1 %v8979_v0  ;;  %v9033_v60 = vld [vmem:[%s11994_s1 + $0x1308] ss:$12 sps:$4 sm:$0xff]   ;;  %v9038_v0 = vld [vmem:[%s11994_s1 + $0x1320] ss:$12 sps:$4 sm:$0xff]  }
 0x241   :  { %5778 = vmatprep.subr.bf16.mxu0 %v8978_v63  ;;  %v9041_v63 = vld [vmem:[%s11994_s1 + $0x14a8] ss:$12 sps:$4 sm:$0xff]  }
 0x242   :  { %6415 = vmatmul.mubr.bf16.vlgmr.msra.gmra.mrb[48].mxu1 %v6913_v3 }
 0x243   :  { %5770 = vmatmul.mubr.bf16.vlgmr.msra.gmra.mrb[0].mxu0 %v6913_v3  ;;  %7984 = vmatpush3.bf16.msra.mxu1 %v8980_v2  ;;  %v9045_v2 = vld [vmem:[%s11994_s1 + $0x133c] ss:$12 sps:$4 sm:$0xff]   ;;  %v9046_v3 = vld [vmem:[%s11994_s1 + $0x14c0] ss:$12 sps:$4 sm:$0xff]  }
 0x244   :  { %5779 = vmatpush1.bf16.msra.mxu0 %v8976_v1  ;;  %7985 = vmatprep.subr.bf16.mxu1 %v8984_v38  ;;  %v9042_v1 = vld [vmem:[%s11994_s1 + $0x13e8] ss:$12 sps:$4 sm:$0xff]  }
 0x245   :  { %5780 = vmatprep.subr.bf16.mxu0 %v8983_v4  ;;  %6454 = vmatprep.mubr.bf16.mxu1 %v6916_v10  ;;  %v9047_v4 = vld [vmem:[%s11994_s1 + $0x1400] ss:$12 sps:$4 sm:$0xff]  }
 0x246   :  { %5810 = vmatprep.mubr.bf16.mxu0 %v6916_v10  ;;  %v9050_v38 = vld [vmem:[%s11994_s1 + $0x1354] ss:$12 sps:$4 sm:$0xff]  }
 0x247   :  { %7986 = vmatpush3.bf16.msra.mxu1 %v8985_v9 }
 0x248   :  { %5781 = vmatpush1.bf16.msra.mxu0 %v8981_v50  ;;  %7987 = vmatprep.subr.bf16.mxu1 %v8989_v12  ;;  %v9051_v50 = vld [vmem:[%s11994_s1 + $0x14d8] ss:$12 sps:$4 sm:$0xff]   ;;  %v9048_v12 = vld [vmem:[%s11994_s1 + $0x1350] ss:$12 sps:$4 sm:$0xff]  }
 0x249   :  { %5782 = vmatprep.subr.bf16.mxu0 %v8988_v11 }
 0x24b   :  { %7988 = vmatpush3.bf16.msra.mxu1 %v8990_v13 }
 0x24c   :  { %5783 = vmatpush1.bf16.msra.mxu0 %v8986_v37  ;;  %7989 = vmatprep.subr.bf16.mxu1 %v8994_v14  ;;  %v9052_v37 = vld [vmem:[%s11994_s1 + $0x1418] ss:$12 sps:$4 sm:$0xff]   ;;  %v9056_v14 = vld [vmem:[%s11994_s1 + $0x14f0] ss:$12 sps:$4 sm:$0xff]  }
 0x24d   :  { %5784 = vmatprep.subr.bf16.mxu0 %v8993_v5  ;;  %v9055_v5 = vld [vmem:[%s11994_s1 + $0x136c] ss:$12 sps:$4 sm:$0xff]  }
 0x24f   :  { %7990 = vmatpush3.bf16.msra.mxu1 %v8995_v6 }
 0x250   :  { %5785 = vmatpush1.bf16.msra.mxu0 %v8991_v17  ;;  %7991 = vmatprep.subr.bf16.mxu1 %v8999_v8  ;;  %v9057_v8 = vld [vmem:[%s11994_s1 + $0x1430] ss:$12 sps:$4 sm:$0xff]  }
 0x251   :  { %5786 = vmatprep.subr.bf16.mxu0 %v8998_v25  ;;  %v9053_v25 = vld [vmem:[%s11994_s1 + $0x1368] ss:$12 sps:$4 sm:$0xff]  }
 0x253   :  { %7992 = vmatpush3.bf16.msra.mxu1 %v9000_v35  ;;  %v9063_v35 = vld [vmem:[%s11994_s1 + $0x15c8] ss:$12 sps:$4 sm:$0xff]  }
 0x254   :  { %5787 = vmatpush1.bf16.msra.mxu0 %v8996_v20  ;;  %7993 = vmatprep.subr.bf16.mxu1 %v9004_v62  ;;  %v9062_v20 = vld [vmem:[%s11994_s1 + $0x1384] ss:$12 sps:$4 sm:$0xff]  }
 0x255   :  { %5788 = vmatprep.subr.bf16.mxu0 %v9003_v21  ;;  %v7845_v30 = vpop.f32.mrb[24].mxu1  ;;  %v11474_v21 = vcombine.low %v11365_v47, %v11365_v47  ;;  %v11479_v62 = vld [vmem:[%s11995_s0 + $0x70] sm:$0xff]  ;;  %v9087_v47 = vld [vmem:[%s11994_s1 + $0x13fc] ss:$12 sps:$4 sm:$0xff]  }
 0x256   :  { %v7846_v52 = vpop.f32.mrb[25].mxu1 }
 0x257   :  { %7994 = vmatpush3.bf16.msra.mxu1 %v9005_v27  ;;  %v7847_v34 = vadd.f32 %v7846_v52, %v7845_v30  ;;  %v7848_v39 = vpop.f32.mrb[26].mxu1  ;;  %v9064_v27 = vld [vmem:[%s11994_s1 + $0x1508] ss:$12 sps:$4 sm:$0xff]   ;;  %v11495_v30 = vcombine.high %v11479_v62, %v11479_v62  ;;  %v9065_v52 = vld [vmem:[%s11994_s1 + $0x1398] ss:$12 sps:$4 sm:$0xff]  }
 0x258   :  { %5789 = vmatpush1.bf16.msra.mxu0 %v9001_v24  ;;  %7995 = vmatprep.subr.bf16.mxu1 %v9009_v29  ;;  %v7849_v41 = vpop.f32.mrb[27].mxu1  ;;  %v9060_v24 = vld [vmem:[%s11994_s1 + $0x1380] ss:$12 sps:$4 sm:$0xff]   ;;  %v9070_v39 = vld [vmem:[%s11994_s1 + $0x13b0] ss:$12 sps:$4 sm:$0xff]  }
 0x259   :  { %5790 = vmatprep.subr.bf16.mxu0 %v9008_v28  ;;  %v11344_v18 = vadd.f32 %v7847_v34, %v11239_v19  ;;  %v9037_v19 = vld [vmem:[%s11994_s1 + $0x13d0] ss:$12 sps:$4 sm:$0xff]   ;;  %v9068_v29 = vld [vmem:[%s11994_s1 + $0x15e0] ss:$12 sps:$4 sm:$0xff]   ;;  %v9073_v34 = vld [vmem:[%s11994_s1 + $0x15f8] ss:$12 sps:$4 sm:$0xff]  }
 0x25a   :  { %v9067_v28 = vld [vmem:[%s11994_s1 + $0x139c] ss:$12 sps:$4 sm:$0xff]  }
 0x25b   :  { %7996 = vmatpush3.bf16.msra.mxu1 %v9010_v32  ;;  %v9072_v32 = vld [vmem:[%s11994_s1 + $0x13b4] ss:$12 sps:$4 sm:$0xff]   ;;  %v9078_v41 = vld [vmem:[%s11994_s1 + $0x1610] ss:$12 sps:$4 sm:$0xff]  }
 0x25c   :  { %5791 = vmatpush1.bf16.msra.mxu0 %v9006_v31  ;;  %7997 = vmatprep.subr.bf16.mxu1 %v9014_v23  ;;  %v9069_v31 = vld [vmem:[%s11994_s1 + $0x1520] ss:$12 sps:$4 sm:$0xff]  }
 0x25d   :  { %5792 = vmatprep.subr.bf16.mxu0 %v9013_v22  ;;  %v9074_v22 = vld [vmem:[%s11994_s1 + $0x1538] ss:$12 sps:$4 sm:$0xff]  }
 0x25e   :  { %v9077_v23 = vld [vmem:[%s11994_s1 + $0x13cc] ss:$12 sps:$4 sm:$0xff]  }
 0x25f   :  { %7998 = vmatpush3.bf16.msra.mxu1 %v9015_v44  ;;  %v9082_v44 = vld [vmem:[%s11994_s1 + $0x13e4] ss:$12 sps:$4 sm:$0xff]  }
 0x260   :  { %5793 = vmatpush1.bf16.msra.mxu0 %v9011_v43  ;;  %8005 = vmatprep.subr.bf16.mxu1 %v9021_v45  ;;  %v9079_v43 = vld [vmem:[%s11994_s1 + $0x1550] ss:$12 sps:$4 sm:$0xff]   ;;  %v9080_v45 = vld [vmem:[%s11994_s1 + $0x13e0] ss:$12 sps:$4 sm:$0xff]  }
 0x261   :  { %5794 = vmatprep.subr.bf16.mxu0 %v9020_v26  ;;  %v9083_v26 = vld [vmem:[%s11994_s1 + $0x1628] ss:$12 sps:$4 sm:$0xff]  }
 0x262   :  { %6455 = vmatmul.mubr.bf16.vlgmr.msra.gmra.mrb[52].mxu1 %v11360_v46 }
 0x263   :  { %8006 = vmatpush3.bf16.msra.mxu1 %v9022_v48  ;;  %6494 = vmatprep.mubr.bf16.mxu1 %v11381_v42  ;;  %v9085_v48 = vld [vmem:[%s11994_s1 + $0x13f8] ss:$12 sps:$4 sm:$0xff]  }
 0x264   :  { %5795 = vmatpush1.bf16.msra.mxu0 %v9018_v49  ;;  %8007 = vmatprep.subr.bf16.mxu1 %v9026_v54  ;;  %v9088_v49 = vld [vmem:[%s11994_s1 + $0x1640] ss:$12 sps:$4 sm:$0xff]  }
 0x265   :  { %5796 = vmatprep.subr.bf16.mxu0 %v9025_v51  ;;  %v9089_v51 = vld [vmem:[%s11994_s1 + $0x1580] ss:$12 sps:$4 sm:$0xff]  }
 0x266   :  { %v9092_v54 = vld [vmem:[%s11994_s1 + $0x1414] ss:$12 sps:$4 sm:$0xff]  }
 0x267   :  { %8008 = vmatpush3.bf16.msra.mxu1 %v9027_v56 }
 0x268   :  { %5797 = vmatpush1.bf16.msra.mxu0 %v9023_v55  ;;  %8009 = vmatprep.subr.bf16.mxu1 %v9031_v40  ;;  %v9090_v40 = vld [vmem:[%s11994_s1 + $0x1410] ss:$12 sps:$4 sm:$0xff]  }
 0x269   :  { %5798 = vmatprep.subr.bf16.mxu0 %v9030_v57 }
 0x26b   :  { %8010 = vmatpush3.bf16.msra.mxu1 %v9032_v15 }
 0x26c   :  { %5799 = vmatpush1.bf16.msra.mxu0 %v9028_v58  ;;  %8011 = vmatprep.subr.bf16.mxu1 %v9036_v59  ;;  %v9094_v58 = vld [vmem:[%s11994_s1 + $0x1598] ss:$12 sps:$4 sm:$0xff]   ;;  %v9098_v59 = vld [vmem:[%s11994_s1 + $0x1670] ss:$12 sps:$4 sm:$0xff]  }
 0x26d   :  { %5800 = vmatprep.subr.bf16.mxu0 %v9035_v16  ;;  %v9097_v16 = vld [vmem:[%s11994_s1 + $0x142c] ss:$12 sps:$4 sm:$0xff]  }
 0x26f   :  { %8012 = vmatpush3.bf16.msra.mxu1 %v9037_v19 }
 0x270   :  { %5801 = vmatpush1.bf16.msra.mxu0 %v9033_v60  ;;  %8013 = vmatprep.subr.bf16.mxu1 %v9041_v63  ;;  %v9099_v63 = vld [vmem:[%s11994_s1 + $0x15b0] ss:$12 sps:$4 sm:$0xff]  }
 0x271   :  { %5802 = vmatprep.subr.bf16.mxu0 %v9040_v61  ;;  %v9095_v61 = vld [vmem:[%s11994_s1 + $0x1428] ss:$12 sps:$4 sm:$0xff]  }
 0x273   :  { %8014 = vmatpush3.bf16.msra.mxu1 %v9042_v1  ;;  %v9105_v1 = vld [vmem:[%s11994_s1 + $0x1748] ss:$12 sps:$4 sm:$0xff]  }
 0x274   :  { %5803 = vmatpush1.bf16.msra.mxu0 %v9038_v0  ;;  %8015 = vmatprep.subr.bf16.mxu1 %v9046_v3  ;;  %v9104_v0 = vld [vmem:[%s11994_s1 + $0x1444] ss:$12 sps:$4 sm:$0xff]   ;;  %v11595_v3 = vld [vmem:[%s11995_s0 + $0x78] sm:$0xff] }
 0x275   :  { %5804 = vmatprep.subr.bf16.mxu0 %v9045_v2  ;;  %v7867_v9 = vpop.f32.mrb[28].mxu1  ;;  %v11590_v2 = vcombine.low %v11479_v62, %v11479_v62  ;;  %v9126_v62 = vld [vmem:[%s11994_s1 + $0x16e8] ss:$12 sps:$4 sm:$0xff]  }
 0x276   :  { %v7868_v10 = vpop.f32.mrb[29].mxu1 }
 0x277   :  { %v7869_v11 = vadd.f32 %v7868_v10, %v7867_v9  ;;  %8016 = vmatpush3.bf16.msra.mxu1 %v9047_v4  ;;  %v7870_v13 = vpop.f32.mrb[30].mxu1  ;;  %v9106_v4 = vld [vmem:[%s11994_s1 + $0x1688] ss:$12 sps:$4 sm:$0xff]   ;;  %v11611_v9 = vcombine.high %v11595_v3, %v11595_v3  ;;  %v9107_v10 = vld [vmem:[%s11994_s1 + $0x1458] ss:$12 sps:$4 sm:$0xff]  }
 0x278   :  { %5805 = vmatpush1.bf16.msra.mxu0 %v9043_v7  ;;  %8017 = vmatprep.subr.bf16.mxu1 %v9051_v50  ;;  %v7871_v17 = vpop.f32.mrb[31].mxu1  ;;  %v9102_v7 = vld [vmem:[%s11994_s1 + $0x1440] ss:$12 sps:$4 sm:$0xff]   ;;  %v9112_v13 = vld [vmem:[%s11994_s1 + $0x1470] ss:$12 sps:$4 sm:$0xff]  }
 0x279   :  { %5806 = vmatprep.subr.bf16.mxu0 %v9050_v38  ;;  %v11458_v6 = vadd.f32 %v7869_v11, %v11344_v18  ;;  %v9075_v18 = vld [vmem:[%s11994_s1 + $0x13c8] ss:$12 sps:$4 sm:$0xff]   ;;  %v9110_v50 = vld [vmem:[%s11994_s1 + $0x1760] ss:$12 sps:$4 sm:$0xff]   ;;  %v9120_v17 = vld [vmem:[%s11994_s1 + $0x1790] ss:$12 sps:$4 sm:$0xff]  }
 0x27a   :  { %v9109_v38 = vld [vmem:[%s11994_s1 + $0x145c] ss:$12 sps:$4 sm:$0xff]   ;;  %v9111_v11 = vld [vmem:[%s11994_s1 + $0x16a0] ss:$12 sps:$4 sm:$0xff]  }
 0x27b   :  { %8018 = vmatpush3.bf16.msra.mxu1 %v9052_v37  ;;  %v9115_v37 = vld [vmem:[%s11994_s1 + $0x1778] ss:$12 sps:$4 sm:$0xff]  }
 0x27c   :  { %5807 = vmatpush1.bf16.msra.mxu0 %v9048_v12  ;;  %8019 = vmatprep.subr.bf16.mxu1 %v9056_v14  ;;  %v9114_v12 = vld [vmem:[%s11994_s1 + $0x1474] ss:$12 sps:$4 sm:$0xff]   ;;  %v9119_v14 = vld [vmem:[%s11994_s1 + $0x148c] ss:$12 sps:$4 sm:$0xff]  }
 0x27d   :  { %5808 = vmatprep.subr.bf16.mxu0 %v9055_v5  ;;  %v9116_v5 = vld [vmem:[%s11994_s1 + $0x16b8] ss:$12 sps:$4 sm:$0xff]  }
 0x27f   :  { %8020 = vmatpush3.bf16.msra.mxu1 %v9057_v8  ;;  %v9124_v8 = vld [vmem:[%s11994_s1 + $0x14a4] ss:$12 sps:$4 sm:$0xff]  }
 0x280   :  { %5809 = vmatpush1.bf16.msra.mxu0 %v9053_v25  ;;  %8027 = vmatprep.subr.bf16.mxu1 %v9063_v35  ;;  %v9121_v25 = vld [vmem:[%s11994_s1 + $0x16d0] ss:$12 sps:$4 sm:$0xff]   ;;  %v9122_v35 = vld [vmem:[%s11994_s1 + $0x14a0] ss:$12 sps:$4 sm:$0xff]  }
 0x281   :  { %5819 = vmatprep.subr.bf16.mxu0 %v9062_v20  ;;  %v9125_v20 = vld [vmem:[%s11994_s1 + $0x17a8] ss:$12 sps:$4 sm:$0xff]  }
 0x282   :  { %6495 = vmatmul.mubr.bf16.vlgmr.msra.gmra.mrb[56].mxu1 %v11474_v21 }
 0x283   :  { %5811 = vmatmul.mubr.bf16.vlgmr.msra.gmra.mrb[0].mxu0 %v11360_v46  ;;  %8028 = vmatpush3.bf16.msra.mxu1 %v9064_v27  ;;  %v9084_v46 = vld [vmem:[%s11994_s1 + $0x1568] ss:$12 sps:$4 sm:$0xff]   ;;  %v9130_v27 = vld [vmem:[%s11994_s1 + $0x17c0] ss:$12 sps:$4 sm:$0xff]  }
 0x284   :  { %5820 = vmatpush1.bf16.msra.mxu0 %v9060_v24  ;;  %8029 = vmatprep.subr.bf16.mxu1 %v9068_v29  ;;  %v9129_v24 = vld [vmem:[%s11994_s1 + $0x14bc] ss:$12 sps:$4 sm:$0xff]   ;;  %v9131_v29 = vld [vmem:[%s11994_s1 + $0x1700] ss:$12 sps:$4 sm:$0xff]  }
 0x285   :  { %5821 = vmatprep.subr.bf16.mxu0 %v9067_v28  ;;  %6534 = vmatprep.mubr.bf16.mxu1 %v11495_v30  ;;  %v9127_v28 = vld [vmem:[%s11994_s1 + $0x14b8] ss:$12 sps:$4 sm:$0xff]  }
 0x286   :  { %5851 = vmatprep.mubr.bf16.mxu0 %v11381_v42  ;;  %v9093_v42 = vld [vmem:[%s11994_s1 + $0x1658] ss:$12 sps:$4 sm:$0xff]  }
 0x287   :  { %8030 = vmatpush3.bf16.msra.mxu1 %v9069_v31  ;;  %v9135_v31 = vld [vmem:[%s11994_s1 + $0x17d8] ss:$12 sps:$4 sm:$0xff]  }
 0x288   :  { %5822 = vmatpush1.bf16.msra.mxu0 %v9065_v52  ;;  %8031 = vmatprep.subr.bf16.mxu1 %v9073_v34  ;;  %v9134_v52 = vld [vmem:[%s11994_s1 + $0x14d4] ss:$12 sps:$4 sm:$0xff]  }
 0x289   :  { %5823 = vmatprep.subr.bf16.mxu0 %v9072_v32 }
 0x28b   :  { %8032 = vmatpush3.bf16.msra.mxu1 %v9074_v22  ;;  %v9132_v22 = vld [vmem:[%s11994_s1 + $0x14d0] ss:$12 sps:$4 sm:$0xff]  }
 0x28c   :  { %5824 = vmatpush1.bf16.msra.mxu0 %v9070_v39  ;;  %8033 = vmatprep.subr.bf16.mxu1 %v9078_v41 }
 0x28d   :  { %5825 = vmatprep.subr.bf16.mxu0 %v9077_v23  ;;  %v9136_v23 = vld [vmem:[%s11994_s1 + $0x1718] ss:$12 sps:$4 sm:$0xff]  }
 0x28f   :  { %8034 = vmatpush3.bf16.msra.mxu1 %v9079_v43  ;;  %v9140_v43 = vld [vmem:[%s11994_s1 + $0x17f0] ss:$12 sps:$4 sm:$0xff]  }
 0x290   :  { %5826 = vmatpush1.bf16.msra.mxu0 %v9075_v18  ;;  %8035 = vmatprep.subr.bf16.mxu1 %v9083_v26  ;;  %v9139_v18 = vld [vmem:[%s11994_s1 + $0x14ec] ss:$12 sps:$4 sm:$0xff]  }
 0x291   :  { %5827 = vmatprep.subr.bf16.mxu0 %v9082_v44 }
 0x293   :  { %8036 = vmatpush3.bf16.msra.mxu1 %v9084_v46  ;;  %v9141_v46 = vld [vmem:[%s11994_s1 + $0x1730] ss:$12 sps:$4 sm:$0xff]  }
 0x294   :  { %5828 = vmatpush1.bf16.msra.mxu0 %v9080_v45  ;;  %8037 = vmatprep.subr.bf16.mxu1 %v9088_v49  ;;  %v9137_v45 = vld [vmem:[%s11994_s1 + $0x14e8] ss:$12 sps:$4 sm:$0xff]   ;;  %v11699_v49 = vcombine.low %v11595_v3, %v11595_v3 }
 0x295   :  { %5829 = vmatprep.subr.bf16.mxu0 %v9087_v47  ;;  %v7889_v55 = vpop.f32.mrb[32].mxu1  ;;  %v9146_v47 = vld [vmem:[%s11994_s1 + $0x1504] ss:$12 sps:$4 sm:$0xff]   ;;  %v9165_v3 = vld [vmem:[%s11994_s1 + $0x15a8] ss:$12 sps:$4 sm:$0xff]  }
 0x296   :  { %v7890_v56 = vpop.f32.mrb[33].mxu1 }
 0x297   :  { %v7891_v57 = vadd.f32 %v7890_v56, %v7889_v55  ;;  %8038 = vmatpush3.bf16.msra.mxu1 %v9089_v51  ;;  %v7892_v15 = vpop.f32.mrb[34].mxu1  ;;  %v9149_v51 = vld [vmem:[%s11994_s1 + $0x151c] ss:$12 sps:$4 sm:$0xff]   ;;  %v9158_v56 = vld [vmem:[%s11994_s1 + $0x1564] ss:$12 sps:$4 sm:$0xff]  }
 0x298   :  { %5830 = vmatpush1.bf16.msra.mxu0 %v9085_v48  ;;  %8039 = vmatprep.subr.bf16.mxu1 %v9093_v42  ;;  %v7893_v60 = vpop.f32.mrb[35].mxu1  ;;  %v9144_v48 = vld [vmem:[%s11994_s1 + $0x1500] ss:$12 sps:$4 sm:$0xff]   ;;  %v9150_v55 = vld [vmem:[%s11994_s1 + $0x1530] ss:$12 sps:$4 sm:$0xff]  }
 0x299   :  { %5831 = vmatprep.subr.bf16.mxu0 %v9092_v54  ;;  %v11574_v19 = vadd.f32 %v7891_v57, %v11458_v6  ;;  %v9117_v6 = vld [vmem:[%s11994_s1 + $0x1488] ss:$12 sps:$4 sm:$0xff]   ;;  %v9147_v54 = vld [vmem:[%s11994_s1 + $0x1518] ss:$12 sps:$4 sm:$0xff]   ;;  %v9156_v57 = vld [vmem:[%s11994_s1 + $0x1560] ss:$12 sps:$4 sm:$0xff]  }
 0x29a   :  { %v9152_v42 = vld [vmem:[%s11994_s1 + $0x1534] ss:$12 sps:$4 sm:$0xff]  }
 0x29b   :  { %8040 = vmatpush3.bf16.msra.mxu1 %v9094_v58  ;;  %v9159_v58 = vld [vmem:[%s11994_s1 + $0x1578] ss:$12 sps:$4 sm:$0xff]   ;;  %v9164_v15 = vld [vmem:[%s11994_s1 + $0x1594] ss:$12 sps:$4 sm:$0xff]  }
 0x29c   :  { %5832 = vmatpush1.bf16.msra.mxu0 %v9090_v40  ;;  %8041 = vmatprep.subr.bf16.mxu1 %v9098_v59  ;;  %v9161_v40 = vld [vmem:[%s11994_s1 + $0x157c] ss:$12 sps:$4 sm:$0xff]  }
 0x29d   :  { %5833 = vmatprep.subr.bf16.mxu0 %v9097_v16 }
 0x29f   :  { %8042 = vmatpush3.bf16.msra.mxu1 %v9099_v63  ;;  %v9167_v63 = vld [vmem:[%s11994_s1 + $0x15ac] ss:$12 sps:$4 sm:$0xff]  }
 0x2a0   :  { %5834 = vmatpush1.bf16.msra.mxu0 %v9095_v61  ;;  %8049 = vmatprep.subr.bf16.mxu1 %v9105_v1 }
 0x2a1   :  { %5835 = vmatprep.subr.bf16.mxu0 %v9104_v0 }
 0x2a2   :  { %6535 = vmatmul.mubr.bf16.vlgmr.msra.gmra.mrb[60].mxu1 %v11590_v2 }
 0x2a3   :  { %8050 = vmatpush3.bf16.msra.mxu1 %v9106_v4  ;;  %6574 = vmatprep.mubr.bf16.mxu1 %v11611_v9  ;;  %v9168_v4 = vld [vmem:[%s11994_s1 + $0x15c0] ss:$12 sps:$4 sm:$0xff]  }
 0x2a4   :  { %5836 = vmatpush1.bf16.msra.mxu0 %v9102_v7  ;;  %8051 = vmatprep.subr.bf16.mxu1 %v9110_v50  ;;  %v9170_v7 = vld [vmem:[%s11994_s1 + $0x15c4] ss:$12 sps:$4 sm:$0xff]  }
 0x2a5   :  { %5837 = vmatprep.subr.bf16.mxu0 %v9109_v38  ;;  %v9173_v38 = vld [vmem:[%s11994_s1 + $0x15dc] ss:$12 sps:$4 sm:$0xff]   ;;  %v9171_v50 = vld [vmem:[%s11994_s1 + $0x15d8] ss:$12 sps:$4 sm:$0xff]  }
 0x2a7   :  { %8052 = vmatpush3.bf16.msra.mxu1 %v9111_v11  ;;  %v9174_v11 = vld [vmem:[%s11994_s1 + $0x15f0] ss:$12 sps:$4 sm:$0xff]  }
 0x2a8   :  { %5838 = vmatpush1.bf16.msra.mxu0 %v9107_v10  ;;  %8053 = vmatprep.subr.bf16.mxu1 %v9115_v37  ;;  %v9176_v10 = vld [vmem:[%s11994_s1 + $0x15f4] ss:$12 sps:$4 sm:$0xff]  }
 0x2a9   :  { %5839 = vmatprep.subr.bf16.mxu0 %v9114_v12  ;;  %v9179_v12 = vld [vmem:[%s11994_s1 + $0x160c] ss:$12 sps:$4 sm:$0xff]   ;;  %v9177_v37 = vld [vmem:[%s11994_s1 + $0x1608] ss:$12 sps:$4 sm:$0xff]  }
 0x2ab   :  { %8054 = vmatpush3.bf16.msra.mxu1 %v9116_v5  ;;  %v9180_v5 = vld [vmem:[%s11994_s1 + $0x1620] ss:$12 sps:$4 sm:$0xff]  }
 0x2ac   :  { %5840 = vmatpush1.bf16.msra.mxu0 %v9112_v13  ;;  %8055 = vmatprep.subr.bf16.mxu1 %v9120_v17  ;;  %v9182_v13 = vld [vmem:[%s11994_s1 + $0x1624] ss:$12 sps:$4 sm:$0xff]  }
 0x2ad   :  { %5841 = vmatprep.subr.bf16.mxu0 %v9119_v14  ;;  %v9185_v14 = vld [vmem:[%s11994_s1 + $0x163c] ss:$12 sps:$4 sm:$0xff]   ;;  %v9183_v17 = vld [vmem:[%s11994_s1 + $0x1638] ss:$12 sps:$4 sm:$0xff]  }
 0x2af   :  { %8056 = vmatpush3.bf16.msra.mxu1 %v9121_v25 }
 0x2b0   :  { %5842 = vmatpush1.bf16.msra.mxu0 %v9117_v6  ;;  %8057 = vmatprep.subr.bf16.mxu1 %v9125_v20  ;;  %v9188_v6 = vld [vmem:[%s11994_s1 + $0x1654] ss:$12 sps:$4 sm:$0xff]  }
 0x2b1   :  { %5843 = vmatprep.subr.bf16.mxu0 %v9124_v8 }
 0x2b3   :  { %8058 = vmatpush3.bf16.msra.mxu1 %v9126_v62 }
 0x2b4   :  { %5844 = vmatpush1.bf16.msra.mxu0 %v9122_v35  ;;  %8059 = vmatprep.subr.bf16.mxu1 %v9130_v27  ;;  %v9186_v35 = vld [vmem:[%s11994_s1 + $0x1650] ss:$12 sps:$4 sm:$0xff]  }
 0x2b5   :  { %5845 = vmatprep.subr.bf16.mxu0 %v9129_v24  ;;  %v7911_v32 = vpop.f32.mrb[36].mxu1  ;;  %v9191_v24 = vld [vmem:[%s11994_s1 + $0x166c] ss:$12 sps:$4 sm:$0xff]  }
 0x2b6   :  { %v7912_v34 = vpop.f32.mrb[37].mxu1 }
 0x2b7   :  { %v7913_v39 = vadd.f32 %v7912_v34, %v7911_v32  ;;  %8060 = vmatpush3.bf16.msra.mxu1 %v9131_v29  ;;  %v7914_v41 = vpop.f32.mrb[38].mxu1  ;;  %v9189_v29 = vld [vmem:[%s11994_s1 + $0x1668] ss:$12 sps:$4 sm:$0xff]   ;;  %v9195_v34 = vld [vmem:[%s11994_s1 + $0x1698] ss:$12 sps:$4 sm:$0xff]  }
 0x2b8   :  { %5846 = vmatpush1.bf16.msra.mxu0 %v9127_v28  ;;  %8061 = vmatprep.subr.bf16.mxu1 %v9135_v31  ;;  %v7915_v44 = vpop.f32.mrb[39].mxu1  ;;  %v9192_v31 = vld [vmem:[%s11994_s1 + $0x1680] ss:$12 sps:$4 sm:$0xff]   ;;  %v9197_v32 = vld [vmem:[%s11994_s1 + $0x169c] ss:$12 sps:$4 sm:$0xff]  }
 0x2b9   :  { %5847 = vmatprep.subr.bf16.mxu0 %v9134_v52  ;;  %v6297_v26 = vadd.f32 %v7913_v39, %v11574_v19  ;;  %v9162_v19 = vld [vmem:[%s11994_s1 + $0x1590] ss:$12 sps:$4 sm:$0xff]   ;;  %v9200_v39 = vld [vmem:[%s11994_s1 + $0x16b4] ss:$12 sps:$4 sm:$0xff]  }
 0x2ba   :  { %v9194_v52 = vld [vmem:[%s11994_s1 + $0x1684] ss:$12 sps:$4 sm:$0xff]   ;;  %v9204_v41 = vld [vmem:[%s11994_s1 + $0x16e0] ss:$12 sps:$4 sm:$0xff]  }
 0x2bb   :  { %8062 = vmatpush3.bf16.msra.mxu1 %v9136_v23  ;;  %v9206_v23 = vld [vmem:[%s11994_s1 + $0x16e4] ss:$12 sps:$4 sm:$0xff]   ;;  %v9212_v44 = vld [vmem:[%s11994_s1 + $0x1714] ss:$12 sps:$4 sm:$0xff]  }
 0x2bc   :  { %5848 = vmatpush1.bf16.msra.mxu0 %v9132_v22  ;;  %8063 = vmatprep.subr.bf16.mxu1 %v9140_v43  ;;  %v9198_v22 = vld [vmem:[%s11994_s1 + $0x16b0] ss:$12 sps:$4 sm:$0xff]   ;;  %v9207_v43 = vld [vmem:[%s11994_s1 + $0x16f8] ss:$12 sps:$4 sm:$0xff]  }
 0x2bd   :  { %5849 = vmatprep.subr.bf16.mxu0 %v9139_v18  ;;  %v9209_v18 = vld [vmem:[%s11994_s1 + $0x16fc] ss:$12 sps:$4 sm:$0xff]  }
 0x2bf   :  { %8064 = vmatpush3.bf16.msra.mxu1 %v9141_v46 }
 0x2c0   :  { %5850 = vmatpush1.bf16.msra.mxu0 %v9137_v45 }
 0x2c1   :  { %5860 = vmatprep.subr.bf16.mxu0 %v9146_v47  ;;  %v9210_v47 = vld [vmem:[%s11994_s1 + $0x1710] ss:$12 sps:$4 sm:$0xff]  }
 0x2c2   :  { %6575 = vmatmul.mubr.bf16.vlgmr.msra.gmra.mrb[64].mxu1 %v11699_v49 }
 0x2c3   :  { %5852 = vmatmul.mubr.bf16.vlgmr.msra.gmra.mrb[0].mxu0 %v11474_v21  ;;  %v9155_v21 = vld [vmem:[%s11994_s1 + $0x154c] ss:$12 sps:$4 sm:$0xff]  }
 0x2c4   :  { %5861 = vmatpush1.bf16.msra.mxu0 %v9144_v48  ;;  %5892 = vmatprep.mubr.bf16.mxu0 %v11495_v30  ;;  %v9153_v30 = vld [vmem:[%s11994_s1 + $0x1548] ss:$12 sps:$4 sm:$0xff]  }
 0x2c5   :  { %5862 = vmatprep.subr.bf16.mxu0 %v9149_v51  ;;  %v9215_v51 = vld [vmem:[%s11994_s1 + $0x172c] ss:$12 sps:$4 sm:$0xff]  }
 0x2c8   :  { %5863 = vmatpush1.bf16.msra.mxu0 %v9147_v54 }
 0x2c9   :  { %5864 = vmatprep.subr.bf16.mxu0 %v9152_v42 }
 0x2cc   :  { %5865 = vmatpush1.bf16.msra.mxu0 %v9150_v55  ;;  %v9213_v55 = vld [vmem:[%s11994_s1 + $0x1728] ss:$12 sps:$4 sm:$0xff]  }
 0x2cd   :  { %5866 = vmatprep.subr.bf16.mxu0 %v9155_v21  ;;  %v9218_v21 = vld [vmem:[%s11994_s1 + $0x1744] ss:$12 sps:$4 sm:$0xff]  }
 0x2d0   :  { %5867 = vmatpush1.bf16.msra.mxu0 %v9153_v30  ;;  %v9216_v30 = vld [vmem:[%s11994_s1 + $0x1740] ss:$12 sps:$4 sm:$0xff]  }
 0x2d1   :  { %5868 = vmatprep.subr.bf16.mxu0 %v9158_v56  ;;  %v9221_v56 = vld [vmem:[%s11994_s1 + $0x175c] ss:$12 sps:$4 sm:$0xff]  }
 0x2d4   :  { %5869 = vmatpush1.bf16.msra.mxu0 %v9156_v57  ;;  %v9219_v57 = vld [vmem:[%s11994_s1 + $0x1758] ss:$12 sps:$4 sm:$0xff]  }
 0x2d5   :  { %5870 = vmatprep.subr.bf16.mxu0 %v9161_v40  ;;  %v7933_v16 = vpop.f32.mrb[40].mxu1  ;;  %v9224_v40 = vld [vmem:[%s11994_s1 + $0x1774] ss:$12 sps:$4 sm:$0xff]  }
 0x2d6   :  { %v7934_v59 = vpop.f32.mrb[41].mxu1 }
 0x2d7   :  { %v7935_v60 = vadd.f32 %v7934_v59, %v7933_v16  ;;  %v7936_v61 = vpop.f32.mrb[42].mxu1  ;;  %v9225_v16 = vld [vmem:[%s11994_s1 + $0x1788] ss:$12 sps:$4 sm:$0xff]   ;;  %v9230_v59 = vld [vmem:[%s11994_s1 + $0x17a4] ss:$12 sps:$4 sm:$0xff]  }
 0x2d8   :  { %5871 = vmatpush1.bf16.msra.mxu0 %v9159_v58  ;;  %v7937_v0 = vpop.f32.mrb[43].mxu1  ;;  %v9222_v58 = vld [vmem:[%s11994_s1 + $0x1770] ss:$12 sps:$4 sm:$0xff]   ;;  %v9231_v61 = vld [vmem:[%s11994_s1 + $0x17b8] ss:$12 sps:$4 sm:$0xff]  }
 0x2d9   :  { %5872 = vmatprep.subr.bf16.mxu0 %v9164_v15  ;;  %v6337_v1 = vadd.f32 %v7935_v60, %v6297_v26  ;;  %v9227_v15 = vld [vmem:[%s11994_s1 + $0x178c] ss:$12 sps:$4 sm:$0xff]  }
 0x2da   :  { %v9228_v60 = vld [vmem:[%s11994_s1 + $0x17a0] ss:$12 sps:$4 sm:$0xff]  }
 0x2dc   :  { %5873 = vmatpush1.bf16.msra.mxu0 %v9162_v19  ;;  %v9233_v19 = vld [vmem:[%s11994_s1 + $0x17bc] ss:$12 sps:$4 sm:$0xff]  }
 0x2dd   :  { %5874 = vmatprep.subr.bf16.mxu0 %v9167_v63  ;;  %v9236_v63 = vld [vmem:[%s11994_s1 + $0x17d4] ss:$12 sps:$4 sm:$0xff]  }
 0x2e0   :  { %5875 = vmatpush1.bf16.msra.mxu0 %v9165_v3 }
 0x2e1   :  { %5876 = vmatprep.subr.bf16.mxu0 %v9170_v7  ;;  %v9234_v7 = vld [vmem:[%s11994_s1 + $0x17d0] ss:$12 sps:$4 sm:$0xff]  }
 0x2e4   :  { %5877 = vmatpush1.bf16.msra.mxu0 %v9168_v4 }
 0x2e5   :  { %5878 = vmatprep.subr.bf16.mxu0 %v9173_v38  ;;  %v9239_v38 = vld [vmem:[%s11994_s1 + $0x17ec] ss:$12 sps:$4 sm:$0xff]  }
 0x2e8   :  { %5879 = vmatpush1.bf16.msra.mxu0 %v9171_v50 }
 0x2e9   :  { %5880 = vmatprep.subr.bf16.mxu0 %v9176_v10 }
 0x2ec   :  { %5881 = vmatpush1.bf16.msra.mxu0 %v9174_v11  ;;  %v9237_v11 = vld [vmem:[%s11994_s1 + $0x17e8] ss:$12 sps:$4 sm:$0xff]  }
 0x2ed   :  { %5882 = vmatprep.subr.bf16.mxu0 %v9179_v12 }
 0x2f0   :  { %5883 = vmatpush1.bf16.msra.mxu0 %v9177_v37 }
 0x2f1   :  { %5884 = vmatprep.subr.bf16.mxu0 %v9182_v13 }
 0x2f4   :  { %5885 = vmatpush1.bf16.msra.mxu0 %v9180_v5 }
 0x2f5   :  { %5886 = vmatprep.subr.bf16.mxu0 %v9185_v14  ;;  %v7955_v25 = vpop.f32.mrb[44].mxu1 }
 0x2f6   :  { %v7956_v8 = vpop.f32.mrb[45].mxu1 }
 0x2f7   :  { %v7957_v20 = vadd.f32 %v7956_v8, %v7955_v25  ;;  %v7958_v62 = vpop.f32.mrb[46].mxu1 }
 0x2f8   :  { %5887 = vmatpush1.bf16.msra.mxu0 %v9183_v17  ;;  %v7959_v27 = vpop.f32.mrb[47].mxu1 }
 0x2f9   :  { %5888 = vmatprep.subr.bf16.mxu0 %v9188_v6  ;;  %v6377_v28 = vadd.f32 %v7957_v20, %v6337_v1  ;;  %v9240_v27 = vld [vmem:[%s11997_s3 + $0x40] sm:$0xff]  }
 0x2fa   :  { %8071 = vmatprep.subr.bf16.mxu1 %v9240_v27 }
 0x2fc   :  { %5889 = vmatpush1.bf16.msra.mxu0 %v9186_v35 }
 0x2fd   :  { %5890 = vmatprep.subr.bf16.mxu0 %v9191_v24 }
 0x300   :  { %5891 = vmatpush1.bf16.msra.mxu0 %v9189_v29 }
 0x301   :  { %5901 = vmatprep.subr.bf16.mxu0 %v9194_v52 }
 0x303   :  { %5893 = vmatmul.mubr.bf16.vlgmr.msra.gmra.mrb[0].mxu0 %v11590_v2  ;;  %v9203_v2 = vld [vmem:[%s11994_s1 + $0x16cc] ss:$12 sps:$4 sm:$0xff]  }
 0x304   :  { %5902 = vmatpush1.bf16.msra.mxu0 %v9192_v31  ;;  %5933 = vmatprep.mubr.bf16.mxu0 %v11611_v9  ;;  %v9201_v9 = vld [vmem:[%s11994_s1 + $0x16c8] ss:$12 sps:$4 sm:$0xff]  }
 0x305   :  { %5903 = vmatprep.subr.bf16.mxu0 %v9197_v32  ;;  %v9242_v31 = vld [vmem:[%s11997_s3 + $0x48] sm:$0xff]  }
 0x308   :  { %5904 = vmatpush1.bf16.msra.mxu0 %v9195_v34  ;;  %v9243_v34 = vld [vmem:[%s11997_s3 + $0x8] sm:$0xff]  }
 0x309   :  { %5905 = vmatprep.subr.bf16.mxu0 %v9200_v39 }
 0x30c   :  { %5906 = vmatpush1.bf16.msra.mxu0 %v9198_v22  ;;  %v9244_v22 = vld [vmem:[%s11997_s3 + $0x50] sm:$0xff]  }
 0x30d   :  { %5907 = vmatprep.subr.bf16.mxu0 %v9203_v2  ;;  %v9245_v2 = vld [vmem:[%s11997_s3 + $0x10] sm:$0xff]  }
 0x310   :  { %5908 = vmatpush1.bf16.msra.mxu0 %v9201_v9  ;;  %v9246_v9 = vld [vmem:[%s11997_s3 + $0x58] sm:$0xff]  }
 0x311   :  { %5909 = vmatprep.subr.bf16.mxu0 %v9206_v23  ;;  %v9247_v23 = vld [vmem:[%s11997_s3 + $0x18] sm:$0xff]  }
 0x314   :  { %5910 = vmatpush1.bf16.msra.mxu0 %v9204_v41  ;;  %v9248_v41 = vld [vmem:[%s11997_s3 + $0x60] sm:$0xff]  }
 0x315   :  { %5911 = vmatprep.subr.bf16.mxu0 %v9209_v18  ;;  %v7977_v26 = vpop.f32.mrb[48].mxu1  ;;  %v9249_v18 = vld [vmem:[%s11997_s3 + $0x20] sm:$0xff]  }
 0x316   :  { %v7978_v45 = vpop.f32.mrb[49].mxu1 }
 0x317   :  { %v7979_v46 = vadd.f32 %v7978_v45, %v7977_v26  ;;  %v7980_v48 = vpop.f32.mrb[50].mxu1  ;;  %v9252_v26 = vld [vmem:[%s11997_s3 + $0x70] sm:$0xff]  }
 0x318   :  { %5912 = vmatpush1.bf16.msra.mxu0 %v9207_v43  ;;  %v7981_v54 = vpop.f32.mrb[51].mxu1  ;;  %v9250_v43 = vld [vmem:[%s11997_s3 + $0x68] sm:$0xff]   ;;  %v9253_v45 = vld [vmem:[%s11997_s3 + $0x30] sm:$0xff]   ;;  %v9277_v48 = vmov 0.0  }
 0x319   :  { %5913 = vmatprep.subr.bf16.mxu0 %v9212_v44  ;;  %v6417_v42 = vadd.f32 %v7979_v46, %v6377_v28  ;;  %v9251_v44 = vld [vmem:[%s11997_s3 + $0x28] sm:$0xff]   ;;  %v9254_v46 = vld [vmem:[%s11997_s3 + $0x78] sm:$0xff]   ;;  %v1069_v54 = vsub.s32 1, %v10867_v36 }
 0x31c   :  { %5914 = vmatpush1.bf16.msra.mxu0 %v9210_v47  ;;  %v9255_v47 = vld [vmem:[%s11997_s3 + $0x38] sm:$0xff]  }
 0x31d   :  { %5915 = vmatprep.subr.bf16.mxu0 %v9215_v51  ;;  %v1065_v51 = vsub.s32 0, %v10867_v36 }
 0x320   :  { %5916 = vmatpush1.bf16.msra.mxu0 %v9213_v55 }
 0x321   :  { %5917 = vmatprep.subr.bf16.mxu0 %v9218_v21 }
 0x324   :  { %5918 = vmatpush1.bf16.msra.mxu0 %v9216_v30 }
 0x325   :  { %5919 = vmatprep.subr.bf16.mxu0 %v9221_v56 }
 0x328   :  { %5920 = vmatpush1.bf16.msra.mxu0 %v9219_v57 }
 0x329   :  { %5921 = vmatprep.subr.bf16.mxu0 %v9224_v40 }
 0x32c   :  { %5922 = vmatpush1.bf16.msra.mxu0 %v9222_v58 }
 0x32d   :  { %5923 = vmatprep.subr.bf16.mxu0 %v9227_v15 }
 0x330   :  { %5924 = vmatpush1.bf16.msra.mxu0 %v9225_v16 }
 0x331   :  { %5925 = vmatprep.subr.bf16.mxu0 %v9230_v59 }
 0x334   :  { %5926 = vmatpush1.bf16.msra.mxu0 %v9228_v60 }
 0x335   :  { %5927 = vmatprep.subr.bf16.mxu0 %v9233_v19  ;;  %v7999_v0 = vpop.f32.mrb[52].mxu1 }
 0x336   :  { %v8000_v1 = vpop.f32.mrb[53].mxu1 }
 0x337   :  { %v8001_v3 = vadd.f32 %v8000_v1, %v7999_v0  ;;  %v8002_v4 = vpop.f32.mrb[54].mxu1 }
 0x338   :  { %5928 = vmatpush1.bf16.msra.mxu0 %v9231_v61  ;;  %v8003_v50 = vpop.f32.mrb[55].mxu1 }
 0x339   :  { %5929 = vmatprep.subr.bf16.mxu0 %v9236_v63  ;;  %v6457_v10 = vadd.f32 %v8001_v3, %v6417_v42  ;;  %v9276_v42 = vld [vmem:[%s11996_s2] sm:$0x7] }
 0x33a   :  { %v1066_v55 = vrot.slane %v9276_v42, %v1065_v51  ;;  %v1070_v21 = vrot.slane %v9276_v42, %v1069_v54 }
 0x33c   :  { %5930 = vmatpush1.bf16.msra.mxu0 %v9234_v7  ;;  %v8122_v30 = vadd.f32 %v10691_v33, %v1066_v55  ;;  %v8124_v56 = vadd.f32 %v10693_v53, %v1070_v21 }
 0x33d   :  { %5931 = vmatprep.subr.bf16.mxu0 %v9239_v38  ;;  %v9256_v38 = vld [vmem:[%s11997_s3 + $0x80] sm:$0xff]  }
 0x340   :  { %5932 = vmatpush1.bf16.msra.mxu0 %v9237_v11  ;;  %v9258_v11 = vld [vmem:[%s11997_s3 + $0x90] sm:$0xff]  }
 0x343   :  { %5934 = vmatmul.mubr.bf16.vlgmr.msra.gmra.mrb[0].mxu0 %v11699_v49  ;;  %v9241_v49 = vld [vmem:[%s11997_s3] sm:$0xff]  }
 0x344   :  { %8072 = vmatpush3.bf16.msra.mxu1 %v9241_v49  ;;  %v7694_v49 = vld [vmem:[%s11998_s4] ss:$0 sm:$0xff] }
 0x345   :  { %8073 = vmatprep.subr.bf16.mxu1 %v9242_v31 }
 0x348   :  { %8074 = vmatpush3.bf16.msra.mxu1 %v9243_v34 }
 0x349   :  { %8075 = vmatprep.subr.bf16.mxu1 %v9244_v22 }
 0x34c   :  { %8076 = vmatpush3.bf16.msra.mxu1 %v9245_v2 }
 0x34d   :  { %8077 = vmatprep.subr.bf16.mxu1 %v9246_v9 }
 0x350   :  { %8078 = vmatpush3.bf16.msra.mxu1 %v9247_v23 }
 0x351   :  { %8079 = vmatprep.subr.bf16.mxu1 %v9248_v41 }
 0x354   :  { %8080 = vmatpush3.bf16.msra.mxu1 %v9249_v18 }
 0x355   :  { %v8021_v12 = vpop.f32.mrb[56].mxu1  ;;  %8081 = vmatprep.subr.bf16.mxu1 %v9250_v43 }
 0x356   :  { %v8022_v37 = vpop.f32.mrb[57].mxu1 }
 0x357   :  { %v8023_v13 = vadd.f32 %v8022_v37, %v8021_v12  ;;  %v8024_v5 = vpop.f32.mrb[58].mxu1 }
 0x358   :  { %v8025_v14 = vpop.f32.mrb[59].mxu1  ;;  %8082 = vmatpush3.bf16.msra.mxu1 %v9251_v44  ;;  %v9260_v5 = vld [vmem:[%s11997_s3 + $0xa0] sm:$0xff]  }
 0x359   :  { %v6497_v17 = vadd.f32 %v8023_v13, %v6457_v10  ;;  %8083 = vmatprep.subr.bf16.mxu1 %v9252_v26  ;;  %v9257_v10 = vld [vmem:[%s11997_s3 + $0x88] sm:$0xff]   ;;  %v9259_v13 = vld [vmem:[%s11997_s3 + $0x98] sm:$0xff]  }
 0x35a   :  { %v9261_v14 = vld [vmem:[%s11997_s3 + $0xa8] sm:$0xff]  }
 0x35c   :  { %8084 = vmatpush3.bf16.msra.mxu1 %v9253_v45 }
 0x35d   :  { %8085 = vmatprep.subr.bf16.mxu1 %v9254_v46 }
 0x360   :  { %8086 = vmatpush3.bf16.msra.mxu1 %v9255_v47 }
 0x361   :  { %8102 = vmatprep.subr.bf16.mxu1 %v9277_v48 }
 0x375   :  { %v8043_v6 = vpop.f32.mrb[60].mxu1 }
 0x376   :  { %v8044_v25 = vpop.f32.mrb[61].mxu1 }
 0x377   :  { %v8045_v8 = vadd.f32 %v8044_v25, %v8043_v6  ;;  %v8046_v20 = vpop.f32.mrb[62].mxu1  ;;  %v9263_v25 = vld [vmem:[%s11997_s3 + $0xb8] sm:$0xff]  }
 0x378   :  { %v8047_v35 = vpop.f32.mrb[63].mxu1 }
 0x379   :  { %v6537_v62 = vadd.f32 %v8045_v8, %v6497_v17  ;;  %v9262_v17 = vld [vmem:[%s11997_s3 + $0xb0] sm:$0xff]  }
 0x395   :  { %v8065_v24 = vpop.f32.mrb[64].mxu1 }
 0x396   :  { %v8066_v28 = vpop.f32.mrb[65].mxu1 }
 0x397   :  { %v8067_v29 = vadd.f32 %v8066_v28, %v8065_v24  ;;  %v8068_v32 = vpop.f32.mrb[66].mxu1 }
 0x398   :  { %v8069_v39 = vpop.f32.mrb[67].mxu1 }
 0x399   :  { %v11902_v52 = vadd.f32 %v8067_v29, %v6537_v62 }
 0x39b   :  { %v7693_v33 = vmul.f32 -1.442695, %v11902_v52 }
 0x416   :  { %v5935_v57 = vpop.f32.mrb[0].mxu0 }
 0x417   :  { %v8123_v40 = vadd.f32 %v8122_v30, %v5935_v57  ;;  %v5937_v58 = vpop.f32.mrb[1].mxu0 }
 0x418   :  { %v8125_v15 = vadd.f32 %v8124_v56, %v5937_v58  ;;  %v5939_v16 = vpop.f32.mrb[2].mxu0 }
 0x419   :  { %v7691_v59 = vmul.f32 -1.442695, %v8123_v40  ;;  %v5940_v60 = vpop.f32.mrb[3].mxu0 }
 0x41a   :  { %v7692_v19 = vmul.f32 -1.442695, %v8125_v15 }
 0x41b   :  { %9264 = vpow2.f32 %v7691_v59 }
 0x41c   :  { %9266 = vpow2.f32 %v7692_v19 }
 0x425   :  { %v9265_v36 = vpop.eup %9264 }
 0x426   :  { %v9267_v61 = vpop.eup %9266  ;;  %v6591_v63 = vadd.f32 1.0, %v9265_v36 }
 0x427   :  { %v6592_v0 = vadd.f32 1.0, %v9267_v61 }
 0x428   :  { %9268 = vrcp.f32 %v6591_v63 }
 0x429   :  { %9270 = vrcp.f32 %v6592_v0 }
 0x42a   :  { %9272 = vpow2.f32 %v7693_v33 }
 0x432   :  { %v9269_v1 = vpop.eup %9268 }
 0x433   :  { %v9271_v53 = vpop.eup %9270  ;;  %v6600_v3 = vmul.f32 %v9269_v1, %v8123_v40 }
 0x434   :  { %v6601_v7 = vmul.f32 %v9271_v53, %v8125_v15  ;;  %v9273_v12 = vpop.eup %9272 }
 0x435   :  { %v6603_v50 = vpack.c.bf16 %v6600_v3, %v6600_v3  ;;  %v6593_v37 = vadd.f32 1.0, %v9273_v12 }
 0x436   :  { %v6604_v4 = vpack.c.bf16 %v6601_v7, %v6601_v7 }
 0x437   :  { %9274 = vrcp.f32 %v6593_v37 }
 0x438   :  { %6837 = vmatprep.mubr.bf16.mxu1 %v6604_v4 }
 0x439   :  { %6838 = vmatmul.mubr.bf16.vlgmr.msra.gmra.mrb[68].mxu1 %v6603_v50 }
 0x43a   :  { %8103 = vmatpush3.bf16.msra.mxu1 %v9256_v38  ;;  %8118 = vmatprep.mubr.msk.bf16.mxu1 %vm9278_vm0, %v9277_v48 }
 0x43b   :  { %8104 = vmatprep.subr.bf16.mxu1 %v9277_v48 }
 0x43e   :  { %8105 = vmatpush3.bf16.msra.mxu1 %v9257_v10 }
 0x43f   :  { %8106 = vmatprep.subr.bf16.mxu1 %v9277_v48 }
 0x441   :  { %v9275_v6 = vpop.eup %9274 }
 0x442   :  { %8107 = vmatpush3.bf16.msra.mxu1 %v9258_v11  ;;  %v6602_v8 = vmul.f32 %v9275_v6, %v11902_v52 }
 0x443   :  { %8108 = vmatprep.subr.bf16.mxu1 %v9277_v48 }
 0x444   :  { %v6605_v20 = vpack.c.bf16 %v6602_v8, %v6602_v8 }
 0x446   :  { %8109 = vmatpush3.bf16.msra.mxu1 %v9259_v13 }
 0x447   :  { %8110 = vmatprep.subr.bf16.mxu1 %v9277_v48 }
 0x44a   :  { %8111 = vmatpush3.bf16.msra.mxu1 %v9260_v5 }
 0x44b   :  { %8112 = vmatprep.subr.bf16.mxu1 %v9277_v48 }
 0x44e   :  { %8113 = vmatpush3.bf16.msra.mxu1 %v9261_v14 }
 0x44f   :  { %8114 = vmatprep.subr.bf16.mxu1 %v9277_v48 }
 0x452   :  { %8115 = vmatpush3.bf16.msra.mxu1 %v9262_v17 }
 0x453   :  { %8116 = vmatprep.subr.bf16.mxu1 %v9277_v48 }
 0x456   :  { %8117 = vmatpush3.bf16.msra.mxu1 %v9263_v25 }
 0x459   :  { %8119 = vmatmul.mubr.bf16.vlgmr.msra.gmra.mrb[72].mxu1 %v6605_v20 }
 0x50c   :  { %v8087_v35 = vpop.f32.mrb[68].mxu1 }
 0x50d   :  { %v8088_v62 = vpop.f32.mrb[69].mxu1 }
 0x50e   :  { %v8089_v24 = vadd.f32 %v8088_v62, %v8087_v35  ;;  %v8090_v27 = vpop.f32.mrb[70].mxu1 }
 0x50f   :  { %v8091_v28 = vpop.f32.mrb[71].mxu1 }
 0x510   :  { %v6840_v29 = vadd.f32 %v8089_v24, %v7694_v49 }
 0x52c   :  { %v6879_v31 = vpop.f32.mrb[72].mxu1 }
 0x52d   :  { %v6880_v32 = vadd.f32 %v6879_v31, %v6840_v29  ;;  %v8120_v34 = vpop.f32.mrb[73].mxu1 }
 0x52e   :  { %v6882_v39 = vpop.f32.mrb[74].mxu1 }
 0x52f   :  { %v6885_v52 = vpack.c.bf16 %v6880_v32, %v6880_v32  ;;  %v8121_v22 = vpop.f32.mrb[75].mxu1 }
 0x531   :  { %6886 = vst [vmem:[%s11999_s5] sm:$0xf] %v6885_v52 }

</bundles_post_ra>
